<compile_context>
chip_gen: v5e
topology: v5e:2x2
jax: 0.10.0
libtpu: 0.0.40
codegen_flags: <defaults>
</compile_context>

<pallas_src>
import jax
import jax.numpy as jnp
import numpy as np
from jax import lax
from jax.experimental import pallas as pl
from jax.experimental.pallas import tpu as pltpu

N_KEEP = 2          # n in "2:4"
M_BLOCK = 4         # m in "2:4"
_VMEM_LIMIT = 48 * 1024 * 1024   # conservative for v7x (64 MiB physical VMEM)


# --------------------------------------------------------------------------
# Phase 1: one-shot prologue — build masked bf16 weight.
# --------------------------------------------------------------------------
def _mask_weight_kernel(w_ref, l_ref, o_ref):
    """One (tn, tk) tile of the masked bf16 weight.

    w_ref : (tn, tk) f32  original weight tile (PyTorch (out, in) layout)
    l_ref : (tn, tk) f32  mask-logits tile (same layout)
    o_ref : (tn, tk) bf16 masked weight tile
    """
    logits = l_ref[...]
    tk = logits.shape[-1]

    col = lax.broadcasted_iota(jnp.int32, (1, tk), 1)   # lane index in tile
    blk = col >> 2                                      # 4-element block id

    # For every logit, count how many of its 3 block-mates beat it (strictly
    # larger, or equal with a lower flat index).  Six rotations cover the
    # displacements {+-1, +-2, +-3}; rolling the lane-index iota alongside the
    # logits gives each value's source lane, so block membership and the
    # tie-break are exact independently of rotate direction / wraparound.
    beat_cnt = jnp.zeros(logits.shape, dtype=jnp.int32)
    for sh in (1, 2, 3, tk - 3, tk - 2, tk - 1):
        l_s = pltpu.roll(logits, shift=sh, axis=1)      # XLU lane rotate
        c_s = pltpu.roll(col, shift=sh, axis=1)
        same_blk = (c_s >> 2) == blk                    # (1, tk)
        beats = same_blk & ((l_s > logits) |
                            ((c_s < col) & (l_s == logits)))
        beat_cnt = beat_cnt + beats.astype(jnp.int32)

    keep = beat_cnt < N_KEEP                            # hard top-2-of-4
    o_ref[...] = jnp.where(keep, w_ref[...], 0.0).astype(jnp.bfloat16)


# --------------------------------------------------------------------------
# Phase 2: plain bf16 tiled matmul + bias (MXU/DMA bound).
# --------------------------------------------------------------------------
def _matmul_bias_kernel(x_ref, w_ref, b_ref, o_ref):
    """x_ref (tm,tk) bf16, w_ref (tn,tk) bf16, b_ref (1,tn) f32, o_ref (tm,tn) f32."""
    k = pl.program_id(2)
    partial = lax.dot_general(
        x_ref[...], w_ref[...],
        dimension_numbers=(((1,), (1,)), ((), ())),
        preferred_element_type=jnp.float32)

    @pl.when(k == 0)
    def _init():                                  # bias-init; no scratch acc
        o_ref[...] = b_ref[...] + partial

    @pl.when(k > 0)
    def _acc():
        o_ref[...] = o_ref[...] + partial


# --------------------------------------------------------------------------
# Wrappers
# --------------------------------------------------------------------------
def _pick_tile(dim, candidates):
    for c in candidates:
        if c <= dim and dim % c == 0:
            return c
    return dim  # full dim is always a legal block extent


def build_masked_weight(weight, mask_logits, *, tn=None, tk=None):
    """Streams W + logits once; returns the 2:4-masked weight in bf16."""
    out_f, in_f = weight.shape
    assert mask_logits.size == out_f * in_f and in_f % M_BLOCK == 0
    # Contiguous groups of 4 of the row-major flattened weight == groups of 4
    # along in_features; this reshape is free (no data movement).
    logits2d = mask_logits.reshape(out_f, in_f).astype(jnp.float32)

    if tn is None:
        tn = _pick_tile(out_f, (512, 256, 128))
    if tk is None:
        tk = _pick_tile(in_f, (1024, 512, 256, 128))
    assert out_f % tn == 0 and in_f % tk == 0
    assert tk % M_BLOCK == 0, "in-feature tile must not split 4-element blocks"

    return pl.pallas_call(
        _mask_weight_kernel,
        out_shape=jax.ShapeDtypeStruct((out_f, in_f), jnp.bfloat16),
        grid=(out_f // tn, in_f // tk),
        in_specs=[pl.BlockSpec((tn, tk), lambda i, j: (i, j)),   # weight
                  pl.BlockSpec((tn, tk), lambda i, j: (i, j))],  # logits
        out_specs=pl.BlockSpec((tn, tk), lambda i, j: (i, j)),
        compiler_params=pltpu.CompilerParams(
            dimension_semantics=("parallel", "parallel"),
            vmem_limit_bytes=_VMEM_LIMIT),
    )(weight.astype(jnp.float32), logits2d)


def hds_linear(x, weight, bias, mask_logits, *, tm=None, tn=None, tk=None,
               prologue_tn=None, prologue_tk=None):
    """HDSLayer(eval).forward for a wrapped nn.Linear, via two Pallas kernels.

    x:            (B, in_features)       float32
    weight:       (out_features, in_f)   float32 (PyTorch layout)
    bias:         (out_features,)        float32
    mask_logits:  (num_blocks, 4)        float32, num_blocks = out*in // 4
    """
    B, in_f = x.shape
    out_f, in_f2 = weight.shape
    assert in_f == in_f2 and in_f % M_BLOCK == 0
    assert mask_logits.size == out_f * in_f

    # Phase 1: masked bf16 weight (one pass over W + logits).
    w_masked = build_masked_weight(weight, mask_logits,
                                   tn=prologue_tn, tk=prologue_tk)

    # Phase 2: bf16 matmul + bias.
    x_bf16 = x.astype(jnp.bfloat16)
    bias2d = bias.reshape(1, out_f).astype(jnp.float32)

    if tm is None:
        tm = _pick_tile(B, (512, 256, 128, 64, 32, 16, 8))
    if tn is None:
        tn = _pick_tile(out_f, (512, 256, 128))
    if tk is None:
        tk = _pick_tile(in_f, (1024, 512, 256, 128))
    assert B % tm == 0 and out_f % tn == 0 and in_f % tk == 0

    grid = (B // tm, out_f // tn, in_f // tk)
    return pl.pallas_call(
        _matmul_bias_kernel,
        out_shape=jax.ShapeDtypeStruct((B, out_f), jnp.float32),
        grid=grid,
        in_specs=[pl.BlockSpec((tm, tk), lambda i, j, k: (i, k)),   # x (bf16)
                  pl.BlockSpec((tn, tk), lambda i, j, k: (j, k)),   # masked W
                  pl.BlockSpec((1, tn), lambda i, j, k: (0, j))],   # bias
        out_specs=pl.BlockSpec((tm, tn), lambda i, j, k: (i, j)),
        compiler_params=pltpu.CompilerParams(
            dimension_semantics=("parallel", "parallel", "arbitrary"),
            vmem_limit_bytes=_VMEM_LIMIT),
    )(x_bf16, w_masked, bias2d)


# --------------------------------------------------------------------------
# Pure-JAX reference (same semantics: hard 2:4 top-k mask, f32 math).
# --------------------------------------------------------------------------
def _mask_ref(mask_logits, out_f, in_f):
    blk = mask_logits.reshape(-1, M_BLOCK)
    gt = blk[:, None, :] > blk[:, :, None]                         # l_j > l_i
    eq = (blk[:, None, :] == blk[:, :, None]) & \
         (jnp.arange(M_BLOCK)[None, :] < jnp.arange(M_BLOCK)[:, None])[None]
    rank = (gt | eq).sum(-1)
    return (rank < N_KEEP).astype(jnp.float32).reshape(out_f, in_f)


def hds_linear_ref(x, weight, bias, mask_logits):
    out_f, in_f = weight.shape
    mask = _mask_ref(mask_logits, out_f, in_f)
    return x @ (weight * mask).T + bias


if __name__ == "__main__":
    B, in_f, out_f = 8, 512, 256
    num_blocks = (out_f * in_f) // M_BLOCK

    key = jax.random.PRNGKey(0)
    kx, kw, kb, kl = jax.random.split(key, 4)
    x = jax.random.normal(kx, (B, in_f), dtype=jnp.float32)
    weight = jax.random.normal(kw, (out_f, in_f), dtype=jnp.float32) * 0.1
    bias = jax.random.normal(kb, (out_f,), dtype=jnp.float32) * 0.01
    # GumbelTopK mask_logits: N(0, 0.1), one (4,)-vector per block.
    mask_logits = jax.random.normal(kl, (num_blocks, M_BLOCK), dtype=jnp.float32) * 0.1

    # Check the prologue masked-weight kernel against the reference mask.
    w_masked = jax.block_until_ready(
        build_masked_weight(weight, mask_logits, tn=128, tk=256))
    w_masked_ref = (weight * _mask_ref(mask_logits, out_f, in_f)).astype(jnp.bfloat16)
    np.testing.assert_allclose(np.asarray(w_masked.astype(jnp.float32)),
                               np.asarray(w_masked_ref.astype(jnp.float32)),
                               rtol=0.0, atol=1e-6)

    # End-to-end: small tiles so the demo exercises the multi-step (j, k) grid,
    # the bias-init at k==0 and the direct-into-output accumulation path.
    out = hds_linear(x, weight, bias, mask_logits,
                     tm=8, tn=128, tk=256, prologue_tn=128, prologue_tk=256)
    out = jax.block_until_ready(out)

    ref = hds_linear_ref(x, weight, bias, mask_logits)
    # bf16 MXU inputs with f32 accumulation -> relaxed tolerance vs f32 ref.
    np.testing.assert_allclose(np.asarray(out), np.asarray(ref),
                               rtol=5e-2, atol=5e-2)

    print("KERNEL_OK")
</pallas_src>

<mosaic_0001>
module attributes {stable_mosaic.version = 11 : i64} {
  func.func @_mask_weight_kernel(%arg0: i32, %arg1: i32, %arg2: memref<128x256xf32, #tpu.memory_space<vmem>>, %arg3: memref<128x256xf32, #tpu.memory_space<vmem>>, %arg4: memref<128x256xbf16, #tpu.memory_space<vmem>>) attributes {dimension_semantics = [#tpu.dimension_semantics<parallel>, #tpu.dimension_semantics<parallel>], iteration_bounds = array<i64: 2, 2>, scalar_prefetch = 0 : i64, scratch_operands = 0 : i64, tpu.core_type = #tpu.core_type<tc>, window_params = [{transform_indices = @transform_0, window_bounds = array<i64: 128, 256>}, {transform_indices = @transform_1, window_bounds = array<i64: 128, 256>}, {transform_indices = @transform_2, window_bounds = array<i64: 128, 256>}]} {
    %c0 = arith.constant 0 : index
    %c0_0 = arith.constant 0 : index
    %0 = vector.load %arg3[%c0, %c0_0] : memref<128x256xf32, #tpu.memory_space<vmem>>, vector<128x256xf32>
    %1 = tpu.iota {dimensions = array<i32: 1>} : vector<1x256xi32>
    %c2_i32 = arith.constant 2 : i32
    %2 = vector.broadcast %c2_i32 : i32 to vector<1x256xi32>
    %3 = arith.shrsi %1, %2 : vector<1x256xi32>
    %c0_i32 = arith.constant 0 : i32
    %4 = vector.broadcast %c0_i32 : i32 to vector<128x256xi32>
    %c1_i32 = arith.constant 1 : i32
    %5 = tpu.dynamic_rotate %0 by %c1_i32 dim 1 : vector<128x256xf32>, i32 -> vector<128x256xf32>
    %c1_i32_1 = arith.constant 1 : i32
    %6 = tpu.dynamic_rotate %1 by %c1_i32_1 dim 1 : vector<1x256xi32>, i32 -> vector<1x256xi32>
    %c2_i32_2 = arith.constant 2 : i32
    %7 = vector.broadcast %c2_i32_2 : i32 to vector<1x256xi32>
    %8 = arith.shrsi %6, %7 : vector<1x256xi32>
    %9 = arith.cmpi eq, %8, %3 : vector<1x256xi32>
    %10 = arith.cmpf ogt, %5, %0 : vector<128x256xf32>
    %11 = arith.cmpi slt, %6, %1 : vector<1x256xi32>
    %12 = arith.cmpf oeq, %5, %0 : vector<128x256xf32>
    %13 = vector.broadcast %11 : vector<1x256xi1> to vector<128x256xi1>
    %14 = arith.andi %13, %12 : vector<128x256xi1>
    %15 = arith.ori %10, %14 : vector<128x256xi1>
    %16 = vector.broadcast %9 : vector<1x256xi1> to vector<128x256xi1>
    %17 = arith.andi %16, %15 : vector<128x256xi1>
    %18 = arith.extui %17 : vector<128x256xi1> to vector<128x256xi32>
    %19 = arith.addi %4, %18 : vector<128x256xi32>
    %c2_i32_3 = arith.constant 2 : i32
    %20 = tpu.dynamic_rotate %0 by %c2_i32_3 dim 1 : vector<128x256xf32>, i32 -> vector<128x256xf32>
    %c2_i32_4 = arith.constant 2 : i32
    %21 = tpu.dynamic_rotate %1 by %c2_i32_4 dim 1 : vector<1x256xi32>, i32 -> vector<1x256xi32>
    %c2_i32_5 = arith.constant 2 : i32
    %22 = vector.broadcast %c2_i32_5 : i32 to vector<1x256xi32>
    %23 = arith.shrsi %21, %22 : vector<1x256xi32>
    %24 = arith.cmpi eq, %23, %3 : vector<1x256xi32>
    %25 = arith.cmpf ogt, %20, %0 : vector<128x256xf32>
    %26 = arith.cmpi slt, %21, %1 : vector<1x256xi32>
    %27 = arith.cmpf oeq, %20, %0 : vector<128x256xf32>
    %28 = vector.broadcast %26 : vector<1x256xi1> to vector<128x256xi1>
    %29 = arith.andi %28, %27 : vector<128x256xi1>
    %30 = arith.ori %25, %29 : vector<128x256xi1>
    %31 = vector.broadcast %24 : vector<1x256xi1> to vector<128x256xi1>
    %32 = arith.andi %31, %30 : vector<128x256xi1>
    %33 = arith.extui %32 : vector<128x256xi1> to vector<128x256xi32>
    %34 = arith.addi %19, %33 : vector<128x256xi32>
    %c3_i32 = arith.constant 3 : i32
    %35 = tpu.dynamic_rotate %0 by %c3_i32 dim 1 : vector<128x256xf32>, i32 -> vector<128x256xf32>
    %c3_i32_6 = arith.constant 3 : i32
    %36 = tpu.dynamic_rotate %1 by %c3_i32_6 dim 1 : vector<1x256xi32>, i32 -> vector<1x256xi32>
    %c2_i32_7 = arith.constant 2 : i32
    %37 = vector.broadcast %c2_i32_7 : i32 to vector<1x256xi32>
    %38 = arith.shrsi %36, %37 : vector<1x256xi32>
    %39 = arith.cmpi eq, %38, %3 : vector<1x256xi32>
    %40 = arith.cmpf ogt, %35, %0 : vector<128x256xf32>
    %41 = arith.cmpi slt, %36, %1 : vector<1x256xi32>
    %42 = arith.cmpf oeq, %35, %0 : vector<128x256xf32>
    %43 = vector.broadcast %41 : vector<1x256xi1> to vector<128x256xi1>
    %44 = arith.andi %43, %42 : vector<128x256xi1>
    %45 = arith.ori %40, %44 : vector<128x256xi1>
    %46 = vector.broadcast %39 : vector<1x256xi1> to vector<128x256xi1>
    %47 = arith.andi %46, %45 : vector<128x256xi1>
    %48 = arith.extui %47 : vector<128x256xi1> to vector<128x256xi32>
    %49 = arith.addi %34, %48 : vector<128x256xi32>
    %c253_i32 = arith.constant 253 : i32
    %50 = tpu.dynamic_rotate %0 by %c253_i32 dim 1 : vector<128x256xf32>, i32 -> vector<128x256xf32>
    %c253_i32_8 = arith.constant 253 : i32
    %51 = tpu.dynamic_rotate %1 by %c253_i32_8 dim 1 : vector<1x256xi32>, i32 -> vector<1x256xi32>
    %c2_i32_9 = arith.constant 2 : i32
    %52 = vector.broadcast %c2_i32_9 : i32 to vector<1x256xi32>
    %53 = arith.shrsi %51, %52 : vector<1x256xi32>
    %54 = arith.cmpi eq, %53, %3 : vector<1x256xi32>
    %55 = arith.cmpf ogt, %50, %0 : vector<128x256xf32>
    %56 = arith.cmpi slt, %51, %1 : vector<1x256xi32>
    %57 = arith.cmpf oeq, %50, %0 : vector<128x256xf32>
    %58 = vector.broadcast %56 : vector<1x256xi1> to vector<128x256xi1>
    %59 = arith.andi %58, %57 : vector<128x256xi1>
    %60 = arith.ori %55, %59 : vector<128x256xi1>
    %61 = vector.broadcast %54 : vector<1x256xi1> to vector<128x256xi1>
    %62 = arith.andi %61, %60 : vector<128x256xi1>
    %63 = arith.extui %62 : vector<128x256xi1> to vector<128x256xi32>
    %64 = arith.addi %49, %63 : vector<128x256xi32>
    %c254_i32 = arith.constant 254 : i32
    %65 = tpu.dynamic_rotate %0 by %c254_i32 dim 1 : vector<128x256xf32>, i32 -> vector<128x256xf32>
    %c254_i32_10 = arith.constant 254 : i32
    %66 = tpu.dynamic_rotate %1 by %c254_i32_10 dim 1 : vector<1x256xi32>, i32 -> vector<1x256xi32>
    %c2_i32_11 = arith.constant 2 : i32
    %67 = vector.broadcast %c2_i32_11 : i32 to vector<1x256xi32>
    %68 = arith.shrsi %66, %67 : vector<1x256xi32>
    %69 = arith.cmpi eq, %68, %3 : vector<1x256xi32>
    %70 = arith.cmpf ogt, %65, %0 : vector<128x256xf32>
    %71 = arith.cmpi slt, %66, %1 : vector<1x256xi32>
    %72 = arith.cmpf oeq, %65, %0 : vector<128x256xf32>
    %73 = vector.broadcast %71 : vector<1x256xi1> to vector<128x256xi1>
    %74 = arith.andi %73, %72 : vector<128x256xi1>
    %75 = arith.ori %70, %74 : vector<128x256xi1>
    %76 = vector.broadcast %69 : vector<1x256xi1> to vector<128x256xi1>
    %77 = arith.andi %76, %75 : vector<128x256xi1>
    %78 = arith.extui %77 : vector<128x256xi1> to vector<128x256xi32>
    %79 = arith.addi %64, %78 : vector<128x256xi32>
    %c255_i32 = arith.constant 255 : i32
    %80 = tpu.dynamic_rotate %0 by %c255_i32 dim 1 : vector<128x256xf32>, i32 -> vector<128x256xf32>
    %c255_i32_12 = arith.constant 255 : i32
    %81 = tpu.dynamic_rotate %1 by %c255_i32_12 dim 1 : vector<1x256xi32>, i32 -> vector<1x256xi32>
    %c2_i32_13 = arith.constant 2 : i32
    %82 = vector.broadcast %c2_i32_13 : i32 to vector<1x256xi32>
    %83 = arith.shrsi %81, %82 : vector<1x256xi32>
    %84 = arith.cmpi eq, %83, %3 : vector<1x256xi32>
    %85 = arith.cmpf ogt, %80, %0 : vector<128x256xf32>
    %86 = arith.cmpi slt, %81, %1 : vector<1x256xi32>
    %87 = arith.cmpf oeq, %80, %0 : vector<128x256xf32>
    %88 = vector.broadcast %86 : vector<1x256xi1> to vector<128x256xi1>
    %89 = arith.andi %88, %87 : vector<128x256xi1>
    %90 = arith.ori %85, %89 : vector<128x256xi1>
    %91 = vector.broadcast %84 : vector<1x256xi1> to vector<128x256xi1>
    %92 = arith.andi %91, %90 : vector<128x256xi1>
    %93 = arith.extui %92 : vector<128x256xi1> to vector<128x256xi32>
    %94 = arith.addi %79, %93 : vector<128x256xi32>
    %c2_i32_14 = arith.constant 2 : i32
    %95 = vector.broadcast %c2_i32_14 : i32 to vector<128x256xi32>
    %96 = arith.cmpi slt, %94, %95 : vector<128x256xi32>
    %c0_15 = arith.constant 0 : index
    %c0_16 = arith.constant 0 : index
    %97 = vector.load %arg2[%c0_15, %c0_16] : memref<128x256xf32, #tpu.memory_space<vmem>>, vector<128x256xf32>
    %cst = arith.constant 0.000000e+00 : f32
    %98 = vector.broadcast %cst : f32 to vector<128x256xf32>
    %99 = arith.select %96, %97, %98 : vector<128x256xi1>, vector<128x256xf32>
    %100 = arith.truncf %99 : vector<128x256xf32> to vector<128x256xbf16>
    %c0_17 = arith.constant 0 : index
    %c0_18 = arith.constant 0 : index
    %101 = vector.load %arg4[%c0_17, %c0_18] : memref<128x256xbf16, #tpu.memory_space<vmem>>, vector<128x256xbf16>
    tpu.vector_store %arg4[%c0_17, %c0_18], %100 {strides = array<i32>} : memref<128x256xbf16, #tpu.memory_space<vmem>>, vector<128x256xbf16>,
    return
  }
  func.func @transform_0(%arg0: i32, %arg1: i32) -> (i32, i32) {
    %c0_i32 = arith.constant 0 : i32
    return %arg0, %arg1 : i32, i32
  }
  func.func @transform_1(%arg0: i32, %arg1: i32) -> (i32, i32) {
    %c0_i32 = arith.constant 0 : i32
    return %arg0, %arg1 : i32, i32
  }
  func.func @transform_2(%arg0: i32, %arg1: i32) -> (i32, i32) {
    %c0_i32 = arith.constant 0 : i32
    return %arg0, %arg1 : i32, i32
  }
}

</mosaic_0001>

<bundles_post_ra>
// kernel: tpu_custom_call.1
= control target key start
LH: loop header
LB: loop body
LE: loop exit
PB: predicated region body
PF: predicated region fallthrough
CT: control target
= control target key end

     0   :  { %s8690_s0 = inlined_call_operand.hbm [shape: f32[256,512], index: 0, kind: input, shape index: {}]   ;;  %s8691_s1 = inlined_call_operand.hbm [shape: f32[256,512], index: 1, kind: input, shape index: {}]   ;;  %s8692_s2 = inlined_call_operand.hbm [shape: bf16[256,512], index: 2, kind: output, shape index: {}]  }
   0x1   :  { %9133 = sst [smem:[#allocation148_spill]] %s8690_s0 }
   0x2   :  { %7 = vsyncpa [#allocation3], 0 }
   0x3   :  { %9 = vsyncpa [#allocation3 + $0x1], 0 }
   0x4   :  { %10 = vsyncpa [#allocation6], 0 }
   0x5   :  { %12 = vsyncpa [#allocation6 + $0x1], 0 }
   0x6   :  { %13 = vsyncpa [#allocation4], 0 }
   0x7   :  { %15 = vsyncpa [#allocation4 + $0x1], 0  ;;  %s2955_s9 = smov 0   ;;  %s2957_s10 = smov 0  }
   0x8   :  { %s2959_s11 = smov 0   ;;  %s2961_s12 = smov 0  }
   0x9   :  { %s2963_s13 = smov 0   ;;  %s2965_s14 = smov 0  }
   0xa   :  { %s2967_s15 = smov 0   ;;  %s2969_s16 = smov 0  }
   0xb LB: > { %9134 = sst [smem:[#allocation11_spill]] %s2921_s15  ;;  %s2574_s17 = sadd.s32 4294967295, %s2925_s16   ;;  %s2925_s16 = sphi %s2969_s16, %s21_s16   ;;  %s2921_s15 = sphi %s2967_s15, %s10784_s15   ;;  %s2917_s14 = sphi %s2965_s14, %s10789_s14   ;;  %s2913_s13 = sphi %s2963_s13, %s10782_s13   ;;  %s2909_s12 = sphi %s2961_s12, %s10788_s12   ;;  %s2905_s11 = sphi %s2959_s11, %s10787_s11   ;;  %s2901_s10 = sphi %s2957_s10, %s10786_s10   ;;  %s2897_s9 = sphi %s2955_s9, %s10785_s9  }
   0xc   : > { %s2575_s18 = sadd.s32 4294967294, %s2925_s16   ;;  %s30_s19 = sadd.s32 1, %s2917_s14 }
   0xd   : > { %s33_s20 = sadd.s32 1, %s2921_s15  ;;  %p31_p0 = scmp.ge.s32.totalorder %s30_s19, 2 }
   0xe   : > { %s42_s21 = sadd.s32 1, %s2905_s11  ;;  %p49_p1 = scmp.ne.s32.totalorder %s2905_s11, %s2901_s10 }
   0xf   : > { %p50_p2 = scmp.eq.s32.totalorder %s2925_s16, 0  ;;  %s10791_s19 = smov (%p31_p0, %s30_s19), 0 }
  0x10   : > { %9135 = sst [smem:[#allocation12_spill]] %s10791_s19  ;;  %s10793_s20 = smov (!%p31_p0, %s33_s20), %s2921_s15 }
  0x11   : > { %s38_s22 = ssub.s32 %s2917_s14, %s10791_s19  ;;  %p3008_p3 = por %p50_p2, %p49_p1 }
  0x12   : > { %p35_p4 = scmp.ge.s32.totalorder %s10793_s20, 2  ;;  %p55_p5 = scmp.ne.s32.totalorder %s2901_s10, %s2897_s9 }
  0x13   : > { %p56_p6 = scmp.eq.s32.totalorder %s2574_s17, 0  ;;  %p109_p7 = scmp.eq.s32.totalorder %s2574_s17, 3 }
  0x14   : > { %s10795_s20 = smov (%p35_p4, %s10793_s20), 0  ;;  %p115_p10 = scmp.eq.s32.totalorder %s2575_s18, 3 }
  0x15   : > { %9137 = sst [smem:[#allocation13_spill]] %s10795_s20  ;;  %p3016_p8 = por %p56_p6, %p55_p5 }
  0x16   : > { %p3020_p9 = por %p109_p7, %p49_p1  ;;  %s37_s26 = ssub.s32 %s2921_s15, %s10795_s20 }
  0x17   : > { %s39_s27 = sor.u32 %s38_s22, %s37_s26  ;;  %p3026_p12 = por %p115_p10, %p55_p5 }
  0x18   : > { %p40_p11 = scmp.eq.s32.totalorder %s39_s27, 0  ;;  %p2619_p13 = scmp.lt.s32.totalorder %s2925_s16, 4 }
  0x19   : > { %s3032_s29 = sand.u32 1, %s2905_s11   ;;  %s2580_s4 = sshll.u32 %s2917_s14, 1 }
  0x1a   : > { %s3035_s30 = scalar_select %p40_p11, %s2905_s11, %s42_s21  }
  0x1b   : > { %s2578_s3 = sshll.u32 %s3032_s29, 8  ;;  %s2599_s5 = sshll.u32 %s2921_s15, 6 }
  0x1c   : > { %s139_s6 = scalar_lea.vmem [#allocation2], %s2578_s3  ;;  %s145_s8 = sadd.s32 %s2599_s5, %s2580_s4 }
  0x1d   : > { %s150_s7 = sshll.u32 %s139_s6, 4  ;;  %s2582_s17 = sshll.u32 %s145_s8, 3  ;;  %s151_s7 = int_to_ptr.vmem [resolvable:$true] %s150_s7 }
  0x1e   : > { %p3042_p0 = pnand %p2619_p13, %p3008_p3  ;;  %s9142_s0 = sld [smem:[#allocation148_spill]] }
  0x1f   : > { %p2588_p1 = scmp.ge.s32.totalorder %s2925_s16, 1  ;;  %s136_s20 = scalar_lea.sflag [#allocation3], %s3032_s29 }
  0x20   : > { %s2927_s6 = smov 512   ;;  %s2928_s4 = smov 256  }
  0x21   : > { %s2929_s5 = smov 16   ;;  %p183_p2 = scmp.lt.s32.totalorder %s2925_s16, 5 }
  0x22   : > { %s172_s19 = scalar_lea.hbm %s8691_s1, %s2582_s17  ;;  %s164_s26 = scalar_lea.vmem [#allocation5], %s2578_s3 }
  0x23   : > { %p184_p3 = pnand %p2588_p1, %p183_p2  ;;  %s173_s22 = sshll.u32 %s172_s19, 4  ;;  %s174_s22 = int_to_ptr.hbm [resolvable:$true] %s173_s22 }
  0x24   : > { %s147_s21 = scalar_lea.hbm %s9142_s0, %s2582_s17  ;;  %s161_s0 = scalar_lea.sflag [#allocation6], %s3032_s29 }
  0x25   : > { %s148_s27 = sshll.u32 %s147_s21, 4  ;;  %s175_s21 = sshll.u32 %s164_s26, 4  ;;  %s149_s27 = int_to_ptr.hbm [resolvable:$true] %s148_s27  ;;  %s176_s21 = int_to_ptr.vmem [resolvable:$true] %s175_s21 }
  0x26   : > { %2611 = dma.hbm_to_vmem [thread:$0]  (!%p3042_p0), %s149_s27, 4096, %s151_s7, %s136_s20, %s2927_s6, %s2928_s4, %s2929_s5  }
  0x27   : > { %2614 = dma.hbm_to_vmem [thread:$0]  (!%p3042_p0), %s174_s22, 4096, %s176_s21, %s161_s0, %s2927_s6, %s2928_s4, %s2929_s5  }
  0x28   : > { %187 = sbr.rel (%p184_p3) target bundleno = 1109 (0x455), region = 28 }
  0x2d   : > { %s3061_s15 = sand.u32 1, %s2901_s10  }
  0x2e   : > { %s2589_s20 = sshll.u32 %s3061_s15, 8  ;;  %s190_s7 = scalar_lea.sflag [#allocation3], %s3061_s15 }
  0x2f   : > { %s3065_s27 = scalar_lea.vmem [#allocation2], %s2589_s20 }
  0x30   : > { %2884 = dma.done.wait (%p3016_p8), %s190_s7, 4096  }
  0x31   : > { %2886 = vsyncadd (%p3016_p8), %s190_s7, 4294963200  ;;  %s200_s19 = scalar_lea.sflag [#allocation6], %s3061_s15  ;;  %s3072_s0 = scalar_lea.vmem [#allocation5], %s2589_s20 }
  0x32   : > { %2888 = dma.done.wait (%p3016_p8), %s200_s19, 4096  }
  0x33   : > { %2890 = vsyncadd (%p3016_p8), %s200_s19, 4294963200  ;;  %v3079_v0 = vld [vmem:[%s3072_s0 + $0x40] sm:$0xff]  ;;  %s2930_s29 = smov 1   ;;  %v3094_v3 = vld [vmem:[%s3072_s0 + $0x50] sm:$0xff]  ;;  %v268_v30 = vlaneseq  ;;  %s2931_s24 = smov 2  }
  0x34   : > { %v3082_v1 = vld [vmem:[%s3072_s0 + $0x20] sm:$0xff]  ;;  %281 = vrot.lane.b32.xlu2 %v3079_v0, %s2930_s29  ;;  %v3097_v4 = vld [vmem:[%s3072_s0 + $0x30] sm:$0xff]  ;;  %v3154_v15 = vld [vmem:[%s3072_s0 + $0x18] sm:$0xff]  ;;  %s2932_s3 = smov 3   ;;  %s2933_s17 = smov 125  }
  0x35   : > { %v3085_v2 = vld [vmem:[%s3072_s0] sm:$0xff]  ;;  %277 = vrot.lane.b32.xlu1 %v3082_v1, %s2930_s29  ;;  %v3100_v5 = vld [vmem:[%s3072_s0 + $0x10] sm:$0xff]  ;;  %v3157_v16 = vld [vmem:[%s3072_s0 + $0x8] sm:$0xff]  ;;  %v3228_v31 = vand.u32 127, %v268_v30  ;;  %s2934_s18 = smov 126   ;;  %s2936_s6 = smov 127  }
  0x36   : > { %273 = vrot.lane.b32.xlu0 %v3085_v2, %s2930_s29  ;;  %v3109_v6 = vld [vmem:[%s3072_s0 + $0x80] sm:$0xff]  ;;  %v3112_v7 = vld [vmem:[%s3072_s0 + $0x70] sm:$0xff]  ;;  %v3169_v18 = vld [vmem:[%s3072_s0 + $0x48] sm:$0xff]  ;;  %s2591_s4 = sshll.u32 %s3061_s15, 7  ;;  %s2594_s23 = sshll.u32 %s2909_s12, 1 }
  0x37   : > { %v3115_v8 = vld [vmem:[%s3072_s0 + $0x60] sm:$0xff]  ;;  %v3124_v9 = vld [vmem:[%s3072_s0 + $0xb0] sm:$0xff]  ;;  %9143 = vst [vmem:[#allocation14_spill] sm:$0xff] %v3169_v18  ;;  %v3172_v19 = vld [vmem:[%s3072_s0 + $0x38] sm:$0xff]  ;;  %v3243_v34 = vadd.s32 128, %v3228_v31  ;;  %vm8781_vm0 = vcmp.lt.s32.totalorder %v3228_v31, 2 }
  0x38   : > { %v3127_v10 = vld [vmem:[%s3072_s0 + $0xa0] sm:$0xff]  ;;  %v3130_v11 = vld [vmem:[%s3072_s0 + $0x90] sm:$0xff]  ;;  %v3175_v20 = vld [vmem:[%s3072_s0 + $0x28] sm:$0xff]  ;;  %vm8775_vm1 = vcmp.lt.s32.totalorder %v3228_v31, 3  ;;  %vm8774_vm2 = vcmp.lt.s32.totalorder %v3228_v31, 1  ;;  %s7669_s5 = scalar_lea.vmem [#allocation7], %s2591_s4 }
  0x39   : > { %v3139_v12 = vld [vmem:[%s3072_s0 + $0xe0] sm:$0xff]  ;;  %v3142_v13 = vld [vmem:[%s3072_s0 + $0xd0] sm:$0xff]  ;;  %v3184_v21 = vld [vmem:[%s3072_s0 + $0x78] sm:$0xff]  ;;  %9145 = vst [vmem:[#allocation16_spill] sm:$0xff] %v3243_v34  ;;  %s2601_s8 = sshll.u32 %s2913_s13, 6  ;;  %s2455_s20 = sshll.u32 %s7669_s5, 4  ;;  %s2456_s20 = int_to_ptr.vmem [resolvable:$true] %s2455_s20 }
  0x3a   : > { %v3145_v14 = vld [vmem:[%s3072_s0 + $0xc0] sm:$0xff]  ;;  %v3160_v17 = vld [vmem:[%s3072_s0 + $0xf0] sm:$0xff]  ;;  %9144 = vst [vmem:[#allocation15_spill] sm:$0xff] %v3184_v21  ;;  %v3187_v22 = vld [vmem:[%s3072_s0 + $0x68] sm:$0xff]  ;;  %s2452_s22 = sadd.s32 %s2601_s8, %s2594_s23  ;;  %s2440_s19 = scalar_lea.sflag [#allocation4], %s3061_s15 }
  0x3b   : > { %v3190_v23 = vld [vmem:[%s3072_s0 + $0x58] sm:$0xff]  ;;  %v3199_v24 = vld [vmem:[%s3072_s0 + $0xa8] sm:$0xff]  ;;  %s2596_s12 = sshll.u32 %s2452_s22, 2 }
  0x3c   : > { %283 = vrot.lane.b32.xlu2 %v3094_v3, %s2930_s29  ;;  %v3202_v25 = vld [vmem:[%s3072_s0 + $0x98] sm:$0xff]  ;;  %v3205_v26 = vld [vmem:[%s3072_s0 + $0x88] sm:$0xff]  ;;  %s2454_s21 = scalar_lea.hbm %s8692_s2, %s2596_s12 }
  0x3d   : > { %279 = vrot.lane.b32.xlu1 %v3097_v4, %s2930_s29  ;;  %v3214_v27 = vld [vmem:[%s3072_s0 + $0xd8] sm:$0xff]  ;;  %v3217_v28 = vld [vmem:[%s3072_s0 + $0xc8] sm:$0xff]  ;;  %s2457_s7 = sshll.u32 %s2454_s21, 4  ;;  %s2458_s7 = int_to_ptr.hbm [resolvable:$true] %s2457_s7 }
  0x3e   : > { %275 = vrot.lane.b32.xlu0 %v3100_v5, %s2930_s29  ;;  %v3220_v29 = vld [vmem:[%s3072_s0 + $0xb8] sm:$0xff]  ;;  %v3234_v33 = vld [vmem:[%s3072_s0 + $0xe8] sm:$0xff] }
  0x3f   : > { %v3231_v32 = vld [vmem:[%s3072_s0 + $0xf8] sm:$0xff] }
  0x44   : > { %289 = vrot.lane.b32.xlu2 %v3109_v6, %s2930_s29 }
  0x45   : > { %287 = vrot.lane.b32.xlu1 %v3112_v7, %s2930_s29 }
  0x46   : > { %285 = vrot.lane.b32.xlu0 %v3115_v8, %s2930_s29 }
  0x4c   : > { %295 = vrot.lane.b32.xlu2 %v3124_v9, %s2930_s29 }
  0x4d   : > { %293 = vrot.lane.b32.xlu1 %v3127_v10, %s2930_s29 }
  0x4e   : > { %291 = vrot.lane.b32.xlu0 %v3130_v11, %s2930_s29 }
  0x54   : > { %301 = vrot.lane.b32.xlu2 %v3139_v12, %s2930_s29 }
  0x55   : > { %299 = vrot.lane.b32.xlu1 %v3142_v13, %s2930_s29 }
  0x56   : > { %297 = vrot.lane.b32.xlu0 %v3145_v14, %s2930_s29 }
  0x5c   : > { %307 = vrot.lane.b32.xlu2 %v3154_v15, %s2930_s29 }
  0x5d   : > { %305 = vrot.lane.b32.xlu1 %v3157_v16, %s2930_s29 }
  0x5e   : > { %303 = vrot.lane.b32.xlu0 %v3160_v17, %s2930_s29 }
  0x64   : > { %313 = vrot.lane.b32.xlu2 %v3169_v18, %s2930_s29 }
  0x65   : > { %311 = vrot.lane.b32.xlu1 %v3172_v19, %s2930_s29 }
  0x66   : > { %309 = vrot.lane.b32.xlu0 %v3175_v20, %s2930_s29 }
  0x6c   : > { %319 = vrot.lane.b32.xlu2 %v3184_v21, %s2930_s29 }
  0x6d   : > { %317 = vrot.lane.b32.xlu1 %v3187_v22, %s2930_s29 }
  0x6e   : > { %315 = vrot.lane.b32.xlu0 %v3190_v23, %s2930_s29 }
  0x74   : > { %325 = vrot.lane.b32.xlu2 %v3199_v24, %s2930_s29 }
  0x75   : > { %323 = vrot.lane.b32.xlu1 %v3202_v25, %s2930_s29 }
  0x76   : > { %321 = vrot.lane.b32.xlu0 %v3205_v26, %s2930_s29 }
  0x7c   : > { %331 = vrot.lane.b32.xlu2 %v3214_v27, %s2930_s29 }
  0x7d   : > { %329 = vrot.lane.b32.xlu1 %v3217_v28, %s2930_s29 }
  0x7e   : > { %327 = vrot.lane.b32.xlu0 %v3220_v29, %s2930_s29 }
  0x84   : > { %370 = vrot.lane.b32.xlu2 %v3228_v31, %s2930_s29 }
  0x85   : > { %335 = vrot.lane.b32.xlu1 %v3231_v32, %s2930_s29 }
  0x86   : > { %333 = vrot.lane.b32.xlu0 %v3234_v33, %s2930_s29 }
  0x8c   : > { %588 = vrot.lane.b32.xlu2 %v3100_v5, %s2931_s24 }
  0x8d   : > { %586 = vrot.lane.b32.xlu1 %v3085_v2, %s2931_s24 }
  0x8e   : > { %372 = vrot.lane.b32.xlu0 %v3243_v34, %s2930_s29  ;;  %v3251_v35 = vpop.permute.xlu2 %281 }
  0x8f   : > { %9146 = vst [vmem:[#allocation17_spill] sm:$0xff] %v3251_v35 }
  0x94   : > { %594 = vrot.lane.b32.xlu2 %v3079_v0, %s2931_s24 }
  0x95   : > { %592 = vrot.lane.b32.xlu1 %v3097_v4, %s2931_s24 }
  0x96   : > { %590 = vrot.lane.b32.xlu0 %v3082_v1, %s2931_s24  ;;  %v3259_v36 = vpop.permute.xlu2 %283 }
  0x97   : > { %9147 = vst [vmem:[#allocation18_spill] sm:$0xff] %v3259_v36 }
  0x9c   : > { %600 = vrot.lane.b32.xlu2 %v3112_v7, %s2931_s24 }
  0x9d   : > { %598 = vrot.lane.b32.xlu1 %v3115_v8, %s2931_s24 }
  0x9e   : > { %596 = vrot.lane.b32.xlu0 %v3094_v3, %s2931_s24  ;;  %v3267_v37 = vpop.permute.xlu2 %289 }
  0x9f   : > { %9148 = vst [vmem:[#allocation19_spill] sm:$0xff] %v3267_v37 }
  0xa4   : > { %606 = vrot.lane.b32.xlu2 %v3127_v10, %s2931_s24 }
  0xa5   : > { %604 = vrot.lane.b32.xlu1 %v3130_v11, %s2931_s24 }
  0xa6   : > { %602 = vrot.lane.b32.xlu0 %v3109_v6, %s2931_s24  ;;  %v3275_v38 = vpop.permute.xlu2 %295 }
  0xa7   : > { %9149 = vst [vmem:[#allocation20_spill] sm:$0xff] %v3275_v38  ;;  %v3277_v39 = vpop.permute.xlu1 %277 }
  0xa8   : > { %9150 = vst [vmem:[#allocation21_spill] sm:$0xff] %v3277_v39  ;;  %v3279_v40 = vpop.permute.xlu0 %273 }
  0xa9   : > { %9151 = vst [vmem:[#allocation22_spill] sm:$0xff] %v3279_v40 }
  0xac   : > { %612 = vrot.lane.b32.xlu2 %v3142_v13, %s2931_s24 }
  0xad   : > { %610 = vrot.lane.b32.xlu1 %v3145_v14, %s2931_s24 }
  0xae   : > { %608 = vrot.lane.b32.xlu0 %v3124_v9, %s2931_s24  ;;  %v3287_v41 = vpop.permute.xlu2 %301 }
  0xaf   : > { %9152 = vst [vmem:[#allocation23_spill] sm:$0xff] %v3287_v41  ;;  %v3289_v42 = vpop.permute.xlu1 %279 }
  0xb0   : > { %9153 = vst [vmem:[#allocation24_spill] sm:$0xff] %v3289_v42  ;;  %v3291_v43 = vpop.permute.xlu0 %275 }
  0xb1   : > { %9154 = vst [vmem:[#allocation25_spill] sm:$0xff] %v3291_v43 }
  0xb4   : > { %618 = vrot.lane.b32.xlu2 %v3157_v16, %s2931_s24 }
  0xb5   : > { %616 = vrot.lane.b32.xlu1 %v3160_v17, %s2931_s24 }
  0xb6   : > { %614 = vrot.lane.b32.xlu0 %v3139_v12, %s2931_s24  ;;  %v3301_v45 = vpop.permute.xlu2 %307 }
  0xb7   : > { %v3299_v44 = vpop.permute.xlu1 %287  ;;  %9156 = vst [vmem:[#allocation27_spill] sm:$0xff] %v3301_v45 }
  0xb8   : > { %9155 = vst [vmem:[#allocation26_spill] sm:$0xff] %v3299_v44  ;;  %v3303_v46 = vpop.permute.xlu0 %285 }
  0xb9   : > { %9157 = vst [vmem:[#allocation28_spill] sm:$0xff] %v3303_v46 }
  0xbc   : > { %624 = vrot.lane.b32.xlu2 %v3172_v19, %s2931_s24 }
  0xbd   : > { %622 = vrot.lane.b32.xlu1 %v3175_v20, %s2931_s24 }
  0xbe   : > { %620 = vrot.lane.b32.xlu0 %v3154_v15, %s2931_s24  ;;  %v3313_v48 = vpop.permute.xlu2 %313 }
  0xbf   : > { %v3311_v47 = vpop.permute.xlu1 %293  ;;  %9159 = vst [vmem:[#allocation30_spill] sm:$0xff] %v3313_v48 }
  0xc0   : > { %9158 = vst [vmem:[#allocation29_spill] sm:$0xff] %v3311_v47  ;;  %v3315_v49 = vpop.permute.xlu0 %291 }
  0xc4   : > { %630 = vrot.lane.b32.xlu2 %v3187_v22, %s2931_s24 }
  0xc5   : > { %628 = vrot.lane.b32.xlu1 %v3190_v23, %s2931_s24 }
  0xc6   : > { %626 = vrot.lane.b32.xlu0 %v3169_v18, %s2931_s24  ;;  %v3325_v51 = vpop.permute.xlu2 %319 }
  0xc7   : > { %v3323_v50 = vpop.permute.xlu1 %299  ;;  %9161 = vst [vmem:[#allocation32_spill] sm:$0xff] %v3325_v51 }
  0xc8   : > { %9160 = vst [vmem:[#allocation31_spill] sm:$0xff] %v3323_v50  ;;  %v3327_v52 = vpop.permute.xlu0 %297 }
  0xcc   : > { %636 = vrot.lane.b32.xlu2 %v3202_v25, %s2931_s24 }
  0xcd   : > { %634 = vrot.lane.b32.xlu1 %v3205_v26, %s2931_s24 }
  0xce   : > { %632 = vrot.lane.b32.xlu0 %v3184_v21, %s2931_s24  ;;  %v3335_v53 = vpop.permute.xlu2 %325 }
  0xcf   : > { %9162 = vst [vmem:[#allocation33_spill] sm:$0xff] %v3335_v53  ;;  %v3337_v54 = vpop.permute.xlu1 %305 }
  0xd0   : > { %9163 = vst [vmem:[#allocation34_spill] sm:$0xff] %v3337_v54  ;;  %v3339_v55 = vpop.permute.xlu0 %303 }
  0xd4   : > { %642 = vrot.lane.b32.xlu2 %v3217_v28, %s2931_s24 }
  0xd5   : > { %640 = vrot.lane.b32.xlu1 %v3220_v29, %s2931_s24 }
  0xd6   : > { %638 = vrot.lane.b32.xlu0 %v3199_v24, %s2931_s24  ;;  %v3347_v56 = vpop.permute.xlu2 %331 }
  0xd7   : > { %9164 = vst [vmem:[#allocation35_spill] sm:$0xff] %v3347_v56  ;;  %v3349_v57 = vpop.permute.xlu1 %311 }
  0xd8   : > { %9165 = vst [vmem:[#allocation36_spill] sm:$0xff] %v3349_v57  ;;  %v3351_v58 = vpop.permute.xlu0 %309 }
  0xd9   : > { %9166 = vst [vmem:[#allocation37_spill] sm:$0xff] %v3351_v58 }
  0xdc   : > { %648 = vrot.lane.b32.xlu2 %v3231_v32, %s2931_s24 }
  0xdd   : > { %646 = vrot.lane.b32.xlu1 %v3234_v33, %s2931_s24 }
  0xde   : > { %644 = vrot.lane.b32.xlu0 %v3214_v27, %s2931_s24  ;;  %v3359_v59 = vpop.permute.xlu2 %370 }
  0xdf   : > { %v3361_v60 = vpop.permute.xlu1 %317 }
  0xe0   : > { %9167 = vst [vmem:[#allocation38_spill] sm:$0xff] %v3361_v60  ;;  %v3363_v61 = vpop.permute.xlu0 %315 }
  0xe1   : > { %9168 = vst [vmem:[#allocation39_spill] sm:$0xff] %v3363_v61 }
  0xe4   : > { %931 = vrot.lane.b32.xlu2 %v3085_v2, %s2932_s3 }
  0xe5   : > { %685 = vrot.lane.b32.xlu1 %v3243_v34, %s2931_s24 }
  0xe6   : > { %683 = vrot.lane.b32.xlu0 %v3228_v31, %s2931_s24  ;;  %v3371_v62 = vpop.permute.xlu2 %588 }
  0xe7   : > { %9169 = vst [vmem:[#allocation40_spill] sm:$0xff] %v3371_v62  ;;  %v3373_v63 = vpop.permute.xlu1 %323 }
  0xe8   : > { %v3375_v30 = vpop.permute.xlu0 %321 }
  0xe9   : > { %9170 = vst [vmem:[#allocation41_spill] sm:$0xff] %v3375_v30 }
  0xec   : > { %937 = vrot.lane.b32.xlu2 %v3097_v4, %s2932_s3 }
  0xed   : > { %935 = vrot.lane.b32.xlu1 %v3082_v1, %s2932_s3 }
  0xee   : > { %933 = vrot.lane.b32.xlu0 %v3100_v5, %s2932_s3  ;;  %v3383_v56 = vpop.permute.xlu2 %594 }
  0xef   : > { %9171 = vst [vmem:[#allocation42_spill] sm:$0xff] %v3383_v56  ;;  %v3385_v50 = vpop.permute.xlu1 %329 }
  0xf0   : > { %v3387_v41 = vpop.permute.xlu0 %327 }
  0xf1   : > { %9172 = vst [vmem:[#allocation43_spill] sm:$0xff] %v3387_v41 }
  0xf4   : > { %943 = vrot.lane.b32.xlu2 %v3115_v8, %s2932_s3 }
  0xf5   : > { %941 = vrot.lane.b32.xlu1 %v3094_v3, %s2932_s3 }
  0xf6   : > { %939 = vrot.lane.b32.xlu0 %v3079_v0, %s2932_s3  ;;  %v3395_v53 = vpop.permute.xlu2 %600 }
  0xf7   : > { %9173 = vst [vmem:[#allocation44_spill] sm:$0xff] %v3395_v53  ;;  %v3397_v47 = vpop.permute.xlu1 %335 }
  0xf8   : > { %v3399_v38 = vpop.permute.xlu0 %333 }
  0xf9   : > { %9174 = vst [vmem:[#allocation45_spill] sm:$0xff] %v3399_v38 }
  0xfc   : > { %949 = vrot.lane.b32.xlu2 %v3130_v11, %s2932_s3 }
  0xfd   : > { %947 = vrot.lane.b32.xlu1 %v3109_v6, %s2932_s3 }
  0xfe   : > { %945 = vrot.lane.b32.xlu0 %v3112_v7, %s2932_s3  ;;  %v3407_v41 = vpop.permute.xlu2 %606 }
  0xff   : > { %9175 = vst [vmem:[#allocation46_spill] sm:$0xff] %v3407_v41  ;;  %v3409_v56 = vpop.permute.xlu1 %586 }
 0x100   : > { %9176 = vst [vmem:[#allocation47_spill] sm:$0xff] %v3409_v56  ;;  %v3411_v62 = vpop.permute.xlu0 %372 }
 0x104   : > { %955 = vrot.lane.b32.xlu2 %v3145_v14, %s2932_s3 }
 0x105   : > { %953 = vrot.lane.b32.xlu1 %v3124_v9, %s2932_s3 }
 0x106   : > { %951 = vrot.lane.b32.xlu0 %v3127_v10, %s2932_s3  ;;  %v3419_v38 = vpop.permute.xlu2 %612 }
 0x107   : > { %9177 = vst [vmem:[#allocation48_spill] sm:$0xff] %v3419_v38  ;;  %v3421_v53 = vpop.permute.xlu1 %592 }
 0x108   : > { %9178 = vst [vmem:[#allocation49_spill] sm:$0xff] %v3421_v53  ;;  %v3423_v36 = vpop.permute.xlu0 %590 }
 0x109   : > { %9179 = vst [vmem:[#allocation50_spill] sm:$0xff] %v3423_v36 }
 0x10c   : > { %961 = vrot.lane.b32.xlu2 %v3160_v17, %s2932_s3 }
 0x10d   : > { %959 = vrot.lane.b32.xlu1 %v3139_v12, %s2932_s3 }
 0x10e   : > { %957 = vrot.lane.b32.xlu0 %v3142_v13, %s2932_s3  ;;  %v3431_v41 = vpop.permute.xlu2 %618 }
 0x10f   : > { %9180 = vst [vmem:[#allocation51_spill] sm:$0xff] %v3431_v41  ;;  %v3433_v61 = vpop.permute.xlu1 %598 }
 0x110   : > { %9181 = vst [vmem:[#allocation52_spill] sm:$0xff] %v3433_v61  ;;  %v3435_v44 = vpop.permute.xlu0 %596 }
 0x111   : > { %9182 = vst [vmem:[#allocation53_spill] sm:$0xff] %v3435_v44 }
 0x114   : > { %967 = vrot.lane.b32.xlu2 %v3175_v20, %s2932_s3 }
 0x115   : > { %965 = vrot.lane.b32.xlu1 %v3154_v15, %s2932_s3 }
 0x116   : > { %963 = vrot.lane.b32.xlu0 %v3157_v16, %s2932_s3  ;;  %v3443_v38 = vpop.permute.xlu2 %624 }
 0x117   : > { %9183 = vst [vmem:[#allocation54_spill] sm:$0xff] %v3443_v38  ;;  %v3445_v36 = vpop.permute.xlu1 %604 }
 0x118   : > { %v3447_v51 = vpop.permute.xlu0 %602 }
 0x119   : > { %9184 = vst [vmem:[#allocation55_spill] sm:$0xff] %v3447_v51 }
 0x11c   : > { %973 = vrot.lane.b32.xlu2 %v3190_v23, %s2932_s3 }
 0x11d   : > { %971 = vrot.lane.b32.xlu1 %v3169_v18, %s2932_s3 }
 0x11e   : > { %969 = vrot.lane.b32.xlu0 %v3172_v19, %s2932_s3  ;;  %v3455_v44 = vpop.permute.xlu2 %630 }
 0x11f   : > { %9185 = vst [vmem:[#allocation56_spill] sm:$0xff] %v3455_v44  ;;  %v3457_v35 = vpop.permute.xlu1 %610 }
 0x120   : > { %v3459_v48 = vpop.permute.xlu0 %608 }
 0x121   : > { %9186 = vst [vmem:[#allocation57_spill] sm:$0xff] %v3459_v48 }
 0x124   : > { %979 = vrot.lane.b32.xlu2 %v3205_v26, %s2932_s3 }
 0x125   : > { %977 = vrot.lane.b32.xlu1 %v3184_v21, %s2932_s3 }
 0x126   : > { %975 = vrot.lane.b32.xlu0 %v3187_v22, %s2932_s3  ;;  %v3467_v58 = vpop.permute.xlu2 %636 }
 0x127   : > { %v3469_v39 = vpop.permute.xlu1 %616 }
 0x128   : > { %v3471_v43 = vpop.permute.xlu0 %614 }
 0x129   : > { %9187 = vst [vmem:[#allocation58_spill] sm:$0xff] %v3471_v43 }
 0x12c   : > { %985 = vrot.lane.b32.xlu2 %v3220_v29, %s2932_s3 }
 0x12d   : > { %983 = vrot.lane.b32.xlu1 %v3199_v24, %s2932_s3 }
 0x12e   : > { %981 = vrot.lane.b32.xlu0 %v3202_v25, %s2932_s3  ;;  %v3479_v48 = vpop.permute.xlu2 %642 }
 0x12f   : > { %v3481_v45 = vpop.permute.xlu1 %622 }
 0x130   : > { %9188 = vst [vmem:[#allocation59_spill] sm:$0xff] %v3481_v45  ;;  %v3483_v44 = vpop.permute.xlu0 %620 }
 0x131   : > { %9189 = vst [vmem:[#allocation60_spill] sm:$0xff] %v3483_v44 }
 0x134   : > { %991 = vrot.lane.b32.xlu2 %v3234_v33, %s2932_s3 }
 0x135   : > { %989 = vrot.lane.b32.xlu1 %v3214_v27, %s2932_s3 }
 0x136   : > { %987 = vrot.lane.b32.xlu0 %v3217_v28, %s2932_s3  ;;  %v3491_v43 = vpop.permute.xlu2 %648 }
 0x137   : > { %v3493_v61 = vpop.permute.xlu1 %628 }
 0x138   : > { %9190 = vst [vmem:[#allocation61_spill] sm:$0xff] %v3493_v61  ;;  %v3495_v53 = vpop.permute.xlu0 %626 }
 0x139   : > { %9191 = vst [vmem:[#allocation62_spill] sm:$0xff] %v3495_v53 }
 0x13c   : > { %1030 = vrot.lane.b32.xlu2 %v3243_v34, %s2932_s3 }
 0x13d   : > { %1028 = vrot.lane.b32.xlu1 %v3228_v31, %s2932_s3 }
 0x13e   : > { %993 = vrot.lane.b32.xlu0 %v3231_v32, %s2932_s3  ;;  %v3503_v44 = vpop.permute.xlu2 %931  ;;  %s2843_s3 = scalar_lea.hbm %s8692_s2, 512 }
 0x13f   : > { %9192 = vst [vmem:[#allocation63_spill] sm:$0xff] %v3503_v44  ;;  %v3505_v45 = vpop.permute.xlu1 %634 }
 0x140   : > { %9193 = vst [vmem:[#allocation64_spill] sm:$0xff] %v3505_v45  ;;  %v3507_v38 = vpop.permute.xlu0 %632 }
 0x141   : > { %9194 = vst [vmem:[#allocation65_spill] sm:$0xff] %v3507_v38 }
 0x144   : > { %1280 = vrot.lane.b32.xlu2 %v3082_v1, %s2933_s17 }
 0x145   : > { %1278 = vrot.lane.b32.xlu1 %v3100_v5, %s2933_s17 }
 0x146   : > { %1276 = vrot.lane.b32.xlu0 %v3085_v2, %s2933_s17  ;;  %v3515_v53 = vpop.permute.xlu2 %937 }
 0x147   : > { %9195 = vst [vmem:[#allocation66_spill] sm:$0xff] %v3515_v53  ;;  %v3517_v61 = vpop.permute.xlu1 %640 }
 0x148   : > { %9196 = vst [vmem:[#allocation67_spill] sm:$0xff] %v3517_v61  ;;  %v3519_v51 = vpop.permute.xlu0 %638 }
 0x149   : > { %9197 = vst [vmem:[#allocation68_spill] sm:$0xff] %v3519_v51 }
 0x14c   : > { %1286 = vrot.lane.b32.xlu2 %v3094_v3, %s2933_s17 }
 0x14d   : > { %1284 = vrot.lane.b32.xlu1 %v3079_v0, %s2933_s17 }
 0x14e   : > { %1282 = vrot.lane.b32.xlu0 %v3097_v4, %s2933_s17  ;;  %v3527_v38 = vpop.permute.xlu2 %943 }
 0x14f   : > { %9198 = vst [vmem:[#allocation69_spill] sm:$0xff] %v3527_v38  ;;  %v3529_v44 = vpop.permute.xlu1 %646 }
 0x150   : > { %9199 = vst [vmem:[#allocation70_spill] sm:$0xff] %v3529_v44  ;;  %v3531_v45 = vpop.permute.xlu0 %644 }
 0x151   : > { %9200 = vst [vmem:[#allocation71_spill] sm:$0xff] %v3531_v45 }
 0x154   : > { %1292 = vrot.lane.b32.xlu2 %v3109_v6, %s2933_s17 }
 0x155   : > { %1290 = vrot.lane.b32.xlu1 %v3112_v7, %s2933_s17 }
 0x156   : > { %1288 = vrot.lane.b32.xlu0 %v3115_v8, %s2933_s17  ;;  %v3539_v51 = vpop.permute.xlu2 %949 }
 0x157   : > { %v686_v61 = vpop.permute.xlu1 %685 }
 0x158   : > { %v684_v53 = vpop.permute.xlu0 %683 }
 0x159   : > { %v3544_v44 = vsel %vm8781_vm0, %v684_v53, %v686_v61  ;;  %v3548_v45 = vsel %vm8781_vm0, %v686_v61, %v684_v53 }
 0x15a   : > { %vm725_vm5 = vcmp.lt.s32.totalorder %v3548_v45, %v3228_v31  ;;  %vm726_vm6 = vcmp.lt.s32.totalorder %v3544_v44, %v3243_v34 }
 0x15c   : > { %1298 = vrot.lane.b32.xlu2 %v3124_v9, %s2933_s17 }
 0x15d   : > { %1296 = vrot.lane.b32.xlu1 %v3127_v10, %s2933_s17 }
 0x15e   : > { %1294 = vrot.lane.b32.xlu0 %v3130_v11, %s2933_s17  ;;  %v3556_v38 = vpop.permute.xlu2 %955 }
 0x15f   : > { %9201 = vst [vmem:[#allocation72_spill] sm:$0xff] %v3556_v38  ;;  %v936_v41 = vpop.permute.xlu1 %935 }
 0x160   : > { %v934_v56 = vpop.permute.xlu0 %933 }
 0x164   : > { %1304 = vrot.lane.b32.xlu2 %v3139_v12, %s2933_s17 }
 0x165   : > { %1302 = vrot.lane.b32.xlu1 %v3142_v13, %s2933_s17 }
 0x166   : > { %1300 = vrot.lane.b32.xlu0 %v3145_v14, %s2933_s17  ;;  %v3564_v53 = vpop.permute.xlu2 %961 }
 0x167   : > { %v942_v61 = vpop.permute.xlu1 %941 }
 0x168   : > { %v940_v46 = vpop.permute.xlu0 %939 }
 0x16c   : > { %1310 = vrot.lane.b32.xlu2 %v3154_v15, %s2933_s17 }
 0x16d   : > { %1308 = vrot.lane.b32.xlu1 %v3157_v16, %s2933_s17 }
 0x16e   : > { %1306 = vrot.lane.b32.xlu0 %v3160_v17, %s2933_s17  ;;  %v968_v60 = vpop.permute.xlu2 %967 }
 0x16f   : > { %v948_v42 = vpop.permute.xlu1 %947  ;;  %v3575_v57 = vsel %vm8775_vm1, %v936_v41, %v968_v60  ;;  %v3579_v30 = vsel %vm8775_vm1, %v968_v60, %v936_v41 }
 0x170   : > { %9202 = vst [vmem:[#allocation73_spill] sm:$0xff] %v3575_v57  ;;  %v946_v37 = vpop.permute.xlu0 %945 }
 0x171   : > { %9203 = vst [vmem:[#allocation74_spill] sm:$0xff] %v3579_v30 }
 0x174   : > { %1316 = vrot.lane.b32.xlu2 %v3169_v18, %s2933_s17 }
 0x175   : > { %1314 = vrot.lane.b32.xlu1 %v3172_v19, %s2933_s17 }
 0x176   : > { %1312 = vrot.lane.b32.xlu0 %v3175_v20, %s2933_s17  ;;  %v974_v54 = vpop.permute.xlu2 %973 }
 0x177   : > { %v954_v40 = vpop.permute.xlu1 %953  ;;  %v3589_v38 = vsel %vm8775_vm1, %v942_v61, %v974_v54  ;;  %v3593_v41 = vsel %vm8775_vm1, %v974_v54, %v942_v61 }
 0x178   : > { %9204 = vst [vmem:[#allocation75_spill] sm:$0xff] %v3589_v38  ;;  %v952_v60 = vpop.permute.xlu0 %951 }
 0x179   : > { %9205 = vst [vmem:[#allocation76_spill] sm:$0xff] %v3593_v41 }
 0x17c   : > { %1322 = vrot.lane.b32.xlu2 %v3184_v21, %s2933_s17 }
 0x17d   : > { %1320 = vrot.lane.b32.xlu1 %v3187_v22, %s2933_s17 }
 0x17e   : > { %1318 = vrot.lane.b32.xlu0 %v3190_v23, %s2933_s17  ;;  %v980_v57 = vpop.permute.xlu2 %979 }
 0x17f   : > { %v960_v30 = vpop.permute.xlu1 %959  ;;  %v3603_v18 = vsel %vm8775_vm1, %v948_v42, %v980_v57  ;;  %v3607_v54 = vsel %vm8775_vm1, %v980_v57, %v948_v42 }
 0x180   : > { %9206 = vst [vmem:[#allocation77_spill] sm:$0xff] %v3603_v18  ;;  %v958_v61 = vpop.permute.xlu0 %957 }
 0x181   : > { %9207 = vst [vmem:[#allocation78_spill] sm:$0xff] %v3607_v54 }
 0x184   : > { %1328 = vrot.lane.b32.xlu2 %v3199_v24, %s2933_s17 }
 0x185   : > { %1326 = vrot.lane.b32.xlu1 %v3202_v25, %s2933_s17 }
 0x186   : > { %1324 = vrot.lane.b32.xlu0 %v3205_v26, %s2933_s17  ;;  %v986_v38 = vpop.permute.xlu2 %985 }
 0x187   : > { %v966_v41 = vpop.permute.xlu1 %965  ;;  %v3617_v21 = vsel %vm8775_vm1, %v954_v40, %v986_v38  ;;  %v3621_v42 = vsel %vm8775_vm1, %v986_v38, %v954_v40 }
 0x188   : > { %9208 = vst [vmem:[#allocation79_spill] sm:$0xff] %v3617_v21  ;;  %v3625_v57 = vsel %vm8775_vm1, %v934_v56, %v966_v41  ;;  %v3629_v24 = vsel %vm8775_vm1, %v966_v41, %v934_v56  ;;  %v3631_v18 = vpop.permute.xlu0 %963 }
 0x189   : > { %9209 = vst [vmem:[#allocation80_spill] sm:$0xff] %v3621_v42 }
 0x18a   : > { %9210 = vst [vmem:[#allocation81_spill] sm:$0xff] %v3625_v57 }
 0x18b   : > { %9211 = vst [vmem:[#allocation82_spill] sm:$0xff] %v3629_v24 }
 0x18c   : > { %1334 = vrot.lane.b32.xlu2 %v3214_v27, %s2933_s17 }
 0x18d   : > { %1332 = vrot.lane.b32.xlu1 %v3217_v28, %s2933_s17 }
 0x18e   : > { %1330 = vrot.lane.b32.xlu0 %v3220_v29, %s2933_s17  ;;  %v992_v38 = vpop.permute.xlu2 %991 }
 0x18f   : > { %v972_v40 = vpop.permute.xlu1 %971  ;;  %v3641_v21 = vsel %vm8775_vm1, %v960_v30, %v992_v38  ;;  %v3645_v56 = vsel %vm8775_vm1, %v992_v38, %v960_v30 }
 0x190   : > { %9212 = vst [vmem:[#allocation83_spill] sm:$0xff] %v3641_v21  ;;  %v3649_v41 = vsel %vm8775_vm1, %v940_v46, %v972_v40  ;;  %v3653_v27 = vsel %vm8775_vm1, %v972_v40, %v940_v46  ;;  %v3655_v42 = vpop.permute.xlu0 %969 }
 0x191   : > { %9213 = vst [vmem:[#allocation84_spill] sm:$0xff] %v3645_v56 }
 0x192   : > { %9214 = vst [vmem:[#allocation85_spill] sm:$0xff] %v3649_v41 }
 0x193   : > { %9215 = vst [vmem:[#allocation86_spill] sm:$0xff] %v3653_v27  ;;  %v3727_v27 = vshra.s32 %v3228_v31, 2 }
 0x194   : > { %1373 = vrot.lane.b32.xlu2 %v3228_v31, %s2933_s17 }
 0x195   : > { %1338 = vrot.lane.b32.xlu1 %v3231_v32, %s2933_s17  ;;  %9225 = vst [vmem:[#allocation96_spill] sm:$0xff] %v3727_v27 }
 0x196   : > { %1336 = vrot.lane.b32.xlu0 %v3234_v33, %s2933_s17  ;;  %v1031_v30 = vpop.permute.xlu2 %1030 }
 0x197   : > { %v978_v38 = vpop.permute.xlu1 %977 }
 0x198   : > { %v3665_v21 = vsel %vm8775_vm1, %v946_v37, %v978_v38  ;;  %v3669_v46 = vsel %vm8775_vm1, %v978_v38, %v946_v37  ;;  %v3671_v40 = vpop.permute.xlu0 %975 }
 0x199   : > { %9216 = vst [vmem:[#allocation87_spill] sm:$0xff] %v3665_v21 }
 0x19a   : > { %9217 = vst [vmem:[#allocation88_spill] sm:$0xff] %v3669_v46 }
 0x19b   : > { %9218 = vst [vmem:[#allocation89_spill] sm:$0xff] %v3671_v40 }
 0x19c   : > { %1623 = vrot.lane.b32.xlu2 %v3100_v5, %s2934_s18  ;;  %v374_v5 = vsel %vm8774_vm2, %v3359_v59, %v3411_v62 }
 0x19d   : > { %1621 = vrot.lane.b32.xlu1 %v3085_v2, %s2934_s18  ;;  %v375_v2 = vsel %vm8774_vm2, %v3411_v62, %v3359_v59  ;;  %vm413_vm4 = vcmp.lt.s32.totalorder %v374_v5, %v3243_v34 }
 0x19e   : > { %1375 = vrot.lane.b32.xlu0 %v3243_v34, %s2933_s17  ;;  %v3679_v56 = vpop.permute.xlu2 %1280  ;;  %vm412_vm3 = vcmp.lt.s32.totalorder %v375_v2, %v3228_v31 }
 0x19f   : > { %9219 = vst [vmem:[#allocation90_spill] sm:$0xff] %v3679_v56  ;;  %v984_v41 = vpop.permute.xlu1 %983 }
 0x1a0   : > { %v3683_v21 = vsel %vm8775_vm1, %v952_v60, %v984_v41  ;;  %v3687_v37 = vsel %vm8775_vm1, %v984_v41, %v952_v60  ;;  %v3689_v38 = vpop.permute.xlu0 %981 }
 0x1a1   : > { %9220 = vst [vmem:[#allocation91_spill] sm:$0xff] %v3683_v21  ;;  %v8772_v21 = vmov 0  }
 0x1a2   : > { %9221 = vst [vmem:[#allocation92_spill] sm:$0xff] %v3687_v37  ;;  %v446_v37 = vsel %vm412_vm3, 1, %v8772_v21  ;;  %v447_v62 = vsel %vm413_vm4, 1, %v8772_v21 }
 0x1a3   : > { %v448_v46 = vperm.slane %v446_v37, 0  ;;  %v363_v37 = vsel %vm8774_vm2, %v3373_v63, %v3315_v49 }
 0x1a4   : > { %1629 = vrot.lane.b32.xlu2 %v3079_v0, %s2934_s18  ;;  %vm432_vm9 = vcmp.eq.f32.partialorder %v363_v37, %v3130_v11  ;;  %vm398_vm13 = vcmp.gt.f32.partialorder %v363_v37, %v3130_v11  ;;  %v9238_v37 = vmov 0 }
 0x1a5   : > { %1627 = vrot.lane.b32.xlu1 %v3097_v4, %s2934_s18  ;;  %vm3748_vm7 = vcmp.eq.s32.totalorder %v448_v46, 1 }
 0x1a6   : > { %1625 = vrot.lane.b32.xlu0 %v3082_v1, %s2934_s18  ;;  %v3708_v60 = vpop.permute.xlu2 %1286  ;;  %v449_v1 = vperm.slane %v447_v62, 0  ;;  %v759_v62 = vsel %vm725_vm5, 1, %v8772_v21  ;;  %vm470_vm11 = vmand %vm3748_vm7, %vm432_vm9 }
 0x1a7   : > { %9222 = vst [vmem:[#allocation93_spill] sm:$0xff] %v3708_v60  ;;  %v990_v41 = vpop.permute.xlu1 %989  ;;  %vm3815_vm9 = vmor %vm398_vm13, %vm470_vm11 }
 0x1a8   : > { %v3713_v59 = vsel %vm8775_vm1, %v958_v61, %v990_v41  ;;  %v3717_v0 = vsel %vm8775_vm1, %v990_v41, %v958_v61  ;;  %v3719_v4 = vpop.permute.xlu0 %987  ;;  %v347_v61 = vsel %vm8774_vm2, %v3315_v49, %v3373_v63  ;;  %v689_v41 = vshra.s32 %v3548_v45, 2 }
 0x1a9   : > { %9223 = vst [vmem:[#allocation94_spill] sm:$0xff] %v3713_v59  ;;  %v9227_v59 = vmov 0  ;;  %v377_v63 = vshra.s32 %v374_v5, 2  ;;  %vm3755_vm8 = vcmp.eq.s32.totalorder %v449_v1, 1  ;;  %v9231_v45 = vmov 0 }
 0x1aa   : > { %9224 = vst [vmem:[#allocation95_spill] sm:$0xff] %v3717_v0  ;;  %v9228_v59 = vsel %vm3748_vm7, 4294967295, %v9227_v59  ;;  %v760_v0 = vsel %vm726_vm6, 1, %v8772_v21  ;;  %v9232_v45 = vsel %vm3755_vm8, 4294967295, %v9231_v45  ;;  %vm433_vm10 = vcmp.eq.f32.partialorder %v347_v61, %v3202_v25 }
 0x1ab   : > { %9229 = vst [vmem:[#allocation98_spill] sm:$0xff] %v9228_v59  ;;  %v369_v5 = vsel %vm8774_vm2, %v3397_v47, %v3339_v55  ;;  %v761_v1 = vperm.slane %v759_v62, 0  ;;  %v353_v21 = vsel %vm8774_vm2, %v3339_v55, %v3397_v47  ;;  %vm691_vm12 = vcmp.eq.s32.totalorder %v689_v41, %v3727_v27  ;;  %vm471_vm3 = vmand %vm3755_vm8, %vm433_vm10 }
 0x1ac   : > { %1635 = vrot.lane.b32.xlu2 %v3112_v7, %s2934_s18  ;;  %v3746_v7 = vshra.s32 %v3243_v34, 2  ;;  %9233 = vst [vmem:[#allocation100_spill] sm:$0xff] %v9232_v45  ;;  %vm399_vm14 = vcmp.gt.f32.partialorder %v347_v61, %v3202_v25  ;;  %v3789_v62 = vsel %vm8774_vm2, %v3385_v50, %v3327_v52  ;;  %vm444_vm4 = vcmp.eq.f32.partialorder %v369_v5, %v3160_v17 }
 0x1ad   : > { %1633 = vrot.lane.b32.xlu1 %v3115_v8, %s2934_s18  ;;  %v376_v8 = vshra.s32 %v375_v2, 2  ;;  %vm445_vm6 = vcmp.eq.f32.partialorder %v353_v21, %v3231_v32  ;;  %v9239_v37 = vsel %vm3815_vm9, 4294967295, %v9238_v37  ;;  %vm3823_vm10 = vcmp.eq.s32.totalorder %v761_v1, 1  ;;  %vm3842_vm13 = vmor %vm399_vm14, %vm471_vm3 }
 0x1ae   : > { %1631 = vrot.lane.b32.xlu0 %v3094_v3, %s2934_s18  ;;  %9226 = vst [vmem:[#allocation97_spill] sm:$0xff] %v3746_v7  ;;  %v3753_v60 = vpop.permute.xlu2 %1292  ;;  %vm3806_vm5 = vcmp.eq.s32.totalorder %v377_v63, %v3746_v7  ;;  %v9243_v41 = vmov 0   ;;  %vm438_vm11 = vcmp.eq.f32.partialorder %v3789_v62, %v3145_v14  ;;  %v9271_v1 = vmov 0 }
 0x1af   : > { %9230 = vst [vmem:[#allocation99_spill] sm:$0xff] %v3753_v60  ;;  %v1029_v49 = vpop.permute.xlu1 %1028  ;;  %vm3792_vm15 = vcmp.eq.s32.totalorder %v376_v8, %v3727_v27  ;;  %v829_v8 = vsel %vm691_vm12, 1, %v9243_v41  ;;  %v9256_v60 = vmov 0  ;;  %v9275_v63 = vmov 0 }
 0x1b0   : > { %v3761_v3 = vsel %vm8775_vm1, %v1029_v49, %v1031_v30  ;;  %v3765_v46 = vsel %vm8775_vm1, %v1031_v30, %v1029_v49  ;;  %v3767_v2 = vpop.permute.xlu0 %993  ;;  %v690_v30 = vshra.s32 %v3544_v44, 2  ;;  %v762_v49 = vperm.slane %v760_v0, 0  ;;  %vm3860_vm1 = vmand %vm3755_vm8, %vm445_vm6 }
 0x1b1   : > { %v3802_v44 = vsel %vm8774_vm2, %v3327_v52, %v3385_v50  ;;  %v676_v0 = vsel %vm8781_vm0, %v3467_v58, %v3445_v36  ;;  %v660_v50 = vsel %vm8781_vm0, %v3445_v36, %v3467_v58  ;;  %v9240_v52 = vmov 0  ;;  %vm3830_vm2 = vmand %vm3748_vm7, %vm444_vm4 }
 0x1b2   : > { %v9241_v52 = vsel %vm3823_vm10, 4294967295, %v9240_v52  ;;  %v9246_v36 = vmov 0  ;;  %v516_v58 = vsel %vm3792_vm15, 1, %v9243_v41  ;;  %vm3850_vm12 = vcmp.eq.s32.totalorder %v690_v30, %v3746_v7  ;;  %vm3876_vm15 = vmand %vm3748_vm7, %vm438_vm11 }
 0x1b3   : > { %9242 = vst [vmem:[#allocation101_spill] sm:$0xff] %v9241_v52  ;;  %v9247_v36 = vsel %vm3842_vm13, 4294967295, %v9246_v36  ;;  %vm3854_vm4 = vcmp.eq.s32.totalorder %v762_v49, 1  ;;  %v517_v30 = vsel %vm3806_vm5, 1, %v9243_v41  ;;  %vm745_vm14 = vcmp.eq.f32.partialorder %v676_v0, %v3130_v11 }
 0x1b4   : > { %1641 = vrot.lane.b32.xlu2 %v3127_v10, %s2934_s18  ;;  %v9250_v10 = vmov 0  ;;  %v9257_v60 = vsel %vm3876_vm15, 4294967295, %v9256_v60  ;;  %vm746_vm6 = vcmp.eq.f32.partialorder %v660_v50, %v3202_v25  ;;  %vm3889_vm5 = vmand %vm3823_vm10, %vm745_vm14  ;;  %v518_v57 = vperm.slane %v516_v58, 0 }
 0x1b5   : > { %1639 = vrot.lane.b32.xlu1 %v3130_v11, %s2934_s18  ;;  %v9251_v10 = vsel %vm3854_vm4, 4294967295, %v9250_v10  ;;  %vm784_vm3 = vmand %vm3854_vm4, %vm746_vm6  ;;  %v830_v24 = vsel %vm3850_vm12, 1, %v9243_v41  ;;  %v519_v40 = vperm.slane %v517_v30, 0  ;;  %vm711_vm14 = vcmp.gt.f32.partialorder %v676_v0, %v3130_v11 }
 0x1b6   : > { %9252 = vst [vmem:[#allocation102_spill] sm:$0xff] %v9251_v10  ;;  %1637 = vrot.lane.b32.xlu0 %v3109_v6, %s2934_s18  ;;  %v3870_v47 = vpop.permute.xlu2 %1298  ;;  %v682_v6 = vsel %vm8781_vm0, %v3491_v43, %v3469_v39  ;;  %vm9260_vm7 = vcmp.lt.s32.totalorder %v3228_v31, 2  ;;  %vm9261_vm6 = vcmp.eq.f32.partialorder %v3802_v44, %v3217_v28  ;;  %v9262_v58 = vmov 0 }
 0x1b7   : > { %9255 = vst [vmem:[#allocation103_spill] sm:$0xff] %v3870_v47  ;;  %v3872_v49 = vpop.permute.xlu1 %1278  ;;  %v831_v47 = vperm.slane %v829_v8, 0  ;;  %v666_v8 = vsel %vm9260_vm7, %v3469_v39, %v3491_v43  ;;  %vm3915_vm12 = vmand %vm3755_vm8, %vm9261_vm6  ;;  %vm411_vm0 = vcmp.gt.f32.partialorder %v353_v21, %v3231_v32  ;;  %vm712_vm15 = vcmp.gt.f32.partialorder %v660_v50, %v3202_v25 }
 0x1b8   : > { %v3893_v56 = vpop.permute.xlu0 %1276  ;;  %v9263_v58 = vsel %vm3915_vm12, 4294967295, %v9262_v58  ;;  %vm757_vm13 = vcmp.eq.f32.partialorder %v682_v6, %v3160_v17  ;;  %vm3924_vm7 = vmor %vm711_vm14, %vm3889_vm5  ;;  %v9264_v39 = vmov 0  ;;  %v1034_v43 = vshra.s32 %v3765_v46, 2 }
 0x1b9   : > { %v9265_v39 = vsel %vm3924_vm7, 4294967295, %v9264_v39  ;;  %vm9266_vm6 = vcmp.gt.f32.partialorder %v369_v5, %v3160_v17  ;;  %v9267_v0 = vmov 0  ;;  %vm3937_vm8 = vmor %vm712_vm15, %vm784_vm3  ;;  %v832_v50 = vperm.slane %v830_v24, 0 }
 0x1ba   : > { %vm3933_vm11 = vmor %vm9266_vm6, %vm3830_vm2  ;;  %vm3941_vm12 = vcmp.eq.s32.totalorder %v831_v47, 1  ;;  %v1035_v30 = vshra.s32 %v3761_v3, 2  ;;  %vm9274_vm5 = vcmp.lt.s32.totalorder %v3765_v46, %v3228_v31  ;;  %vm3956_vm15 = vcmp.eq.s32.totalorder %v518_v57, 1 }
 0x1bb   : > { %v9268_v0 = vsel %vm3933_vm11, 4294967295, %v9267_v0  ;;  %v9272_v1 = vsel %vm3941_vm12, 4294967295, %v9271_v1  ;;  %v1104_v5 = vsel %vm9274_vm5, 1, %v9243_v41  ;;  %vm3952_vm2 = vmor %vm411_vm0, %vm3860_vm1  ;;  %v9277_v55 = vmov 0 }
 0x1bc   : > { %9273 = vst [vmem:[#allocation104_spill] sm:$0xff] %v9272_v1  ;;  %v9276_v63 = vsel %vm3952_vm2, 4294967295, %v9275_v63  ;;  %v9278_v55 = vsel %vm3956_vm15, 4294967295, %v9277_v55  ;;  %vm758_vm3 = vcmp.eq.f32.partialorder %v666_v8, %v3231_v32  ;;  %vm9280_vm14 = vcmp.lt.s32.totalorder %v3761_v3, %v3243_v34  ;;  %vm3967_vm6 = vmand %vm3823_vm10, %vm757_vm13  ;;  %1647 = vrot.lane.b32.xlu2 %v3142_v13, %s2934_s18 }
 0x1bd   : > { %9279 = vst [vmem:[#allocation105_spill] sm:$0xff] %v9278_v55  ;;  %v1105_v24 = vsel %vm9280_vm14, 1, %v9243_v41  ;;  %1645 = vrot.lane.b32.xlu1 %v3145_v14, %s2934_s18  ;;  %vm3975_vm0 = vcmp.eq.s32.totalorder %v519_v40, 1  ;;  %v9283_v57 = vmov 0  ;;  %vm9286_vm1 = vcmp.lt.s32.totalorder %v3228_v31, 2  ;;  %vm3985_vm13 = vmand %vm3854_vm4, %vm758_vm3 }
 0x1be   : > { %v9284_v57 = vsel %vm3975_vm0, 4294967295, %v9283_v57  ;;  %v679_v3 = vsel %vm9286_vm1, %v3479_v48, %v3457_v35  ;;  %1643 = vrot.lane.b32.xlu0 %v3124_v9, %s2934_s18  ;;  %vm9289_vm5 = vmmov %vm9286_vm1  ;;  %vm723_vm14 = vcmp.gt.f32.partialorder %v682_v6, %v3160_v17  ;;  %vm4001_vm3 = vcmp.eq.s32.totalorder %v1034_v43, %v3727_v27  ;;  %v4005_v54 = vpop.permute.xlu2 %1304  ;;  %v4697_v27 = vld [vmem:[%s3072_s0 + $0x10] sm:$0xff] }
 0x1bf   : > { %9285 = vst [vmem:[#allocation106_spill] sm:$0xff] %v9284_v57  ;;  %v663_v13 = vsel %vm9289_vm5, %v3457_v35, %v3479_v48  ;;  %v1106_v47 = vperm.slane %v1104_v5, 0  ;;  %v4007_v9 = vpop.permute.xlu1 %1284  ;;  %vm724_vm2 = vcmp.gt.f32.partialorder %v666_v8, %v3231_v32  ;;  %vm4014_vm11 = vcmp.eq.s32.totalorder %v832_v50, 1  ;;  %vm4025_vm7 = vmor %vm723_vm14, %vm3967_vm6 }
 0x1c0   : > { %9292 = vst [vmem:[#allocation107_spill] sm:$0xff] %v4005_v54  ;;  %v9293_v35 = vmov 0  ;;  %vm4019_vm1 = vcmp.eq.s32.totalorder %v1035_v30, %v3746_v7  ;;  %v1107_v6 = vperm.slane %v1105_v24, 0  ;;  %v9298_v43 = vmov 0  ;;  %v4029_v5 = vpop.permute.xlu0 %1282  ;;  %vm4042_vm6 = vmor %vm724_vm2, %vm3985_vm13 }
 0x1c1   : > { %v9294_v35 = vsel %vm4014_vm11, 4294967295, %v9293_v35  ;;  %v9299_v43 = vsel %vm4025_vm7, 4294967295, %v9298_v43  ;;  %vm404_vm5 = vcmp.gt.f32.partialorder %v3789_v62, %v3145_v14  ;;  %vm405_vm9 = vcmp.gt.f32.partialorder %v3802_v44, %v3217_v28 }
 0x1c2   : > { %9295 = vst [vmem:[#allocation108_spill] sm:$0xff] %v9294_v35  ;;  %vm751_vm12 = vcmp.eq.f32.partialorder %v679_v3, %v3145_v14  ;;  %v9301_v8 = vmov 0  ;;  %vm9303_vm14 = vcmp.lt.s32.totalorder %v3228_v31, 3  ;;  %v1174_v44 = vsel %vm4001_vm3, 1, %v9243_v41 }
 0x1c3   : > { %v9302_v8 = vsel %vm4042_vm6, 4294967295, %v9301_v8  ;;  %v1021_v62 = vsel %vm9303_vm14, %v3689_v38, %v3539_v51  ;;  %vm9304_vm7 = vnez %v9257_v60  ;;  %v9305_v50 = vmov 0  ;;  %vm4067_vm15 = vmand %vm3823_vm10, %vm751_vm12 }
 0x1c4   : > { %vm4055_vm4 = vmor %vm404_vm5, %vm9304_vm7  ;;  %vm9307_vm2 = vnez %v9263_v58  ;;  %v9308_v30 = vmov 0  ;;  %vm752_vm3 = vcmp.eq.f32.partialorder %v663_v13, %v3217_v28  ;;  %vm4080_vm5 = vcmp.eq.s32.totalorder %v1106_v47, 1  ;;  %1653 = vrot.lane.b32.xlu2 %v3157_v16, %s2934_s18 }
 0x1c5   : > { %v9306_v50 = vsel %vm4055_vm4, 4294967295, %v9305_v50  ;;  %vm4061_vm13 = vmor %vm405_vm9, %vm9307_vm2  ;;  %v9313_v58 = vmov 0  ;;  %v1175_v46 = vsel %vm4019_vm1, 1, %v9243_v41  ;;  %vm717_vm12 = vcmp.gt.f32.partialorder %v679_v3, %v3145_v14  ;;  %1651 = vrot.lane.b32.xlu1 %v3160_v17, %s2934_s18 }
 0x1c6   : > { %v9309_v30 = vsel %vm4061_vm13, 4294967295, %v9308_v30  ;;  %vm9312_vm9 = vmmov %vm9303_vm14  ;;  %v9314_v58 = vsel %vm4080_vm5, 4294967295, %v9313_v58  ;;  %vm4088_vm14 = vcmp.eq.s32.totalorder %v1107_v6, 1  ;;  %v9316_v61 = vmov 0  ;;  %1649 = vrot.lane.b32.xlu0 %v3139_v12, %s2934_s18  ;;  %v1311_v47 = vpop.permute.xlu2 %1310 }
 0x1c7   : > { %v1005_v60 = vsel %vm9312_vm9, %v3539_v51, %v3689_v38  ;;  %9315 = vst [vmem:[#allocation109_spill] sm:$0xff] %v9314_v58  ;;  %v9317_v61 = vsel %vm4088_vm14, 4294967295, %v9316_v61  ;;  %vm9320_vm7 = vnez %v9272_v1  ;;  %vm9321_vm13 = vnez %v9251_v10  ;;  %vm4114_vm9 = vmor %vm717_vm12, %vm4067_vm15  ;;  %v4138_v48 = vpop.permute.xlu1 %1290 }
 0x1c8   : > { %9318 = vst [vmem:[#allocation110_spill] sm:$0xff] %v9317_v61  ;;  %vm4102_vm4 = vmand %vm9321_vm13, %vm752_vm3  ;;  %vm1090_vm1 = vcmp.eq.f32.partialorder %v1021_v62, %v3130_v11  ;;  %v1176_v38 = vperm.slane %v1174_v44, 0  ;;  %v9324_v3 = vmov 0  ;;  %vm1091_vm3 = vcmp.eq.f32.partialorder %v1005_v60, %v3202_v25 }
 0x1c9   : > { %v9325_v3 = vsel %vm4114_vm9, 4294967295, %v9324_v3  ;;  %vm4121_vm13 = vmand %vm4080_vm5, %vm1090_vm1  ;;  %v1177_v16 = vperm.slane %v1175_v46, 0  ;;  %vm9329_vm2 = vnez %v9278_v55  ;;  %vm718_vm15 = vcmp.gt.f32.partialorder %v663_v13, %v3217_v28  ;;  %v4151_v13 = vpop.permute.xlu0 %1288 }
 0x1ca   : > { %vm1129_vm12 = vmand %vm4088_vm14, %vm1091_vm3  ;;  %vm1056_vm5 = vcmp.gt.f32.partialorder %v1021_v62, %v3130_v11  ;;  %vm9331_vm10 = vcmp.lt.s32.totalorder %v3228_v31, 125  ;;  %v9335_v44 = vmov 0  ;;  %vm9337_vm1 = vnez %v9265_v39 }
 0x1cb   : > { %v4144_v6 = vsel %vm9331_vm10, %v3872_v49, %v1311_v47  ;;  %vm9333_vm6 = vmmov %vm9331_vm10  ;;  %vm1057_vm9 = vcmp.gt.f32.partialorder %v1005_v60, %v3202_v25  ;;  %vm4172_vm14 = vcmp.eq.s32.totalorder %v1176_v38, 1  ;;  %v9341_v62 = vmov 0 }
 0x1cc   : > { %9332 = vst [vmem:[#allocation111_spill] sm:$0xff] %v4144_v6  ;;  %v4149_v12 = vsel %vm9333_vm6, %v1311_v47, %v3872_v49  ;;  %vm4155_vm3 = vmor %vm718_vm15, %vm4102_vm4  ;;  %v9342_v62 = vsel %vm4172_vm14, 4294967295, %v9341_v62  ;;  %v9347_v60 = vmov 0  ;;  %1659 = vrot.lane.b32.xlu2 %v3172_v19, %s2934_s18  ;;  %v9462_v6 = vld [vmem:[#allocation64_spill] sm:$0xff]  ;;  %v9492_v7 = vmov 0 }
 0x1cd   : > { %9334 = vst [vmem:[#allocation112_spill] sm:$0xff] %v4149_v12  ;;  %v9336_v44 = vsel %vm4155_vm3, 4294967295, %v9335_v44  ;;  %vm9338_vm10 = vmand %vm9320_vm7, %vm9337_vm1  ;;  %vm4186_vm1 = vcmp.eq.s32.totalorder %v1177_v16, 1  ;;  %1657 = vrot.lane.b32.xlu1 %v3175_v20, %s2934_s18  ;;  %v9459_v12 = vmov 0 }
 0x1ce   : > { %v885_v11 = vsel %vm9338_vm10, 1, %v9243_v41  ;;  %vm4168_vm6 = vmor %vm1056_vm5, %vm4121_vm13  ;;  %9343 = vst [vmem:[#allocation113_spill] sm:$0xff] %v9342_v62  ;;  %v9348_v60 = vsel %vm4186_vm1, 4294967295, %v9347_v60  ;;  %vm9350_vm13 = vcmp.lt.s32.totalorder %v3228_v31, 3  ;;  %vm9351_vm5 = vnez %v9239_v37  ;;  %1655 = vrot.lane.b32.xlu0 %v3154_v15, %s2934_s18  ;;  %v1317_v15 = vpop.permute.xlu2 %1316 }
 0x1cf   : > { %vm9344_vm4 = vmand %vm4014_vm11, %vm3937_vm8  ;;  %9349 = vst [vmem:[#allocation114_spill] sm:$0xff] %v9348_v60  ;;  %v1027_v46 = vsel %vm9350_vm13, %v3767_v2, %v3564_v53  ;;  %vm9360_vm10 = vnez %v9314_v58  ;;  %v1297_v47 = vpop.permute.xlu1 %1296 }
 0x1d0   : > { %v886_v39 = vsel %vm9344_vm4, 1, %v9243_v41  ;;  %vm4182_vm15 = vmor %vm1057_vm9, %vm1129_vm12  ;;  %vm1102_vm4 = vcmp.eq.f32.partialorder %v1027_v46, %v3160_v17 }
 0x1d1   : > { %vm9352_vm8 = vmand %vm9329_vm2, %vm9351_vm5  ;;  %v4280_v49 = vpop.permute.xlu0 %1294 }
 0x1d2   : > { %v572_v21 = vsel %vm9352_vm8, 1, %v9243_v41  ;;  %vm9353_vm9 = vmmov %vm9350_vm13  ;;  %vm9355_vm13 = vnez %v9247_v36 }
 0x1d3   : > { %v1011_v51 = vsel %vm9353_vm9, %v3564_v53, %v3767_v2  ;;  %vm9356_vm5 = vmand %vm3975_vm0, %vm9355_vm13  ;;  %v917_v38 = vadd.s32 %v885_v11, %v572_v21  ;;  %vm9366_vm13 = vnez %v9317_v61  ;;  %v9367_v11 = vld [vmem:[#allocation72_spill] sm:$0xff] }
 0x1d4   : > { %v573_v37 = vsel %vm9356_vm5, 1, %v9243_v41  ;;  %vm1198_vm8 = vmand %vm4172_vm14, %vm4168_vm6  ;;  %vm9362_vm6 = vnez %v9299_v43  ;;  %1665 = vrot.lane.b32.xlu2 %v3187_v22, %s2934_s18 }
 0x1d5   : > { %v918_v53 = vadd.s32 %v886_v39, %v573_v37  ;;  %vm1199_vm9 = vmand %vm4186_vm1, %vm4182_vm15  ;;  %v1230_v2 = vsel %vm1198_vm8, 1, %v9243_v41  ;;  %vm1103_vm8 = vcmp.eq.f32.partialorder %v1011_v51, %v3231_v32  ;;  %1663 = vrot.lane.b32.xlu1 %v3190_v23, %s2934_s18  ;;  %v9381_v37 = vld [vmem:[#allocation14_spill] sm:$0xff] }
 0x1d6   : > { %v1231_v36 = vsel %vm1199_vm9, 1, %v9243_v41  ;;  %v4241_v40 = vadd.s32 %v1230_v2, %v917_v38  ;;  %vm1140_vm3 = vmand %vm9360_vm10, %vm1102_vm4  ;;  %vm9364_vm9 = vnez %v9302_v8  ;;  %vm1068_vm4 = vcmp.gt.f32.partialorder %v1027_v46, %v3160_v17  ;;  %1661 = vrot.lane.b32.xlu0 %v9381_v37, %s2934_s18  ;;  %v1323_v23 = vpop.permute.xlu2 %1322 }
 0x1d7   : > { %v4248_v19 = vadd.s32 %v1231_v36, %v918_v53  ;;  %vm9363_vm15 = vmand %vm9320_vm7, %vm9362_vm6  ;;  %vm9368_vm10 = vcmp.lt.s32.totalorder %v3228_v31, 3  ;;  %vm1069_vm6 = vcmp.gt.f32.partialorder %v1011_v51, %v3231_v32  ;;  %vm9369_vm7 = vcmp.lt.s32.totalorder %v3228_v31, 125  ;;  %v1303_v38 = vpop.permute.xlu1 %1302 }
 0x1d8   : > { %9359 = vst [vmem:[#allocation115_spill] sm:$0xff] %v4241_v40  ;;  %v897_v20 = vsel %vm9363_vm15, 1, %v9243_v41  ;;  %vm9365_vm5 = vmand %vm4014_vm11, %vm9364_vm9  ;;  %v1024_v43 = vsel %vm9368_vm10, %v3719_v4, %v9367_v11  ;;  %v4273_v8 = vsel %vm9369_vm7, %v4007_v9, %v1317_v15  ;;  %vm9376_vm9 = vnez %v9276_v63 }
 0x1d9   : > { %9361 = vst [vmem:[#allocation116_spill] sm:$0xff] %v4248_v19  ;;  %v898_v16 = vsel %vm9365_vm5, 1, %v9243_v41  ;;  %vm1141_vm12 = vmand %vm9366_vm13, %vm1103_vm8  ;;  %v4344_v2 = vpop.permute.xlu0 %1300 }
 0x1da   : > { %vm1172_vm15 = vmor %vm1068_vm4, %vm1140_vm3  ;;  %9370 = vst [vmem:[#allocation72_spill] sm:$0xff] %v4273_v8  ;;  %vm9374_vm3 = vnez %v9268_v0 }
 0x1db   : > { %vm9371_vm5 = vmmov %vm9369_vm7 }
 0x1dc   : > { %v4278_v17 = vsel %vm9371_vm5, %v1317_v15, %v4007_v9  ;;  %vm9373_vm8 = vmmov %vm9368_vm10  ;;  %1671 = vrot.lane.b32.xlu2 %v3202_v25, %s2934_s18 }
 0x1dd   : > { %9372 = vst [vmem:[#allocation117_spill] sm:$0xff] %v4278_v17  ;;  %v1008_v39 = vsel %vm9373_vm8, %v9367_v11, %v3719_v4  ;;  %vm9375_vm10 = vmand %vm9329_vm2, %vm9374_vm3  ;;  %vm1096_vm8 = vcmp.eq.f32.partialorder %v1024_v43, %v3145_v14  ;;  %1669 = vrot.lane.b32.xlu1 %v3205_v26, %s2934_s18 }
 0x1de   : > { %v584_v24 = vsel %vm9375_vm10, 1, %v9243_v41  ;;  %vm1173_vm7 = vmor %vm1069_vm6, %vm1141_vm12  ;;  %vm1097_vm12 = vcmp.eq.f32.partialorder %v1008_v39, %v3217_v28  ;;  %vm9379_vm6 = vnez %v9314_v58  ;;  %vm1062_vm10 = vcmp.gt.f32.partialorder %v1024_v43, %v3145_v14  ;;  %v1329_v43 = vpop.permute.xlu2 %1328 }
 0x1df   : > { %vm9377_vm4 = vmand %vm3975_vm0, %vm9376_vm9  ;;  %v929_v46 = vadd.s32 %v897_v20, %v584_v24  ;;  %vm9383_vm9 = vnez %v9325_v3 }
 0x1e0   : > { %v585_v9 = vsel %vm9377_vm4, 1, %v9243_v41  ;;  %vm1210_vm5 = vmand %vm4172_vm14, %vm1172_vm15 }
 0x1e1   : > { %v930_v4 = vadd.s32 %v898_v16, %v585_v9  ;;  %vm1211_vm11 = vmand %vm4186_vm1, %vm1173_vm7  ;;  %v1242_v0 = vsel %vm1210_vm5, 1, %v9243_v41  ;;  %vm9382_vm7 = vnez %v9272_v1  ;;  %vm9385_vm5 = vnez %v9294_v35 }
 0x1e2   : > { %v1243_v21 = vsel %vm1211_vm11, 1, %v9243_v41  ;;  %v4306_v51 = vadd.s32 %v1242_v0, %v929_v46  ;;  %vm1134_vm3 = vmand %vm9379_vm6, %vm1096_vm8  ;;  %vm1063_vm11 = vcmp.gt.f32.partialorder %v1008_v39, %v3217_v28  ;;  %vm9386_vm8 = vnez %v9336_v44  ;;  %v1309_v39 = vpop.permute.xlu1 %1308  ;;  %v4392_v46 = vpop.permute.xlu0 %1306 }
 0x1e3   : > { %v4311_v63 = vadd.s32 %v1243_v21, %v930_v4  ;;  %vm1135_vm15 = vmand %vm9366_vm13, %vm1097_vm12  ;;  %vm9388_vm1 = vcmp.lt.s32.totalorder %v3228_v31, 125 }
 0x1e4   : > { %9378 = vst [vmem:[#allocation118_spill] sm:$0xff] %v4306_v51  ;;  %vm9384_vm4 = vmand %vm9382_vm7, %vm9383_vm9  ;;  %v4337_v53 = vsel %vm9388_vm1, %v4138_v48, %v1323_v23  ;;  %1677 = vrot.lane.b32.xlu2 %v3217_v28, %s2934_s18  ;;  %vm9453_vm7 = vcmp.lt.s32.totalorder %v3228_v31, 2 }
 0x1e5   : > { %9380 = vst [vmem:[#allocation119_spill] sm:$0xff] %v4311_v63  ;;  %v891_v14 = vsel %vm9384_vm4, 1, %v9243_v41  ;;  %vm9387_vm6 = vmand %vm9385_vm5, %vm9386_vm8  ;;  %1675 = vrot.lane.b32.xlu1 %v3220_v29, %s2934_s18 }
 0x1e6   : > { %v892_v22 = vsel %vm9387_vm6, 1, %v9243_v41  ;;  %vm1166_vm12 = vmor %vm1062_vm10, %vm1134_vm3  ;;  %9389 = vst [vmem:[#allocation14_spill] sm:$0xff] %v4337_v53  ;;  %vm9392_vm6 = vnez %v9306_v50  ;;  %v1335_v4 = vpop.permute.xlu2 %1334  ;;  %v9452_v53 = vld [vmem:[#allocation51_spill] sm:$0xff] }
 0x1e7   : > { %vm1167_vm13 = vmor %vm1063_vm11, %vm1135_vm15  ;;  %vm9396_vm11 = vnez %v9348_v60 }
 0x1e8   : > { %vm9390_vm9 = vmmov %vm9388_vm1  ;;  %vm9394_vm1 = vnez %v9309_v30  ;;  %v9399_v30 = vld [vmem:[#allocation15_spill] sm:$0xff] }
 0x1e9   : > { %v4342_v3 = vsel %vm9390_vm9, %v1323_v23, %v4138_v48  ;;  %vm9393_vm3 = vmand %vm9329_vm2, %vm9392_vm6  ;;  %1667 = vrot.lane.b32.xlu0 %v9399_v30, %s2934_s18  ;;  %v9429_v30 = vld [vmem:[#allocation24_spill] sm:$0xff] }
 0x1ea   : > { %9391 = vst [vmem:[#allocation120_spill] sm:$0xff] %v4342_v3  ;;  %v578_v44 = vsel %vm9393_vm3, 1, %v9243_v41  ;;  %vm9395_vm10 = vmand %vm3975_vm0, %vm9394_vm1  ;;  %v1315_v0 = vpop.permute.xlu1 %1314  ;;  %v4418_v37 = vpop.permute.xlu0 %1312  ;;  %v9451_v3 = vld [vmem:[#allocation47_spill] sm:$0xff] }
 0x1eb   : > { %v579_v36 = vsel %vm9395_vm10, 1, %v9243_v41  ;;  %vm1204_vm15 = vmand %vm4172_vm14, %vm1166_vm12  ;;  %v923_v48 = vadd.s32 %v891_v14, %v578_v44  ;;  %9415 = vst [vmem:[#allocation129_spill] sm:$0xff] %v4418_v37  ;;  %v2699_v14 = vld [vmem:[%s3072_s0 + $0xd8] sm:$0xff]  ;;  %v9422_v44 = vld [vmem:[#allocation34_spill] sm:$0xff]  ;;  %v4562_v17 = vsel %vm9453_vm7, %v9452_v53, %v9451_v3 }
 0x1ec   : > { %v924_v20 = vadd.s32 %v892_v22, %v579_v36  ;;  %vm1205_vm4 = vmand %vm9396_vm11, %vm1167_vm13  ;;  %v1236_v16 = vsel %vm1204_vm15, 1, %v9243_v41  ;;  %1683 = vrot.lane.b32.xlu2 %v3231_v32, %s2934_s18  ;;  %vm9444_vm11 = vnez %v9232_v45 }
 0x1ed   : > { %v1237_v50 = vsel %vm1205_vm4, 1, %v9243_v41  ;;  %v4364_v15 = vadd.s32 %v1236_v16, %v923_v48  ;;  %vm9400_vm13 = vmmov %vm9390_vm9  ;;  %1681 = vrot.lane.b32.xlu1 %v3234_v33, %s2934_s18  ;;  %v9421_v33 = vld [vmem:[#allocation22_spill] sm:$0xff]  ;;  %v9424_v48 = vld [vmem:[#allocation19_spill] sm:$0xff] }
 0x1ee   : > { %v4366_v11 = vadd.s32 %v1237_v50, %v924_v20  ;;  %v4376_v24 = vsel %vm9400_vm13, %v1297_v47, %v1329_v43  ;;  %vm9402_vm8 = vmmov %vm9390_vm9  ;;  %v4426_v22 = vpop.permute.xlu2 %1373  ;;  %vm9423_vm13 = vcmp.lt.s32.totalorder %v3228_v31, 1  ;;  %v9425_v20 = vld [vmem:[#allocation41_spill] sm:$0xff]  ;;  %v9428_v50 = vld [vmem:[#allocation36_spill] sm:$0xff] }
 0x1ef   : > { %9397 = vst [vmem:[#allocation121_spill] sm:$0xff] %v4364_v15  ;;  %v4380_v9 = vsel %vm9402_vm8, %v1329_v43, %v1297_v47  ;;  %vm9404_vm12 = vmmov %vm9402_vm8  ;;  %v2698_v47 = vld [vmem:[%s3072_s0 + $0xa8] sm:$0xff]  ;;  %v4444_v36 = vsel %vm9423_vm13, %v9422_v44, %v9421_v33 }
 0x1f0   : > { %9398 = vst [vmem:[#allocation122_spill] sm:$0xff] %v4366_v11  ;;  %v4385_v25 = vsel %vm9404_vm12, %v3893_v56, %v1309_v39  ;;  %vm9405_vm9 = vmmov %vm9402_vm8 }
 0x1f1   : > { %9401 = vst [vmem:[#allocation15_spill] sm:$0xff] %v4376_v24  ;;  %v4390_v26 = vsel %vm9405_vm9, %v1309_v39, %v3893_v56  ;;  %1673 = vrot.lane.b32.xlu0 %v2698_v47, %s2934_s18  ;;  %vm9407_vm6 = vmmov %vm9402_vm8  ;;  %v9449_v24 = vmov 0 }
 0x1f2   : > { %9403 = vst [vmem:[#allocation123_spill] sm:$0xff] %v4380_v9  ;;  %v4402_v21 = vsel %vm9407_vm6, %v1303_v38, %v1335_v4  ;;  %vm9409_vm3 = vmmov %vm9407_vm6  ;;  %v1321_v23 = vpop.permute.xlu1 %1320  ;;  %v9447_v9 = vmov 0 }
 0x1f3   : > { %9406 = vst [vmem:[#allocation124_spill] sm:$0xff] %v4390_v26  ;;  %v4406_v56 = vsel %vm9409_vm3, %v1335_v4, %v1303_v38  ;;  %vm9411_vm1 = vmmov %vm9409_vm3  ;;  %v4438_v38 = vpop.permute.xlu0 %1318  ;;  %v9433_v4 = vld [vmem:[#allocation38_spill] sm:$0xff]  ;;  %v9575_v26 = vmov 0 }
 0x1f4   : > { %9408 = vst [vmem:[#allocation125_spill] sm:$0xff] %v4402_v21  ;;  %v4411_v28 = vsel %vm9411_vm1, %v4029_v5, %v1315_v0  ;;  %vm9413_vm10 = vmmov %vm9411_vm1  ;;  %v4536_v21 = vld [vmem:[%s3072_s0 + $0x68] sm:$0xff] }
 0x1f5   : > { %9410 = vst [vmem:[#allocation126_spill] sm:$0xff] %v4406_v56  ;;  %v4416_v29 = vsel %vm9413_vm10, %v1315_v0, %v4029_v5  ;;  %vm9416_vm15 = vmmov %vm9411_vm1  ;;  %v9434_v0 = vld [vmem:[#allocation28_spill] sm:$0xff]  ;;  %1720 = vrot.lane.b32.xlu1 %v3243_v34, %s2934_s18  ;;  %v4531_v56 = vld [vmem:[%s3072_s0 + $0x60] sm:$0xff] }
 0x1f6   : > { %9412 = vst [vmem:[#allocation127_spill] sm:$0xff] %v4411_v28  ;;  %v4431_v5 = vsel %vm9416_vm15, %v4151_v13, %v1321_v23  ;;  %vm9418_vm4 = vmmov %vm9411_vm1  ;;  %v4564_v8 = vpop.permute.xlu2 %1623 }
 0x1f7   : > { %9414 = vst [vmem:[#allocation128_spill] sm:$0xff] %v4416_v29  ;;  %v4436_v32 = vsel %vm9418_vm4, %v1321_v23, %v4151_v13  ;;  %vm9426_vm8 = vmmov %vm9423_vm13 }
 0x1f8   : > { %9417 = vst [vmem:[#allocation130_spill] sm:$0xff] %v4431_v5  ;;  %v362_v16 = vsel %vm9426_vm8, %v9425_v20, %v9424_v48  ;;  %vm9427_vm12 = vmmov %vm9426_vm8 }
 0x1f9   : > { %1679 = vrot.lane.b32.xlu0 %v2699_v14, %s2934_s18  ;;  %9419 = vst [vmem:[#allocation131_spill] sm:$0xff] %v4436_v32  ;;  %v4454_v13 = vsel %vm9427_vm12, %v9421_v33, %v9422_v44  ;;  %vm9430_vm9 = vmmov %vm9426_vm8  ;;  %v4485_v33 = vld [vmem:[%s3072_s0] sm:$0xff]  ;;  %v9494_v32 = vmov 0 }
 0x1fa   : > { %9420 = vst [vmem:[#allocation132_spill] sm:$0xff] %v4438_v38  ;;  %v4460_v43 = vsel %vm9430_vm9, %v9429_v30, %v9428_v50  ;;  %vm9431_vm6 = vmmov %vm9426_vm8  ;;  %vm414_vm15 = vcmp.eq.f32.partialorder %v4444_v36, %v4485_v33  ;;  %v4490_v44 = vld [vmem:[%s3072_s0 + $0x80] sm:$0xff]  ;;  %1966 = vrot.lane.b32.xlu2 %v4485_v33, %s2936_s6  ;;  %v1327_v63 = vpop.permute.xlu1 %1326  ;;  %v9457_v38 = vmov 0 }
 0x1fb   : > { %v4466_v39 = vsel %vm9431_vm6, %v9428_v50, %v9429_v30  ;;  %vm9432_vm3 = vmmov %vm9431_vm6  ;;  %vm430_vm4 = vcmp.eq.f32.partialorder %v362_v16, %v4490_v44  ;;  %v4508_v50 = vld [vmem:[%s3072_s0 + $0x38] sm:$0xff]  ;;  %v4513_v30 = vld [vmem:[%s3072_s0 + $0x88] sm:$0xff]  ;;  %vm9438_vm6 = vnez %v9228_v59  ;;  %9443 = vst [vmem:[#allocation34_spill] sm:$0xff] %v4536_v21  ;;  %v4599_v37 = vpop.permute.xlu0 %1324 }
 0x1fc   : > { %v346_v47 = vsel %vm9432_vm3, %v9424_v48, %v9425_v20  ;;  %vm9435_vm1 = vmmov %vm9432_vm3  ;;  %v4498_v48 = vld [vmem:[%s3072_s0 + $0x8] sm:$0xff]  ;;  %v4503_v20 = vld [vmem:[%s3072_s0 + $0x30] sm:$0xff]  ;;  %vm421_vm12 = vcmp.eq.f32.partialorder %v4460_v43, %v4508_v50  ;;  %9437 = vst [vmem:[#allocation22_spill] sm:$0xff] %v4513_v30 }
 0x1fd   : > { %v4476_v14 = vsel %vm9435_vm1, %v9434_v0, %v9433_v4  ;;  %vm9436_vm10 = vmmov %vm9435_vm1  ;;  %vm415_vm13 = vcmp.eq.f32.partialorder %v4454_v13, %v4498_v48  ;;  %vm420_vm8 = vcmp.eq.f32.partialorder %v4466_v39, %v4503_v20  ;;  %vm431_vm9 = vcmp.eq.f32.partialorder %v346_v47, %v4513_v30  ;;  %9454 = vst [vmem:[#allocation19_spill] sm:$0xff] %v4564_v8  ;;  %v9461_v8 = vld [vmem:[#allocation55_spill] sm:$0xff] }
 0x1fe   : > { %v4482_v23 = vsel %vm9436_vm10, %v9433_v4, %v9434_v0  ;;  %vm4518_vm3 = vmand %vm9438_vm6, %vm414_vm15  ;;  %vm427_vm15 = vcmp.eq.f32.partialorder %v4476_v14, %v4536_v21  ;;  %9468 = vst [vmem:[#allocation24_spill] sm:$0xff] %v4599_v37  ;;  %v9483_v0 = vld [vmem:[#allocation52_spill] sm:$0xff]  ;;  %v9487_v37 = vmov 0  ;;  %v4710_v5 = vpop.permute.xlu2 %1629 }
 0x1ff   : > { %vm4526_vm1 = vmand %vm9438_vm6, %vm430_vm4  ;;  %vm426_vm10 = vcmp.eq.f32.partialorder %v4482_v23, %v4531_v56  ;;  %9497 = vst [vmem:[#allocation28_spill] sm:$0xff] %v4710_v5  ;;  %vm392_vm0 = vcmp.gt.f32.partialorder %v4482_v23, %v4531_v56  ;;  %v9541_v23 = vmov 0  ;;  %v4860_v4 = vld [vmem:[%s3072_s0 + $0x50] sm:$0xff] }
 0x200   : > { %vm4542_vm14 = vmand %vm9444_vm11, %vm415_vm13  ;;  %9543 = vst [vmem:[#allocation64_spill] sm:$0xff] %v4860_v4 }
 0x201   : > { %1718 = vrot.lane.b32.xlu0 %v3228_v31, %s2934_s18  ;;  %vm4548_vm4 = vmand %vm9438_vm6, %vm420_vm8  ;;  %vm396_vm8 = vcmp.gt.f32.partialorder %v362_v16, %v4490_v44 }
 0x202   : > { %v9448_v9 = vsel %vm4548_vm4, 4294967295, %v9447_v9  ;;  %vm4554_vm5 = vmand %vm9444_vm11, %vm421_vm12  ;;  %1972 = vrot.lane.b32.xlu2 %v4503_v20, %s2936_s6  ;;  %v1333_v29 = vpop.permute.xlu1 %1332 }
 0x203   : > { %v9450_v24 = vsel %vm4554_vm5, 4294967295, %v9449_v24  ;;  %vm4568_vm13 = vmand %vm9444_vm11, %vm431_vm9  ;;  %vm9463_vm9 = vcmp.lt.s32.totalorder %v3228_v31, 2  ;;  %vm9464_vm5 = vcmp.lt.s32.totalorder %v3228_v31, 125  ;;  %v4744_v28 = vpop.permute.xlu0 %1330 }
 0x204   : > { %vm4575_vm12 = vmand %vm9438_vm6, %vm426_vm10  ;;  %v675_v11 = vsel %vm9463_vm9, %v9462_v6, %v9461_v8  ;;  %v4592_v16 = vsel %vm9464_vm5, %v4280_v49, %v1327_v63  ;;  %vm9478_vm6 = vnez %v9241_v52  ;;  %9506 = vst [vmem:[#allocation55_spill] sm:$0xff] %v4744_v28  ;;  %v4883_v28 = vld [vmem:[%s3072_s0 + $0x40] sm:$0xff] }
 0x205   : > { %v9458_v38 = vsel %vm4575_vm12, 4294967295, %v9457_v38  ;;  %vm4581_vm7 = vmand %vm9444_vm11, %vm427_vm15  ;;  %9465 = vst [vmem:[#allocation41_spill] sm:$0xff] %v4592_v16  ;;  %vm397_vm15 = vcmp.gt.f32.partialorder %v346_v47, %v4513_v30  ;;  %v9474_v47 = vld [vmem:[#allocation49_spill] sm:$0xff]  ;;  %vm9486_vm12 = vnez %v9251_v10 }
 0x206   : > { %v9460_v12 = vsel %vm4581_vm7, 4294967295, %v9459_v12  ;;  %vm9466_vm10 = vmmov %vm9464_vm5  ;;  %v9547_v16 = vld [vmem:[#allocation77_spill] sm:$0xff] }
 0x207   : > { %v4597_v15 = vsel %vm9466_vm10, %v1327_v63, %v4280_v49  ;;  %vm9469_vm11 = vmmov %vm9463_vm9  ;;  %v9471_v49 = vmov 0  ;;  %vm727_vm10 = vcmp.eq.f32.partialorder %v4562_v17, %v4485_v33  ;;  %v9473_v63 = vld [vmem:[#allocation54_spill] sm:$0xff] }
 0x208   : > { %9467 = vst [vmem:[#allocation36_spill] sm:$0xff] %v4597_v15  ;;  %v4606_v19 = vsel %vm9469_vm11, %v9451_v3, %v9452_v53  ;;  %vm9470_vm5 = vmmov %vm9463_vm9  ;;  %v9479_v3 = vmov 0  ;;  %v4673_v15 = vld [vmem:[%s3072_s0 + $0x20] sm:$0xff] }
 0x209   : > { %v659_v40 = vsel %vm9470_vm5, %v9461_v8, %v9462_v6  ;;  %vm4614_vm9 = vmor %vm396_vm8, %vm4526_vm1  ;;  %v4630_v6 = vsel %vm9470_vm5, %v9473_v63, %v9474_v47  ;;  %v9476_v8 = vmov 0  ;;  %vm743_vm8 = vcmp.eq.f32.partialorder %v675_v11, %v4490_v44  ;;  %9489 = vst [vmem:[#allocation38_spill] sm:$0xff] %v4673_v15  ;;  %1970 = vrot.lane.b32.xlu1 %v4673_v15, %s2936_s6 }
 0x20a   : > { %v9472_v49 = vsel %vm4614_vm9, 4294967295, %v9471_v49  ;;  %vm9475_vm11 = vmmov %vm9470_vm5  ;;  %vm744_vm5 = vcmp.eq.f32.partialorder %v659_v40, %v4513_v30  ;;  %1968 = vrot.lane.b32.xlu0 %v4697_v27, %s2936_s6  ;;  %1978 = vrot.lane.b32.xlu2 %v4531_v56, %s2936_s6  ;;  %9550 = vst [vmem:[#allocation54_spill] sm:$0xff] %v4883_v28 }
 0x20b   : > { %v4624_v53 = vsel %vm9475_vm11, %v9474_v47, %v9473_v63  ;;  %vm4634_vm1 = vmor %vm397_vm15, %vm4568_vm13  ;;  %vm728_vm11 = vcmp.eq.f32.partialorder %v4606_v19, %v4498_v48  ;;  %vm733_vm15 = vcmp.eq.f32.partialorder %v4630_v6, %v4503_v20  ;;  %v9484_v63 = vld [vmem:[#allocation56_spill] sm:$0xff] }
 0x20c   : > { %v9477_v8 = vsel %vm4634_vm1, 4294967295, %v9476_v8  ;;  %vm4641_vm7 = vmand %vm9478_vm6, %vm727_vm10  ;;  %vm734_vm10 = vcmp.eq.f32.partialorder %v4624_v53, %v4508_v50 }
 0x20d   : > { %v9480_v3 = vsel %vm4641_vm7, 4294967295, %v9479_v3  ;;  %vm4650_vm13 = vmand %vm9478_vm6, %vm743_vm8  ;;  %vm9485_vm7 = vcmp.lt.s32.totalorder %v3228_v31, 2 }
 0x20e   : > { %v4662_v47 = vsel %vm9485_vm7, %v9484_v63, %v9483_v0  ;;  %vm4666_vm4 = vmand %vm9486_vm12, %vm728_vm11  ;;  %vm709_vm7 = vcmp.gt.f32.partialorder %v675_v11, %v4490_v44 }
 0x20f   : > { %v9488_v37 = vsel %vm4666_vm4, 4294967295, %v9487_v37  ;;  %vm4679_vm8 = vmand %vm9486_vm12, %vm744_vm5  ;;  %vm387_vm5 = vcmp.gt.f32.partialorder %v4460_v43, %v4508_v50  ;;  %v9518_v43 = vmov 0 }
 0x210   : > { %vm4686_vm11 = vmand %vm9478_vm6, %vm733_vm15  ;;  %vm9496_vm15 = vcmp.lt.s32.totalorder %v3228_v31, 2 }
 0x211   : > { %v9493_v7 = vsel %vm4686_vm11, 4294967295, %v9492_v7  ;;  %vm4692_vm4 = vmand %vm9486_vm12, %vm734_vm10  ;;  %v4707_v11 = vsel %vm9496_vm15, %v9483_v0, %v9484_v63  ;;  %vm710_vm11 = vcmp.gt.f32.partialorder %v659_v40, %v4513_v30  ;;  %vm739_vm15 = vcmp.eq.f32.partialorder %v4662_v47, %v4531_v56  ;;  %v9500_v40 = vld [vmem:[#allocation63_spill] sm:$0xff]  ;;  %1976 = vrot.lane.b32.xlu1 %v4860_v4, %s2936_s6  ;;  %v9609_v4 = vld [vmem:[#allocation17_spill] sm:$0xff] }
 0x212   : > { %v9495_v32 = vsel %vm4692_vm4, 4294967295, %v9494_v32  ;;  %vm4722_vm4 = vmor %vm709_vm7, %vm4650_vm13  ;;  %vm9501_vm12 = vcmp.lt.s32.totalorder %v3228_v31, 3  ;;  %vm9502_vm10 = vcmp.lt.s32.totalorder %v3228_v31, 125  ;;  %1974 = vrot.lane.b32.xlu0 %v4883_v28, %s2936_s6  ;;  %v1339_v28 = vpop.permute.xlu1 %1338  ;;  %v9571_v0 = vmov 0 }
 0x213   : > { %v4732_v63 = vsel %vm9501_vm12, %v3631_v18, %v9500_v40  ;;  %v4737_v5 = vsel %vm9502_vm10, %v4344_v2, %v1333_v29  ;;  %vm9504_vm13 = vmmov %vm9502_vm10  ;;  %vm381_vm12 = vcmp.gt.f32.partialorder %v4454_v13, %v4498_v48  ;;  %vm386_vm10 = vcmp.gt.f32.partialorder %v4466_v39, %v4503_v20  ;;  %v9523_v39 = vld [vmem:[#allocation66_spill] sm:$0xff] }
 0x214   : > { %9503 = vst [vmem:[#allocation47_spill] sm:$0xff] %v4737_v5  ;;  %v4742_v51 = vsel %vm9504_vm13, %v1333_v29, %v4344_v2  ;;  %vm4748_vm7 = vmor %vm710_vm11, %vm4679_vm8  ;;  %vm9509_vm13 = vcmp.gt.f32.partialorder %v4444_v36, %v4485_v33  ;;  %v9510_v2 = vmov 0  ;;  %v9512_v29 = vmov 0  ;;  %v9578_v5 = vld [vmem:[#allocation89_spill] sm:$0xff] }
 0x215   : > { %9505 = vst [vmem:[#allocation51_spill] sm:$0xff] %v4742_v51  ;;  %vm4763_vm1 = vmor %vm9509_vm13, %vm4518_vm3  ;;  %vm9514_vm11 = vcmp.lt.s32.totalorder %v3228_v31, 3  ;;  %vm393_vm3 = vcmp.gt.f32.partialorder %v4476_v14, %v4536_v21  ;;  %v9515_v36 = vmov 0  ;;  %v9539_v14 = vld [vmem:[#allocation78_spill] sm:$0xff]  ;;  %v4901_v51 = vpop.permute.xlu2 %1635 }
 0x216   : > { %v9511_v2 = vsel %vm4763_vm1, 4294967295, %v9510_v2  ;;  %vm4769_vm8 = vmand %vm9478_vm6, %vm739_vm15  ;;  %v4777_v13 = vsel %vm9514_vm11, %v9500_v40, %v3631_v18  ;;  %vm9517_vm15 = vnez %v9448_v9  ;;  %vm9520_vm11 = vnez %v9450_v24  ;;  %9552 = vst [vmem:[#allocation49_spill] sm:$0xff] %v4901_v51  ;;  %v4924_v51 = vpop.permute.xlu0 %1336 }
 0x217   : > { %v9513_v29 = vsel %vm4769_vm8, 4294967295, %v9512_v29  ;;  %vm4785_vm13 = vmor %vm381_vm12, %vm4542_vm14  ;;  %v9521_v18 = vmov 0  ;;  %vm9524_vm1 = vcmp.lt.s32.totalorder %v3228_v31, 3  ;;  %vm9525_vm14 = vnez %v9272_v1  ;;  %9561 = vst [vmem:[#allocation63_spill] sm:$0xff] %v4924_v51  ;;  %v9567_v51 = vld [vmem:[#allocation25_spill] sm:$0xff] }
 0x218   : > { %v9516_v36 = vsel %vm4785_vm13, 4294967295, %v9515_v36  ;;  %vm4791_vm6 = vmor %vm386_vm10, %vm9517_vm15  ;;  %v4805_v54 = vsel %vm9524_vm1, %v3655_v42, %v9523_v39  ;;  %vm9526_vm10 = vnez %v9458_v38  ;;  %v9527_v24 = vmov 0 }
 0x219   : > { %v9519_v43 = vsel %vm4791_vm6, 4294967295, %v9518_v43  ;;  %vm4797_vm8 = vmor %vm387_vm5, %vm9520_vm11  ;;  %vm9529_vm5 = vnez %v9460_v12  ;;  %v9530_v9 = vmov 0  ;;  %vm740_vm1 = vcmp.eq.f32.partialorder %v4707_v11, %v4536_v21  ;;  %1982 = vrot.lane.b32.xlu1 %v4490_v44, %s2936_s6 }
 0x21a   : > { %v9522_v18 = vsel %vm4797_vm8, 4294967295, %v9521_v18  ;;  %vm4813_vm15 = vmor %vm392_vm0, %vm9526_vm10  ;;  %vm1072_vm8 = vcmp.eq.f32.partialorder %v4732_v63, %v4485_v33  ;;  %vm9532_vm12 = vnez %v9294_v35  ;;  %vm9533_vm10 = vnez %v9251_v10 }
 0x21b   : > { %v9528_v24 = vsel %vm4813_vm15, 4294967295, %v9527_v24  ;;  %vm4819_vm11 = vmor %vm393_vm3, %vm9529_vm5  ;;  %v9534_v12 = vmov 0  ;;  %vm1073_vm3 = vcmp.eq.f32.partialorder %v4777_v13, %v4498_v48  ;;  %vm9536_vm5 = vnez %v9314_v58 }
 0x21c   : > { %v9531_v9 = vsel %vm4819_vm11, 4294967295, %v9530_v9  ;;  %vm4833_vm15 = vmand %vm9533_vm10, %vm740_vm1  ;;  %v9537_v38 = vmov 0  ;;  %vm693_vm6 = vcmp.gt.f32.partialorder %v4562_v17, %v4485_v33  ;;  %vm1088_vm0 = vcmp.eq.f32.partialorder %v9539_v14, %v4490_v44 }
 0x21d   : > { %v9535_v12 = vsel %vm4833_vm15, 4294967295, %v9534_v12  ;;  %vm4841_vm11 = vmand %vm9536_vm5, %vm1072_vm8  ;;  %vm1078_vm1 = vcmp.eq.f32.partialorder %v4805_v54, %v4503_v20  ;;  %vm9540_vm10 = vnez %v9317_v61  ;;  %vm9544_vm13 = vnez %v9480_v3 }
 0x21e   : > { %v9538_v38 = vsel %vm4841_vm11, 4294967295, %v9537_v38  ;;  %vm4853_vm15 = vmand %vm9540_vm10, %vm1073_vm3  ;;  %v9545_v17 = vmov 0  ;;  %v9548_v40 = vmov 0  ;;  %vm1054_vm11 = vcmp.gt.f32.partialorder %v9539_v14, %v4490_v44 }
 0x21f   : > { %v9542_v23 = vsel %vm4853_vm15, 4294967295, %v9541_v23  ;;  %vm4870_vm3 = vmor %vm693_vm6, %vm9544_vm13  ;;  %vm1089_vm15 = vcmp.eq.f32.partialorder %v9547_v16, %v4513_v30  ;;  %vm9551_vm8 = vcmp.lt.s32.totalorder %v3228_v31, 3  ;;  %vm9553_vm13 = vnez %v9488_v37  ;;  %v9593_v37 = vld [vmem:[#allocation37_spill] sm:$0xff] }
 0x220   : > { %v9546_v17 = vsel %vm4870_vm3, 4294967295, %v9545_v17  ;;  %vm4878_vm9 = vmand %vm9536_vm5, %vm1078_vm1  ;;  %v4899_v3 = vsel %vm9551_vm8, %v9523_v39, %v3655_v42  ;;  %v9555_v14 = vmov 0  ;;  %vm9557_vm1 = vcmp.lt.s32.totalorder %v3228_v31, 125 }
 0x221   : > { %v9549_v40 = vsel %vm4878_vm9, 4294967295, %v9548_v40  ;;  %vm1126_vm6 = vmand %vm9536_vm5, %vm1088_vm0  ;;  %vm9554_vm9 = vcmp.gt.f32.partialorder %v4606_v19, %v4498_v48  ;;  %v4917_v42 = vsel %vm9557_vm1, %v4392_v46, %v1339_v28 }
 0x222   : > { %vm1127_vm0 = vmand %vm9540_vm10, %vm1089_vm15  ;;  %9558 = vst [vmem:[#allocation52_spill] sm:$0xff] %v4917_v42  ;;  %v9577_v42 = vld [vmem:[#allocation69_spill] sm:$0xff] }
 0x223   : > { %vm4910_vm3 = vmor %vm9554_vm9, %vm9553_vm13 }
 0x224   : > { %v9556_v14 = vsel %vm4910_vm3, 4294967295, %v9555_v14  ;;  %vm9559_vm8 = vmmov %vm9557_vm1  ;;  %vm9570_vm1 = vcmp.gt.f32.partialorder %v4630_v6, %v4503_v20  ;;  %v5062_v6 = vld [vmem:[%s3072_s0 + $0x90] sm:$0xff] }
 0x225   : > { %v4922_v39 = vsel %vm9559_vm8, %v1339_v28, %v4392_v46  ;;  %vm4926_vm15 = vmor %vm1054_vm11, %vm1126_vm6  ;;  %v9566_v28 = vld [vmem:[#allocation27_spill] sm:$0xff]  ;;  %vm9568_vm11 = vcmp.lt.s32.totalorder %v3228_v31, 1  ;;  %vm9569_vm6 = vnez %v9493_v7  ;;  %vm9573_vm8 = vnez %v9495_v32  ;;  %1984 = vrot.lane.b32.xlu2 %v5062_v6, %s2936_s6 }
 0x226   : > { %9560 = vst [vmem:[#allocation56_spill] sm:$0xff] %v4922_v39  ;;  %vm9564_vm9 = vmand %vm9525_vm14, %vm4722_vm4  ;;  %v4946_v39 = vsel %vm9568_vm11, %v9567_v51, %v9566_v28  ;;  %vm9580_vm11 = vcmp.gt.f32.partialorder %v9547_v16, %v4513_v30  ;;  %v9608_v30 = vld [vmem:[#allocation30_spill] sm:$0xff] }
 0x227   : > { %v883_v19 = vsel %vm9564_vm9, 1, %v9243_v41  ;;  %vm9565_vm13 = vmand %vm9532_vm12, %vm4748_vm7  ;;  %vm9574_vm7 = vcmp.gt.f32.partialorder %v4624_v53, %v4508_v50  ;;  %vm9596_vm12 = vnez %v9513_v29  ;;  %v9664_v29 = vld [vmem:[#allocation18_spill] sm:$0xff] }
 0x228   : > { %v884_v46 = vsel %vm9565_vm13, 1, %v9243_v41  ;;  %vm4953_vm4 = vmor %vm9570_vm1, %vm9569_vm6  ;;  %vm9579_vm13 = vcmp.lt.s32.totalorder %v3228_v31, 3  ;;  %vm9583_vm1 = vcmp.lt.s32.totalorder %v3228_v31, 1 }
 0x229   : > { %v9572_v0 = vsel %vm4953_vm4, 4294967295, %v9571_v0  ;;  %vm4962_vm9 = vmor %vm9574_vm7, %vm9573_vm8  ;;  %v4970_v7 = vsel %vm9579_vm13, %v9578_v5, %v9577_v42  ;;  %v4983_v32 = vsel %vm9583_vm1, %v9566_v28, %v9567_v51  ;;  %vm9585_vm7 = vnez %v9342_v62 }
 0x22a   : > { %v9576_v26 = vsel %vm4962_vm9, 4294967295, %v9575_v26  ;;  %vm4975_vm6 = vmor %vm9580_vm11, %vm1127_vm0  ;;  %vm9588_vm1 = vnez %v9284_v57  ;;  %vm9589_vm9 = vnez %v9477_v8 }
 0x22b   : > { %vm9584_vm8 = vmmov %vm9579_vm13  ;;  %vm9586_vm13 = vnez %v9472_v49 }
 0x22c   : > { %v4989_v53 = vsel %vm9584_vm8, %v9577_v42, %v9578_v5  ;;  %vm1196_vm0 = vmand %vm9585_vm7, %vm4926_vm15  ;;  %vm705_vm8 = vcmp.gt.f32.partialorder %v4662_v47, %v4531_v56  ;;  %vm1079_vm15 = vcmp.eq.f32.partialorder %v4899_v3, %v4508_v50  ;;  %vm9591_vm7 = vnez %v9348_v60  ;;  %v9592_v42 = vld [vmem:[#allocation21_spill] sm:$0xff] }
 0x22d   : > { %vm9587_vm11 = vmand %vm9329_vm2, %vm9586_vm13  ;;  %v9597_v47 = vmov 0  ;;  %vm9656_vm2 = vnez %v9294_v35 }
 0x22e   : > { %v570_v16 = vsel %vm9587_vm11, 1, %v9243_v41  ;;  %vm9590_vm4 = vmand %vm9588_vm1, %vm9589_vm9  ;;  %vm9594_vm11 = vcmp.lt.s32.totalorder %v3228_v31, 1  ;;  %vm9631_vm1 = vnez %v9538_v38  ;;  %v9641_v38 = vmov 0 }
 0x22f   : > { %v571_v5 = vsel %vm9590_vm4, 1, %v9243_v41  ;;  %vm1197_vm13 = vmand %vm9591_vm7, %vm4975_vm6  ;;  %v915_v49 = vadd.s32 %v883_v19, %v570_v16  ;;  %v5019_v8 = vsel %vm9594_vm11, %v9593_v37, %v9592_v42  ;;  %vm1084_vm6 = vcmp.eq.f32.partialorder %v4970_v7, %v4531_v56 }
 0x230   : > { %v916_v51 = vadd.s32 %v884_v46, %v571_v5  ;;  %vm5027_vm3 = vmor %vm705_vm8, %vm9596_vm12  ;;  %v1228_v46 = vsel %vm1196_vm0, 1, %v9243_v41  ;;  %v1229_v28 = vsel %vm1197_vm13, 1, %v9243_v41  ;;  %vm1085_vm0 = vcmp.eq.f32.partialorder %v4989_v53, %v4536_v21 }
 0x231   : > { %v9598_v47 = vsel %vm5027_vm3, 4294967295, %v9597_v47  ;;  %vm5035_vm7 = vmand %vm9540_vm10, %vm1079_vm15  ;;  %v5068_v16 = vadd.s32 %v1228_v46, %v915_v49  ;;  %vm9610_vm15 = vcmp.lt.s32.totalorder %v3228_v31, 1  ;;  %vm1038_vm11 = vcmp.gt.f32.partialorder %v4732_v63, %v4485_v33  ;;  %v5103_v49 = vld [vmem:[%s3072_s0 + $0x70] sm:$0xff]  ;;  %v9621_v63 = vld [vmem:[#allocation26_spill] sm:$0xff] }
 0x232   : > { %vm5057_vm13 = vmand %vm9536_vm5, %vm1084_vm6  ;;  %v5070_v5 = vadd.s32 %v1229_v28, %v916_v51  ;;  %v5076_v60 = vsel %vm9610_vm15, %v9609_v4, %v9608_v30  ;;  %9617 = vst [vmem:[#allocation27_spill] sm:$0xff] %v5103_v49  ;;  %1980 = vrot.lane.b32.xlu0 %v5103_v49, %s2936_s6  ;;  %vm9618_vm8 = vcmp.lt.s32.totalorder %v3228_v31, 1  ;;  %v9620_v51 = vld [vmem:[#allocation32_spill] sm:$0xff]  ;;  %v9625_v46 = vld [vmem:[#allocation59_spill] sm:$0xff]  ;;  %vm9627_vm3 = vnez %v9535_v12 }
 0x233   : > { %9606 = vst [vmem:[#allocation66_spill] sm:$0xff] %v5068_v16  ;;  %vm9612_vm6 = vmmov %vm9610_vm15  ;;  %vm706_vm15 = vcmp.gt.f32.partialorder %v4707_v11, %v4536_v21  ;;  %v5111_v11 = vsel %vm9618_vm8, %v9608_v30, %v9609_v4  ;;  %v9632_v30 = vmov 0  ;;  %v5139_v4 = vpop.permute.xlu2 %1641  ;;  %v5141_v16 = vpop.permute.xlu1 %1621  ;;  %v9661_v19 = vmov 0  ;;  %v9679_v49 = vld [vmem:[#allocation40_spill] sm:$0xff] }
 0x234   : > { %9607 = vst [vmem:[#allocation78_spill] sm:$0xff] %v5070_v5  ;;  %v5082_v62 = vsel %vm9612_vm6, %v9592_v42, %v9593_v37  ;;  %vm5098_vm6 = vmand %vm9540_vm10, %vm1085_vm0  ;;  %v9624_v37 = vld [vmem:[#allocation50_spill] sm:$0xff]  ;;  %vm9626_vm0 = vcmp.lt.s32.totalorder %v3228_v31, 2  ;;  %v9628_v5 = vmov 0 }
 0x235   : > { %9611 = vst [vmem:[#allocation77_spill] sm:$0xff] %v5076_v60  ;;  %vm9622_vm12 = vmmov %vm9618_vm8  ;;  %v5123_v28 = vsel %vm9626_vm0, %v9625_v46, %v9624_v37  ;;  %vm1039_vm8 = vcmp.gt.f32.partialorder %v4777_v13, %v4498_v48  ;;  %v9670_v60 = vmov 0 }
 0x236   : > { %9619 = vst [vmem:[#allocation25_spill] sm:$0xff] %v5111_v11  ;;  %v5117_v42 = vsel %vm9622_vm12, %v9621_v63, %v9620_v51  ;;  %vm5127_vm9 = vmor %vm706_vm15, %vm9627_vm3  ;;  %vm9640_vm15 = vnez %v9542_v23 }
 0x237   : > { %9623 = vst [vmem:[#allocation69_spill] sm:$0xff] %v5117_v42  ;;  %v9629_v5 = vsel %vm5127_vm9, 4294967295, %v9628_v5  ;;  %vm5135_vm4 = vmor %vm1038_vm11, %vm9631_vm1  ;;  %vm1044_vm11 = vcmp.gt.f32.partialorder %v4805_v54, %v4503_v20  ;;  %vm1045_vm9 = vcmp.gt.f32.partialorder %v4899_v3, %v4508_v50  ;;  %v9647_v54 = vmov 0 }
 0x238   : > { %9630 = vst [vmem:[#allocation89_spill] sm:$0xff] %v9629_v5  ;;  %v9633_v30 = vsel %vm5135_vm4, 4294967295, %v9632_v30  ;;  %vm9637_vm3 = vmmov %vm9622_vm12  ;;  %vm9646_vm4 = vnez %v9549_v40  ;;  %v9652_v40 = vmov 0  ;;  %v9754_v5 = vmov 0 }
 0x239   : > { %9634 = vst [vmem:[#allocation21_spill] sm:$0xff] %v9633_v30  ;;  %v5147_v12 = vsel %vm9637_vm3, %v9620_v51, %v9621_v63  ;;  %vm9639_vm1 = vmmov %vm9626_vm0  ;;  %v1376_v51 = vpop.permute.xlu0 %1375  ;;  %v5166_v63 = vld [vmem:[%s3072_s0 + $0x28] sm:$0xff]  ;;  %v9757_v30 = vld [vmem:[#allocation64_spill] sm:$0xff] }
 0x23a   : > { %9635 = vst [vmem:[#allocation37_spill] sm:$0xff] %v5139_v4  ;;  %v5155_v13 = vsel %vm9639_vm1, %v9624_v37, %v9625_v46  ;;  %vm5161_vm0 = vmor %vm1039_vm8, %vm9640_vm15  ;;  %vm9650_vm15 = vcmp.lt.s32.totalorder %v3228_v31, 125  ;;  %vm731_vm1 = vcmp.eq.f32.partialorder %v5123_v28, %v4673_v15  ;;  %v5231_v46 = vld [vmem:[%s3072_s0 + $0x18] sm:$0xff]  ;;  %v9669_v4 = vld [vmem:[#allocation74_spill] sm:$0xff] }
 0x23b   : > { %9636 = vst [vmem:[#allocation30_spill] sm:$0xff] %v5141_v16  ;;  %v9642_v38 = vsel %vm5161_vm0, 4294967295, %v9641_v38  ;;  %vm5178_vm8 = vmor %vm1044_vm11, %vm9646_vm4  ;;  %v5185_v23 = vsel %vm9650_vm15, %v4426_v22, %v1376_v51  ;;  %vm1050_vm4 = vcmp.gt.f32.partialorder %v4970_v7, %v4531_v56  ;;  %v5281_v16 = vld [vmem:[%s3072_s0 + $0xc0] sm:$0xff] }
 0x23c   : > { %9638 = vst [vmem:[#allocation17_spill] sm:$0xff] %v5147_v12  ;;  %v9648_v54 = vsel %vm5178_vm8, 4294967295, %v9647_v54  ;;  %vm9651_vm3 = vmmov %vm9650_vm15  ;;  %vm1415_vm15 = vcmp.lt.s32.totalorder %v5185_v23, %v3228_v31  ;;  %v9674_v12 = vmov 0  ;;  %1990 = vrot.lane.b32.xlu2 %v5281_v16, %s2936_s6 }
 0x23d   : > { %9643 = vst [vmem:[#allocation32_spill] sm:$0xff] %v9642_v38  ;;  %v5190_v37 = vsel %vm9651_vm3, %v1376_v51, %v4426_v22  ;;  %vm5198_vm11 = vmor %vm1045_vm9, %vm5035_vm7  ;;  %vm1051_vm9 = vcmp.gt.f32.partialorder %v4989_v53, %v4536_v21  ;;  %v9657_v22 = vmov 0  ;;  %v1449_v3 = vsel %vm1415_vm15, 1, %v9243_v41  ;;  %v9663_v53 = vld [vmem:[#allocation39_spill] sm:$0xff] }
 0x23e   : > { %9644 = vst [vmem:[#allocation26_spill] sm:$0xff] %v5166_v63  ;;  %v9653_v40 = vsel %vm5198_vm11, 4294967295, %v9652_v40  ;;  %vm1416_vm12 = vcmp.lt.s32.totalorder %v5190_v37, %v3243_v34  ;;  %vm5218_vm11 = vmor %vm1050_vm4, %vm5057_vm13  ;;  %vm9660_vm3 = vnez %v9241_v52  ;;  %vm9665_vm4 = vcmp.lt.s32.totalorder %v3228_v31, 1  ;;  %v9680_v34 = vld [vmem:[#allocation60_spill] sm:$0xff] }
 0x23f   : > { %9649 = vst [vmem:[#allocation50_spill] sm:$0xff] %v9648_v54  ;;  %v9658_v22 = vsel %vm5218_vm11, 4294967295, %v9657_v22  ;;  %v1450_v7 = vsel %vm1416_vm12, 1, %v9243_v41  ;;  %vm5226_vm8 = vmand %vm9660_vm3, %vm731_vm1  ;;  %v5239_v51 = vsel %vm9665_vm4, %v9664_v29, %v9663_v53  ;;  %v1451_v11 = vperm.slane %v1449_v3, 0 }
 0x240   : > { %9654 = vst [vmem:[#allocation59_spill] sm:$0xff] %v9653_v40  ;;  %v9662_v19 = vsel %vm5226_vm8, 4294967295, %v9661_v19  ;;  %vm1076_vm8 = vcmp.eq.f32.partialorder %v9669_v4, %v4673_v15  ;;  %vm5253_vm13 = vmor %vm1051_vm9, %vm5098_vm6  ;;  %v1452_v42 = vperm.slane %v1450_v7, 0  ;;  %vm9672_vm4 = vcmp.eq.f32.partialorder %v5155_v13, %v5166_v63  ;;  %v9683_v7 = vld [vmem:[#allocation73_spill] sm:$0xff] }
 0x241   : > { %9659 = vst [vmem:[#allocation133_spill] sm:$0xff] %v9658_v22  ;;  %v9671_v60 = vsel %vm5253_vm13, 4294967295, %v9670_v60  ;;  %vm9673_vm1 = vnez %v9251_v10  ;;  %vm9677_vm7 = vcmp.lt.s32.totalorder %v3228_v31, 1  ;;  %vm9681_vm6 = vcmp.lt.s32.totalorder %v3228_v31, 2  ;;  %v5547_v40 = vld [vmem:[%s3072_s0 + $0x98] sm:$0xff]  ;;  %v5561_v22 = vld [vmem:[%s3072_s0 + $0xf0] sm:$0xff] }
 0x242   : > { %9666 = vst [vmem:[#allocation39_spill] sm:$0xff] %v5239_v51  ;;  %vm5262_vm12 = vmand %vm9673_vm1, %vm9672_vm4  ;;  %v5270_v44 = vsel %vm9677_vm7, %v9663_v53, %v9664_v29  ;;  %v5276_v3 = vsel %vm9681_vm6, %v9680_v34, %v9679_v49  ;;  %vm1077_vm9 = vcmp.eq.f32.partialorder %v9683_v7, %v5166_v63  ;;  %v9685_v53 = vmov 0  ;;  %v2718_v7 = vld [vmem:[%s3072_s0 + $0xa0] sm:$0xff]  ;;  %v9823_v51 = vld [vmem:[#allocation73_spill] sm:$0xff] }
 0x243   : > { %v9675_v12 = vsel %vm5262_vm12, 4294967295, %v9674_v12  ;;  %9678 = vst [vmem:[#allocation74_spill] sm:$0xff] %v5270_v44  ;;  %vm5289_vm7 = vmand %vm9536_vm5, %vm1076_vm8  ;;  %vm9688_vm4 = vcmp.eq.f32.partialorder %v5019_v8, %v4673_v15  ;;  %vm9689_vm6 = vnez %v9228_v59  ;;  %v9690_v29 = vmov 0  ;;  %1986 = vrot.lane.b32.xlu0 %v2718_v7, %s2936_s6  ;;  %v9713_v7 = vld [vmem:[#allocation124_spill] sm:$0xff]  ;;  %v9764_v44 = vld [vmem:[#allocation97_spill] sm:$0xff] }
 0x244   : > { %9676 = vst [vmem:[#allocation18_spill] sm:$0xff] %v9675_v12  ;;  %v2717_v12 = vld [vmem:[%s3072_s0 + $0xb0] sm:$0xff]  ;;  %v9686_v53 = vsel %vm5289_vm7, 4294967295, %v9685_v53  ;;  %vm5298_vm12 = vmand %vm9689_vm6, %vm9688_vm4  ;;  %vm1417_vm15 = vcmp.eq.f32.partialorder %v4385_v25, %v4485_v33  ;;  %vm5305_vm13 = vcmp.eq.s32.totalorder %v1451_v11, 1  ;;  %vm5309_vm8 = vcmp.eq.s32.totalorder %v1452_v42, 1  ;;  %1996 = vrot.lane.b32.xlu2 %v5561_v22, %s2936_s6 }
 0x245   : > { %9682 = vst [vmem:[#allocation40_spill] sm:$0xff] %v5276_v3  ;;  %1988 = vrot.lane.b32.xlu1 %v2717_v12, %s2936_s6  ;;  %v9691_v29 = vsel %vm5298_vm12, 4294967295, %v9690_v29  ;;  %v1379_v12 = vshra.s32 %v5185_v23, 2  ;;  %vm5317_vm4 = vmand %vm9540_vm10, %vm1077_vm9  ;;  %vm9701_vm12 = vcmp.eq.f32.partialorder %v5082_v62, %v5166_v63  ;;  %vm9702_vm7 = vnez %v9232_v45 }
 0x246   : > { %9684 = vst [vmem:[#allocation60_spill] sm:$0xff] %v5281_v16  ;;  %v9693_v16 = vmov 0  ;;  %vm5326_vm5 = vmand %vm9702_vm7, %vm9701_vm12  ;;  %v9703_v11 = vmov 0  ;;  %vm9706_vm11 = vnez %v9278_v55  ;;  %vm9707_vm9 = vnez %v9511_v2  ;;  %v9748_v55 = vld [vmem:[#allocation130_spill] sm:$0xff] }
 0x247   : > { %9687 = vst [vmem:[#allocation134_spill] sm:$0xff] %v9686_v53  ;;  %v9694_v16 = vsel %vm5305_vm13, 4294967295, %v9693_v16  ;;  %v9696_v53 = vmov 0  ;;  %v9704_v11 = vsel %vm5326_vm5, 4294967295, %v9703_v11  ;;  %vm9708_vm10 = vmand %vm9706_vm11, %vm9707_vm9  ;;  %vm1418_vm0 = vcmp.eq.f32.partialorder %v9713_v7, %v4498_v48 }
 0x248   : > { %9692 = vst [vmem:[#allocation135_spill] sm:$0xff] %v9691_v29  ;;  %v9697_v53 = vsel %vm5309_vm8, 4294967295, %v9696_v53  ;;  %v9699_v29 = vmov 0  ;;  %v5338_v42 = vsel %vm9708_vm10, 1, %v9243_v41  ;;  %vm5355_vm10 = vmand %vm5305_vm13, %vm1417_vm15  ;;  %v9714_v2 = vmov 0 }
 0x249   : > { %9695 = vst [vmem:[#allocation136_spill] sm:$0xff] %v9694_v16  ;;  %v9700_v29 = vsel %vm5317_vm4, 4294967295, %v9699_v29  ;;  %vm9710_vm4 = vcmp.lt.s32.totalorder %v3228_v31, 2  ;;  %v9715_v2 = vsel %vm5355_vm10, 4294967295, %v9714_v2  ;;  %vm9718_vm9 = vnez %v9284_v57  ;;  %v9744_v57 = vld [vmem:[#allocation128_spill] sm:$0xff] }
 0x24a   : > { %9698 = vst [vmem:[#allocation137_spill] sm:$0xff] %v9697_v53  ;;  %v5344_v23 = vsel %vm9710_vm4, %v9679_v49, %v9680_v34  ;;  %v5361_v34 = vpop.permute.xlu1 %1627  ;;  %vm9719_vm5 = vnez %v9516_v36  ;;  %vm9722_vm15 = vnez %v9519_v43  ;;  %vm9725_vm4 = vnez %v9522_v18  ;;  %v9728_v36 = vld [vmem:[#allocation127_spill] sm:$0xff]  ;;  %v5397_v43 = vpop.permute.xlu0 %1625 }
 0x24b   : > { %9705 = vst [vmem:[#allocation138_spill] sm:$0xff] %v9704_v11  ;;  %v1380_v11 = vshra.s32 %v5190_v37, 2  ;;  %vm9720_vm12 = vmand %vm9718_vm9, %vm9719_vm5  ;;  %vm1423_vm5 = vcmp.eq.f32.partialorder %v9728_v36, %v4503_v20  ;;  %vm1424_vm1 = vcmp.eq.f32.partialorder %v9744_v57, %v4508_v50  ;;  %v9752_v38 = vmov 0 }
 0x24c   : > { %9709 = vst [vmem:[#allocation139_spill] sm:$0xff] %v5338_v42  ;;  %v5359_v42 = vpop.permute.xlu2 %1647  ;;  %v5371_v49 = vsel %vm9720_vm12, 1, %v9243_v41  ;;  %vm9723_vm10 = vmand %vm9706_vm11, %vm9722_vm15  ;;  %v9771_v54 = vmov 0  ;;  %v9797_v16 = vmov 0  ;;  %v9825_v53 = vmov 0  ;;  %1998 = vrot.lane.b32.xlu2 %v4498_v48, %s2936_s6 }
 0x24d   : > { %9711 = vst [vmem:[#allocation140_spill] sm:$0xff] %v5344_v23  ;;  %v5379_v37 = vsel %vm9723_vm10, 1, %v9243_v41  ;;  %vm9726_vm7 = vmand %vm9718_vm9, %vm9725_vm4  ;;  %vm9732_vm10 = vnez %v9528_v24  ;;  %vm729_vm4 = vcmp.eq.f32.partialorder %v5276_v3, %v4697_v27  ;;  %v9742_v24 = vld [vmem:[#allocation114_spill] sm:$0xff]  ;;  %vm5482_vm14 = vcmp.eq.s32.totalorder %v1380_v11, %v9764_v44  ;;  %v9791_v3 = vld [vmem:[#allocation36_spill] sm:$0xff] }
 0x24e   : > { %9716 = vst [vmem:[#allocation124_spill] sm:$0xff] %v5359_v42  ;;  %v5387_v42 = vsel %vm9726_vm7, 1, %v9243_v41  ;;  %vm5393_vm12 = vmand %vm5309_vm8, %vm1418_vm0  ;;  %vm9735_vm7 = vnez %v9531_v9  ;;  %v9745_v9 = vmov 0 }
 0x24f   : > { %9717 = vst [vmem:[#allocation141_spill] sm:$0xff] %v5361_v34  ;;  %v9729_v34 = vmov 0  ;;  %vm9733_vm15 = vmand %vm9706_vm11, %vm9732_vm10  ;;  %vm1429_vm10 = vcmp.eq.f32.partialorder %v9748_v55, %v4531_v56 }
 0x250   : > { %9721 = vst [vmem:[#allocation142_spill] sm:$0xff] %v5371_v49  ;;  %v9730_v34 = vsel %vm5393_vm12, 4294967295, %v9729_v34  ;;  %v5405_v18 = vsel %vm9733_vm15, 1, %v9243_v41  ;;  %vm9736_vm0 = vmand %vm9718_vm9, %vm9735_vm7  ;;  %vm9743_vm15 = vnez %v9742_v24  ;;  %vm9761_vm9 = vcmp.lt.s32.totalorder %v3228_v31, 2 }
 0x251   : > { %9724 = vst [vmem:[#allocation143_spill] sm:$0xff] %v5379_v37  ;;  %vm5429_vm7 = vmand %vm5305_vm13, %vm1423_vm5  ;;  %v5463_v37 = vld [vmem:[%s3072_s0 + $0x58] sm:$0xff]  ;;  %v9767_v49 = vmov 0 }
 0x252   : > { %9727 = vst [vmem:[#allocation144_spill] sm:$0xff] %v5387_v42  ;;  %v5413_v42 = vsel %vm9736_vm0, 1, %v9243_v41  ;;  %v9746_v9 = vsel %vm5429_vm7, 4294967295, %v9745_v9  ;;  %vm5450_vm5 = vmand %vm5309_vm8, %vm1424_vm1 }
 0x253   : > { %9731 = vst [vmem:[#allocation127_spill] sm:$0xff] %v5397_v43  ;;  %v9739_v43 = vld [vmem:[#allocation113_spill] sm:$0xff]  ;;  %v9753_v38 = vsel %vm5450_vm5, 4294967295, %v9752_v38  ;;  %vm5456_vm0 = vmand %vm9660_vm3, %vm729_vm4  ;;  %vm9770_vm3 = vnez %v9251_v10  ;;  %vm9776_vm5 = vnez %v9546_v17  ;;  %v9785_v17 = vmov 0 }
 0x254   : > { %9734 = vst [vmem:[#allocation145_spill] sm:$0xff] %v5405_v18  ;;  %vm9740_vm6 = vnez %v9739_v43  ;;  %v9755_v5 = vsel %vm5456_vm0, 4294967295, %v9754_v5  ;;  %vm5488_vm1 = vmand %vm5305_vm13, %vm1429_vm10  ;;  %vm9774_vm10 = vcmp.lt.s32.totalorder %v3228_v31, 2  ;;  %v9780_v10 = vld [vmem:[#allocation41_spill] sm:$0xff]  ;;  %vm9796_vm0 = vnez %v9232_v45  ;;  %v9941_v45 = vld [vmem:[#allocation140_spill] sm:$0xff]  ;;  %2004 = vrot.lane.b32.xlu2 %v4508_v50, %s2936_s6 }
 0x255   : > { %9737 = vst [vmem:[#allocation146_spill] sm:$0xff] %v5413_v42  ;;  %v9749_v42 = vld [vmem:[#allocation96_spill] sm:$0xff]  ;;  %v9768_v49 = vsel %vm5488_vm1, 4294967295, %v9767_v49  ;;  %vm9775_vm1 = vnez %v9272_v1  ;;  %v9802_v18 = vmov 0 }
 0x256   : > { %vm5444_vm12 = vcmp.eq.s32.totalorder %v1379_v12, %v9749_v42  ;;  %9756 = vst [vmem:[#allocation128_spill] sm:$0xff] %v9755_v5  ;;  %v9759_v12 = vld [vmem:[#allocation61_spill] sm:$0xff]  ;;  %v9763_v5 = vld [vmem:[#allocation131_spill] sm:$0xff]  ;;  %vm9777_vm7 = vmand %vm9775_vm1, %vm9776_vm5  ;;  %vm9784_vm5 = vnez %v9228_v59  ;;  %vm1436_vm1 = vcmp.eq.f32.partialorder %v9791_v3, %v5547_v40 }
 0x257   : > { %9758 = vst [vmem:[#allocation130_spill] sm:$0xff] %v5463_v37  ;;  %v9760_v42 = vld [vmem:[#allocation53_spill] sm:$0xff]  ;;  %vm1430_vm11 = vcmp.eq.f32.partialorder %v9763_v5, %v4536_v21  ;;  %v867_v44 = vsel %vm9777_vm7, 1, %v9243_v41  ;;  %vm9783_vm7 = vcmp.eq.f32.partialorder %v4983_v32, %v4697_v27  ;;  %v2722_v59 = vld [vmem:[%s3072_s0 + $0xe0] sm:$0xff] }
 0x258   : > { %v5473_v52 = vsel %vm9761_vm9, %v9760_v42, %v9759_v12  ;;  %vm9769_vm9 = vcmp.eq.f32.partialorder %v5344_v23, %v5231_v46  ;;  %v5507_v11 = vsel %vm9774_vm10, %v9759_v12, %v9760_v42  ;;  %vm1435_vm10 = vcmp.eq.f32.partialorder %v9780_v10, %v5062_v6  ;;  %v9788_v12 = vld [vmem:[#allocation81_spill] sm:$0xff]  ;;  %9790 = vst [vmem:[#allocation131_spill] sm:$0xff] %v5547_v40 }
 0x259   : > { %vm5497_vm4 = vmand %vm9770_vm3, %vm9769_vm9  ;;  %v9781_v42 = vmov 0  ;;  %v1519_v23 = vsel %vm5444_vm12, 1, %v9243_v41  ;;  %1994 = vrot.lane.b32.xlu1 %v2722_v59, %s2936_s6 }
 0x25a   : > { %v9772_v54 = vsel %vm5497_vm4, 4294967295, %v9771_v54  ;;  %vm5525_vm3 = vmand %vm5309_vm8, %vm1430_vm11 }
 0x25b   : > { %9773 = vst [vmem:[#allocation61_spill] sm:$0xff] %v9772_v54  ;;  %v9778_v54 = vld [vmem:[#allocation82_spill] sm:$0xff]  ;;  %v9782_v42 = vsel %vm5525_vm3, 4294967295, %v9781_v42  ;;  %vm5534_vm9 = vmand %vm9784_vm5, %vm9783_vm7  ;;  %vm9809_vm3 = vnez %v9314_v58 }
 0x25c   : > { %v9786_v17 = vsel %vm5534_vm9, 4294967295, %v9785_v17  ;;  %vm5553_vm7 = vmand %vm5305_vm13, %vm1435_vm10  ;;  %9794 = vst [vmem:[#allocation82_spill] sm:$0xff] %v5561_v22  ;;  %vm9795_vm10 = vcmp.eq.f32.partialorder %v4946_v39, %v5231_v46  ;;  %vm9799_vm13 = vnez %v9556_v14  ;;  %v1520_v14 = vsel %vm5482_vm14, 1, %v9243_v41  ;;  %v2723_v22 = vld [vmem:[%s3072_s0 + $0xd0] sm:$0xff] }
 0x25d   : > { %9787 = vst [vmem:[#allocation53_spill] sm:$0xff] %v9786_v17  ;;  %v9792_v17 = vmov 0  ;;  %vm5573_vm4 = vmand %vm9796_vm0, %vm9795_vm10  ;;  %1992 = vrot.lane.b32.xlu0 %v2723_v22, %s2936_s6  ;;  %vm9813_vm14 = vcmp.eq.f32.partialorder %v9788_v12, %v5231_v46  ;;  %vm9814_vm9 = vnez %v9317_v61 }
 0x25e   : > { %v9793_v17 = vsel %vm5553_vm7, 4294967295, %v9792_v17  ;;  %v9798_v16 = vsel %vm5573_vm4, 4294967295, %v9797_v16  ;;  %vm9800_vm11 = vmand %vm9656_vm2, %vm9799_vm13  ;;  %vm1383_vm4 = vcmp.gt.f32.partialorder %v4385_v25, %v4485_v33  ;;  %vm9804_vm13 = vnez %v9662_v19 }
 0x25f   : > { %v868_v59 = vsel %vm9800_vm11, 1, %v9243_v41  ;;  %vm5595_vm12 = vmand %vm5309_vm8, %vm1436_vm1  ;;  %vm9805_vm11 = vcmp.gt.f32.partialorder %v5123_v28, %v4673_v15  ;;  %v9806_v25 = vmov 0  ;;  %vm9808_vm1 = vcmp.eq.f32.partialorder %v9778_v54, %v4697_v27 }
 0x260   : > { %v9803_v18 = vsel %vm5595_vm12, 4294967295, %v9802_v18  ;;  %vm5609_vm10 = vmor %vm9805_vm11, %vm9804_vm13  ;;  %v9810_v33 = vmov 0  ;;  %v9815_v28 = vmov 0  ;;  %vm9818_vm11 = vnez %v9272_v1 }
 0x261   : > { %v9807_v25 = vsel %vm5609_vm10, 4294967295, %v9806_v25  ;;  %vm5618_vm8 = vmand %vm9809_vm3, %vm9808_vm1  ;;  %vm9819_vm1 = vnez %v9572_v0  ;;  %vm1384_vm13 = vcmp.gt.f32.partialorder %v9713_v7, %v4498_v48  ;;  %v1654_v0 = vpop.permute.xlu2 %1653  ;;  %v9835_v7 = vmov 0  ;;  %v9926_v48 = vld [vmem:[#allocation102_spill] sm:$0xff] }
 0x262   : > { %v9811_v33 = vsel %vm5618_vm8, 4294967295, %v9810_v33  ;;  %vm5627_vm12 = vmand %vm9814_vm9, %vm9813_vm14  ;;  %vm9821_vm8 = vnez %v9576_v26  ;;  %v9831_v26 = vmov 0  ;;  %vm9838_vm14 = vcmp.lt.s32.totalorder %v3228_v31, 126 }
 0x263   : > { %9812 = vst [vmem:[#allocation41_spill] sm:$0xff] %v9811_v33  ;;  %v9816_v28 = vsel %vm5627_vm12, 4294967295, %v9815_v28  ;;  %vm9820_vm10 = vmand %vm9818_vm11, %vm9819_vm1  ;;  %vm9824_vm12 = vnez %v9715_v2  ;;  %v9828_v33 = vld [vmem:[#allocation18_spill] sm:$0xff]  ;;  %vm1389_vm1 = vcmp.gt.f32.partialorder %v9728_v36, %v4503_v20  ;;  %v1521_v2 = vperm.slane %v1519_v23, 0  ;;  %v9848_v23 = vld [vmem:[#allocation135_spill] sm:$0xff] }
 0x264   : > { %9817 = vst [vmem:[#allocation81_spill] sm:$0xff] %v9816_v28  ;;  %v873_v22 = vsel %vm9820_vm10, 1, %v9243_v41  ;;  %vm9822_vm3 = vmand %vm9656_vm2, %vm9821_vm8  ;;  %v5655_v28 = vpop.permute.xlu1 %1633  ;;  %vm9829_vm10 = vnez %v9828_v33  ;;  %v9843_v20 = vld [vmem:[#allocation134_spill] sm:$0xff]  ;;  %v9851_v36 = vmov 0 }
 0x265   : > { %v874_v19 = vsel %vm9822_vm3, 1, %v9243_v41  ;;  %vm5651_vm9 = vmor %vm1383_vm4, %vm9824_vm12  ;;  %9827 = vst [vmem:[#allocation36_spill] sm:$0xff] %v5655_v28  ;;  %vm9830_vm3 = vcmp.gt.f32.partialorder %v5155_v13, %v5166_v63  ;;  %vm9834_vm4 = vnez %v9730_v34  ;;  %v9837_v28 = vld [vmem:[#allocation30_spill] sm:$0xff]  ;;  %v9846_v34 = vmov 0  ;;  %2063 = vrot.lane.b32.xlu0 %v3228_v31, %s2936_s6 }
 0x266   : > { %v9826_v53 = vsel %vm5651_vm9, 4294967295, %v9825_v53  ;;  %vm5662_vm8 = vmor %vm9830_vm3, %vm9829_vm10  ;;  %v5677_v33 = vsel %vm9838_vm14, %v9837_v28, %v1654_v0  ;;  %vm9844_vm3 = vnez %v9843_v20  ;;  %v9870_v20 = vld [vmem:[#allocation139_spill] sm:$0xff] }
 0x267   : > { %v9832_v26 = vsel %vm5662_vm8, 4294967295, %v9831_v26  ;;  %vm5670_vm12 = vmor %vm1384_vm13, %vm9834_vm4  ;;  %9839 = vst [vmem:[#allocation18_spill] sm:$0xff] %v5677_v33  ;;  %vm9845_vm13 = vcmp.gt.f32.partialorder %v9669_v4, %v4673_v15  ;;  %vm9849_vm8 = vnez %v9848_v23  ;;  %v899_v23 = vadd.s32 %v867_v44, %v9870_v20  ;;  %v9875_v33 = vld [vmem:[#allocation143_spill] sm:$0xff] }
 0x268   : > { %9833 = vst [vmem:[#allocation73_spill] sm:$0xff] %v9832_v26  ;;  %v9836_v7 = vsel %vm5670_vm12, 4294967295, %v9835_v7  ;;  %vm9840_vm10 = vmmov %vm9838_vm14  ;;  %v5684_v26 = vpop.permute.xlu0 %1631  ;;  %vm9850_vm14 = vcmp.gt.f32.partialorder %v5019_v8, %v4673_v15  ;;  %v1522_v8 = vperm.slane %v1520_v14, 0  ;;  %v9866_v14 = vld [vmem:[#allocation65_spill] sm:$0xff]  ;;  %v9876_v15 = vld [vmem:[#allocation144_spill] sm:$0xff]  ;;  %v9889_v44 = vmov 0 }
 0x269   : > { %v5682_v13 = vsel %vm9840_vm10, %v1654_v0, %v9837_v28  ;;  %9842 = vst [vmem:[#allocation147_spill] sm:$0xff] %v5684_v26  ;;  %vm5691_vm4 = vmor %vm9845_vm13, %vm9844_vm3  ;;  %vm1390_vm3 = vcmp.gt.f32.partialorder %v9744_v57, %v4508_v50  ;;  %vm9853_vm13 = vnez %v9746_v9  ;;  %v9858_v28 = vmov 0  ;;  %v9860_v0 = vld [vmem:[#allocation138_spill] sm:$0xff]  ;;  %v9865_v9 = vld [vmem:[#allocation44_spill] sm:$0xff] }
 0x26a   : > { %9841 = vst [vmem:[#allocation30_spill] sm:$0xff] %v5682_v13  ;;  %v9847_v34 = vsel %vm5691_vm4, 4294967295, %v9846_v34  ;;  %vm5700_vm12 = vmor %vm9850_vm14, %vm9849_vm8  ;;  %vm9856_vm8 = vnez %v9700_v29  ;;  %vm9857_vm14 = vcmp.gt.f32.partialorder %v9823_v51, %v5166_v63  ;;  %vm9861_vm9 = vnez %v9860_v0  ;;  %v9874_v0 = vld [vmem:[#allocation142_spill] sm:$0xff] }
 0x26b   : > { %v9852_v36 = vsel %vm5700_vm12, 4294967295, %v9851_v36  ;;  %vm5712_vm4 = vmor %vm1389_vm1, %vm9853_vm13  ;;  %vm9862_vm10 = vcmp.gt.f32.partialorder %v5082_v62, %v5166_v63  ;;  %v9863_v57 = vmov 0  ;;  %vm9867_vm1 = vcmp.lt.s32.totalorder %v3228_v31, 2 }
 0x26c   : > { %vm5721_vm12 = vmor %vm9857_vm14, %vm9856_vm8  ;;  %v5738_v29 = vsel %vm9867_vm1, %v9866_v14, %v9865_v9  ;;  %vm9868_vm13 = vnez %v9598_v47  ;;  %v9872_v62 = vmov 0  ;;  %v900_v13 = vadd.s32 %v868_v59, %v9874_v0 }
 0x26d   : > { %v9859_v28 = vsel %vm5721_vm12, 4294967295, %v9858_v28  ;;  %vm5730_vm7 = vmor %vm9862_vm10, %vm9861_vm9  ;;  %vm1395_vm9 = vcmp.gt.f32.partialorder %v9748_v55, %v4531_v56  ;;  %vm9871_vm10 = vnez %v9753_v38  ;;  %v905_v26 = vadd.s32 %v873_v22, %v9875_v33  ;;  %v9880_v55 = vld [vmem:[#allocation21_spill] sm:$0xff]  ;;  %2000 = vrot.lane.b32.xlu0 %v5231_v46, %s2936_s6 }
 0x26e   : > { %v9864_v57 = vsel %vm5730_vm7, 4294967295, %v9863_v57  ;;  %vm9869_vm8 = vmand %vm9818_vm11, %vm9868_vm13  ;;  %v906_v63 = vadd.s32 %v874_v19, %v9876_v15  ;;  %vm1396_vm1 = vcmp.gt.f32.partialorder %v9763_v5, %v4536_v21  ;;  %vm9877_vm13 = vnez %v9768_v49  ;;  %v9883_v15 = vld [vmem:[#allocation32_spill] sm:$0xff]  ;;  %v9892_v49 = vld [vmem:[#allocation74_spill] sm:$0xff] }
 0x26f   : > { %v879_v51 = vsel %vm9869_vm8, 1, %v9243_v41  ;;  %vm5751_vm14 = vmor %vm1390_vm3, %vm9871_vm10  ;;  %v9878_v47 = vmov 0  ;;  %vm9881_vm3 = vnez %v9880_v55  ;;  %vm9884_vm7 = vnez %v9883_v15  ;;  %v9911_v55 = vld [vmem:[#allocation16_spill] sm:$0xff]  ;;  %v9939_v21 = vld [vmem:[#allocation61_spill] sm:$0xff] }
 0x270   : > { %v9873_v62 = vsel %vm5751_vm14, 4294967295, %v9872_v62  ;;  %vm5762_vm8 = vmor %vm1395_vm9, %vm9877_vm13  ;;  %vm1401_vm9 = vcmp.gt.f32.partialorder %v9780_v10, %v5062_v6  ;;  %vm9886_vm13 = vnez %v9782_v42  ;;  %v9887_v38 = vmov 0  ;;  %v9897_v10 = vld [vmem:[#allocation39_spill] sm:$0xff]  ;;  %v9901_v42 = vld [vmem:[#allocation89_spill] sm:$0xff]  ;;  %2065 = vrot.lane.b32.xlu1 %v9911_v55, %s2936_s6 }
 0x271   : > { %v9879_v47 = vsel %vm5762_vm8, 4294967295, %v9878_v47  ;;  %vm9882_vm10 = vmand %vm9740_vm6, %vm9881_vm3  ;;  %vm5786_vm14 = vcmp.eq.s32.totalorder %v1521_v2, 1  ;;  %vm9893_vm3 = vcmp.eq.f32.partialorder %v9892_v49, %v9757_v30  ;;  %v9895_v22 = vmov 0  ;;  %v9904_v2 = vld [vmem:[#allocation145_spill] sm:$0xff]  ;;  %v9914_v15 = vld [vmem:[#allocation40_spill] sm:$0xff] }
 0x272   : > { %v1212_v56 = vsel %vm9882_vm10, 1, %v9243_v41  ;;  %vm9885_vm12 = vmand %vm9743_vm15, %vm9884_vm7  ;;  %v9890_v44 = vsel %vm5786_vm14, 4294967295, %v9889_v44  ;;  %v9899_v6 = vmov 0  ;;  %vm9902_vm10 = vnez %v9901_v42 }
 0x273   : > { %v1213_v5 = vsel %vm9885_vm12, 1, %v9243_v41  ;;  %vm5782_vm8 = vmor %vm1396_vm1, %vm9886_vm13  ;;  %9891 = vst [vmem:[#allocation134_spill] sm:$0xff] %v9890_v44  ;;  %vm9898_vm12 = vcmp.eq.f32.partialorder %v9897_v10, %v5463_v37  ;;  %v911_v33 = vadd.s32 %v879_v51, %v9904_v2  ;;  %v9906_v20 = vmov 0  ;;  %v9912_v51 = vld [vmem:[#allocation128_spill] sm:$0xff] }
 0x274   : > { %v9888_v38 = vsel %vm5782_vm8, 4294967295, %v9887_v38  ;;  %vm5795_vm7 = vmand %vm9784_vm5, %vm9893_vm3  ;;  %vm1402_vm3 = vcmp.gt.f32.partialorder %v9791_v3, %v5547_v40  ;;  %vm9905_vm5 = vnez %v9793_v17  ;;  %v9908_v0 = vmov 0  ;;  %v9920_v17 = vld [vmem:[#allocation101_spill] sm:$0xff]  ;;  %v9931_v2 = vld [vmem:[#allocation76_spill] sm:$0xff] }
 0x275   : > { %v9896_v22 = vsel %vm5795_vm7, 4294967295, %v9895_v22  ;;  %vm5804_vm1 = vmand %vm9796_vm0, %vm9898_vm12  ;;  %vm5823_vm12 = vcmp.eq.s32.totalorder %v1522_v8, 1  ;;  %v9916_v3 = vmov 0  ;;  %v9922_v8 = vmov 0 }
 0x276   : > { %v9900_v6 = vsel %vm5804_vm1, 4294967295, %v9899_v6  ;;  %vm9903_vm13 = vmand %vm9656_vm2, %vm9902_vm10  ;;  %v9909_v0 = vsel %vm5823_vm12, 4294967295, %v9908_v0  ;;  %vm9913_vm10 = vnez %v9912_v51  ;;  %vm9927_vm8 = vnez %v9926_v48  ;;  %v9932_v51 = vld [vmem:[#allocation75_spill] sm:$0xff] }
 0x277   : > { %v880_v19 = vsel %vm9903_vm13, 1, %v9243_v41  ;;  %vm5819_vm7 = vmor %vm1401_vm9, %vm9905_vm5  ;;  %9910 = vst [vmem:[#allocation135_spill] sm:$0xff] %v9909_v0  ;;  %vm9915_vm13 = vcmp.gt.f32.partialorder %v9914_v15, %v4697_v27  ;;  %vm9919_vm5 = vcmp.eq.f32.partialorder %v5507_v11, %v9757_v30  ;;  %vm9921_vm9 = vnez %v9920_v17  ;;  %v9933_v15 = vld [vmem:[#allocation50_spill] sm:$0xff] }
 0x278   : > { %v9907_v20 = vsel %vm5819_vm7, 4294967295, %v9906_v20  ;;  %vm5836_vm0 = vmor %vm9915_vm13, %vm9913_vm10  ;;  %vm9925_vm7 = vcmp.eq.f32.partialorder %v5473_v52, %v5463_v37  ;;  %v9928_v42 = vmov 0  ;;  %v9937_v40 = vmov 0 }
 0x279   : > { %v9917_v3 = vsel %vm5836_vm0, 4294967295, %v9916_v3  ;;  %vm5845_vm1 = vmand %vm9921_vm9, %vm9919_vm5  ;;  %vm9940_vm5 = vnez %v9939_v21  ;;  %v9943_v59 = vmov 0  ;;  %v9955_v48 = vmov 0 }
 0x27a   : > { %9918 = vst [vmem:[#allocation138_spill] sm:$0xff] %v9917_v3  ;;  %v9923_v8 = vsel %vm5845_vm1, 4294967295, %v9922_v8  ;;  %vm5854_vm2 = vmand %vm9927_vm8, %vm9925_vm7  ;;  %vm9934_vm7 = vnez %v9933_v15  ;;  %vm9942_vm1 = vcmp.gt.f32.partialorder %v9941_v45, %v5231_v46  ;;  %v9946_v15 = vld [vmem:[#allocation27_spill] sm:$0xff]  ;;  %v1245_v3 = vadd.s32 %v1213_v5, %v900_v13  ;;  %v1660_v45 = vpop.permute.xlu2 %1659  ;;  %v9957_v13 = vld [vmem:[#allocation69_spill] sm:$0xff] }
 0x27b   : > { %9924 = vst [vmem:[#allocation44_spill] sm:$0xff] %v9923_v8  ;;  %v9929_v42 = vsel %vm5854_vm2, 4294967295, %v9928_v42  ;;  %vm9935_vm0 = vmand %vm9740_vm6, %vm9934_vm7  ;;  %vm9936_vm2 = vnez %v9803_v18  ;;  %v9948_v18 = vld [vmem:[#allocation59_spill] sm:$0xff]  ;;  %v1244_v8 = vadd.s32 %v1212_v56, %v899_v23  ;;  %vm9961_vm8 = vnez %v9836_v7  ;;  %v9962_v56 = vld [vmem:[#allocation141_spill] sm:$0xff] }
 0x27c   : > { %9930 = vst [vmem:[#allocation65_spill] sm:$0xff] %v9929_v42  ;;  %v1218_v55 = vsel %vm9935_vm0, 1, %v9243_v41  ;;  %vm5874_vm10 = vmor %vm1402_vm3, %vm9936_vm2  ;;  %vm9949_vm3 = vnez %v9948_v18  ;;  %v9952_v42 = vld [vmem:[#allocation53_spill] sm:$0xff]  ;;  %vm9954_vm2 = vcmp.gt.f32.partialorder %v4983_v32, %v4697_v27  ;;  %v9970_v7 = vmov 0 }
 0x27d   : > { %v9938_v40 = vsel %vm5874_vm10, 4294967295, %v9937_v40  ;;  %vm5885_vm13 = vmor %vm9942_vm1, %vm9940_vm5  ;;  %vm9951_vm1 = vnez %v9826_v53  ;;  %vm9953_vm0 = vnez %v9952_v42  ;;  %v5915_v18 = vld [vmem:[%s3072_s0 + $0x78] sm:$0xff]  ;;  %vm9977_vm9 = vnez %v9317_v61 }
 0x27e   : > { %v9944_v59 = vsel %vm5885_vm13, 4294967295, %v9943_v59  ;;  %vm9950_vm7 = vmand %vm9743_vm15, %vm9949_vm3  ;;  %v9958_v53 = vld [vmem:[#allocation133_spill] sm:$0xff]  ;;  %v9992_v4 = vmov 0  ;;  %v10021_v50 = vmov 0 }
 0x27f   : > { %9945 = vst [vmem:[#allocation139_spill] sm:$0xff] %v9944_v59  ;;  %v1219_v21 = vsel %vm9950_vm7, 1, %v9243_v41  ;;  %vm1525_vm5 = vmand %vm5786_vm14, %vm9951_vm1  ;;  %v5903_v59 = vpop.permute.xlu1 %1639  ;;  %vm9959_vm7 = vnez %v9958_v53  ;;  %v5940_v53 = vpop.permute.xlu0 %1637  ;;  %v10107_v61 = vld [vmem:[#allocation121_spill] sm:$0xff] }
 0x280   : > { %vm5910_vm13 = vmor %vm9954_vm2, %vm9953_vm0  ;;  %v1557_v32 = vsel %vm1525_vm5, 1, %v9243_v41  ;;  %vm9963_vm2 = vcmp.lt.s32.totalorder %v3228_v31, 126  ;;  %9967 = vst [vmem:[#allocation144_spill] sm:$0xff] %v5940_v53  ;;  %vm9972_vm5 = vcmp.eq.f32.partialorder %v9931_v2, %v9757_v30  ;;  %v9984_v53 = vld [vmem:[#allocation41_spill] sm:$0xff] }
 0x281   : > { %v9956_v48 = vsel %vm5910_vm13, 4294967295, %v9955_v48  ;;  %vm9960_vm1 = vmand %vm9740_vm6, %vm9959_vm7  ;;  %v5933_v5 = vsel %vm9963_vm2, %v9962_v56, %v1660_v45  ;;  %vm9968_vm7 = vnez %v9798_v16  ;;  %vm10018_vm6 = vnez %v9938_v40  ;;  %v6091_v40 = vld [vmem:[%s3072_s0 + $0xc8] sm:$0xff] }
 0x282   : > { %v1224_v23 = vsel %vm9960_vm1, 1, %v9243_v41  ;;  %vm1526_vm0 = vmand %vm5823_vm12, %vm9961_vm8  ;;  %9964 = vst [vmem:[#allocation142_spill] sm:$0xff] %v5933_v5  ;;  %vm9969_vm1 = vcmp.gt.f32.partialorder %v4946_v39, %v5231_v46  ;;  %v9974_v5 = vmov 0  ;;  %v9978_v39 = vmov 0 }
 0x283   : > { %vm9965_vm3 = vmmov %vm9963_vm2  ;;  %vm9973_vm2 = vnez %v9314_v58 }
 0x284   : > { %v5938_v42 = vsel %vm9965_vm3, %v1660_v45, %v9962_v56  ;;  %vm5947_vm8 = vmor %vm9969_vm1, %vm9968_vm7  ;;  %vm9976_vm3 = vcmp.eq.f32.partialorder %v9932_v51, %v5463_v37  ;;  %vm9980_vm7 = vnez %v9671_v60  ;;  %v1250_v45 = vadd.s32 %v1218_v55, %v905_v26  ;;  %v9989_v26 = vld [vmem:[#allocation81_spill] sm:$0xff]  ;;  %v9994_v55 = vld [vmem:[#allocation146_spill] sm:$0xff] }
 0x285   : > { %9966 = vst [vmem:[#allocation143_spill] sm:$0xff] %v5938_v42  ;;  %v9971_v7 = vsel %vm5947_vm8, 4294967295, %v9970_v7  ;;  %vm5956_vm13 = vmand %vm9973_vm2, %vm9972_vm5  ;;  %v1558_v56 = vsel %vm1526_vm0, 1, %v9243_v41  ;;  %v5980_v42 = vadd.s32 %v1557_v32, %v1244_v8  ;;  %vm9985_vm2 = vnez %v9984_v53 }
 0x286   : > { %v9975_v5 = vsel %vm5956_vm13, 4294967295, %v9974_v5  ;;  %vm5965_vm10 = vmand %vm9977_vm9, %vm9976_vm3  ;;  %v9987_v60 = vmov 0  ;;  %vm9991_vm0 = vcmp.gt.f32.partialorder %v9788_v12, %v5231_v46  ;;  %v912_v8 = vadd.s32 %v880_v19, %v9994_v55  ;;  %v10023_v55 = vld [vmem:[#allocation51_spill] sm:$0xff] }
 0x287   : > { %v9979_v39 = vsel %vm5965_vm10, 4294967295, %v9978_v39  ;;  %vm9981_vm1 = vmand %vm9743_vm15, %vm9980_vm7  ;;  %9982 = vst [vmem:[#allocation21_spill] sm:$0xff] %v5980_v42  ;;  %vm9986_vm7 = vcmp.gt.f32.partialorder %v9778_v54, %v4697_v27  ;;  %v1251_v32 = vadd.s32 %v1219_v21, %v906_v63  ;;  %vm9995_vm9 = vnez %v9873_v62  ;;  %v10079_v42 = vld [vmem:[#allocation100_spill] sm:$0xff] }
 0x288   : > { %v1225_v16 = vsel %vm9981_vm1, 1, %v9243_v41  ;;  %vm1531_vm5 = vmand %vm5786_vm14, %vm5712_vm4  ;;  %vm9990_vm4 = vnez %v9989_v26  ;;  %v6010_v53 = vadd.s32 %v1558_v56, %v1245_v3  ;;  %v9997_v26 = vld [vmem:[#allocation73_spill] sm:$0xff]  ;;  %v1256_v63 = vadd.s32 %v1224_v23, %v911_v33  ;;  %v10011_v33 = vld [vmem:[#allocation106_spill] sm:$0xff] }
 0x289   : > { %vm5991_vm1 = vmor %vm9986_vm7, %vm9985_vm2  ;;  %v1563_v54 = vsel %vm1531_vm5, 1, %v9243_v41  ;;  %v10005_v3 = vld [vmem:[#allocation105_spill] sm:$0xff]  ;;  %v10015_v23 = vld [vmem:[#allocation26_spill] sm:$0xff]  ;;  %vm10030_vm13 = vnez %v9896_v22 }
 0x28a   : > { %v9988_v60 = vsel %vm5991_vm1, 4294967295, %v9987_v60  ;;  %vm6000_vm10 = vmor %vm9991_vm0, %vm9990_vm4  ;;  %9996 = vst [vmem:[#allocation32_spill] sm:$0xff] %v6010_v53  ;;  %vm9999_vm1 = vnez %v9294_v35  ;;  %vm10000_vm0 = vcmp.lt.s32.totalorder %v3228_v31, 2  ;;  %v6027_v19 = vadd.s32 %v1563_v54, %v1250_v45  ;;  %2002 = vrot.lane.b32.xlu1 %v10015_v23, %s2936_s6  ;;  %v10017_v45 = vld [vmem:[#allocation47_spill] sm:$0xff]  ;;  %v10039_v22 = vld [vmem:[#allocation102_spill] sm:$0xff] }
 0x28b   : > { %v9993_v4 = vsel %vm6000_vm10, 4294967295, %v9992_v4  ;;  %vm1532_vm2 = vmand %vm5823_vm12, %vm9995_vm9  ;;  %v6020_v12 = vsel %vm10000_vm0, %v9865_v9, %v9866_v14  ;;  %vm10001_vm10 = vnez %v9879_v47  ;;  %vm10006_vm0 = vnez %v10005_v3  ;;  %v10076_v53 = vld [vmem:[#allocation139_spill] sm:$0xff] }
 0x28c   : > { %vm1537_vm9 = vmand %vm5786_vm14, %vm10001_vm10  ;;  %v1564_v62 = vsel %vm1532_vm2, 1, %v9243_v41  ;;  %10002 = vst [vmem:[#allocation74_spill] sm:$0xff] %v6027_v19  ;;  %v1257_v9 = vadd.s32 %v1225_v16, %v912_v8  ;;  %vm10007_vm10 = vnez %v9888_v38  ;;  %v10016_v16 = vld [vmem:[#allocation60_spill] sm:$0xff]  ;;  %vm10035_vm4 = vcmp.gt.f32.partialorder %v9897_v10, %v5463_v37  ;;  %v10053_v19 = vld [vmem:[#allocation138_spill] sm:$0xff] }
 0x28d   : > { %vm1538_vm2 = vmand %vm5823_vm12, %vm10007_vm10  ;;  %v1569_v14 = vsel %vm1537_vm9, 1, %v9243_v41  ;;  %v6044_v47 = vadd.s32 %v1564_v62, %v1251_v32  ;;  %vm741_vm10 = vcmp.eq.f32.partialorder %v5738_v29, %v9946_v15  ;;  %vm10013_vm9 = vnez %v9907_v20  ;;  %v10024_v32 = vld [vmem:[#allocation115_spill] sm:$0xff]  ;;  %v6099_v62 = vpop.permute.xlu1 %1645  ;;  %v10045_v10 = vld [vmem:[#allocation36_spill] sm:$0xff] }
 0x28e   : > { %vm1543_vm8 = vmand %vm5786_vm14, %vm10013_vm9  ;;  %v1570_v38 = vsel %vm1538_vm2, 1, %v9243_v41  ;;  %v6063_v21 = vadd.s32 %v1569_v14, %v1256_v63  ;;  %vm1441_vm5 = vcmp.eq.f32.partialorder %v10017_v45, %v10016_v16  ;;  %vm10020_vm2 = vnez %v9920_v17  ;;  %v1666_v63 = vpop.permute.xlu2 %1665  ;;  %v10106_v14 = vld [vmem:[#allocation34_spill] sm:$0xff] }
 0x28f   : > { %10008 = vst [vmem:[#allocation39_spill] sm:$0xff] %v6044_v47  ;;  %vm1544_vm9 = vmand %vm5823_vm12, %vm10018_vm6  ;;  %v1575_v20 = vsel %vm1543_vm8, 1, %v9243_v41  ;;  %v6078_v56 = vadd.s32 %v1570_v38, %v1257_v9  ;;  %vm1442_vm6 = vcmp.eq.f32.partialorder %v10023_v55, %v6091_v40  ;;  %v10026_v9 = vld [vmem:[#allocation136_spill] sm:$0xff]  ;;  %v10032_v38 = vmov 0  ;;  %v10051_v47 = vld [vmem:[#allocation137_spill] sm:$0xff]  ;;  %2010 = vrot.lane.b32.xlu2 %v10106_v14, %s2936_s6 }
 0x290   : > { %10014 = vst [vmem:[#allocation89_spill] sm:$0xff] %v6063_v21  ;;  %vm6084_vm3 = vmand %vm10020_vm2, %vm741_vm10  ;;  %v1576_v8 = vsel %vm1544_vm9, 1, %v9243_v41  ;;  %v6097_v54 = vadd.s32 %v1575_v20, %v10024_v32  ;;  %vm10027_vm8 = vnez %v10026_v9  ;;  %vm10031_vm2 = vcmp.gt.f32.partialorder %v9892_v49, %v9757_v30  ;;  %v6149_v21 = vpop.permute.xlu0 %1643  ;;  %v10111_v14 = vld [vmem:[#allocation122_spill] sm:$0xff] }
 0x291   : > { %10019 = vst [vmem:[#allocation145_spill] sm:$0xff] %v6078_v56  ;;  %v10022_v50 = vsel %vm6084_vm3, 4294967295, %v10021_v50  ;;  %vm6103_vm10 = vmand %vm10027_vm8, %vm1441_vm5  ;;  %vm10034_vm9 = vnez %v9900_v6  ;;  %v10036_v20 = vmov 0  ;;  %vm10038_vm5 = vcmp.eq.f32.partialorder %v6020_v12, %v5915_v18  ;;  %v10043_v6 = vld [vmem:[#allocation116_spill] sm:$0xff] }
 0x292   : > { %10025 = vst [vmem:[#allocation128_spill] sm:$0xff] %v6097_v54  ;;  %vm6112_vm3 = vmor %vm10031_vm2, %vm10030_vm13  ;;  %vm10040_vm8 = vnez %v10039_v22  ;;  %v10041_v49 = vmov 0  ;;  %vm1407_vm13 = vcmp.gt.f32.partialorder %v10017_v45, %v10016_v16  ;;  %v6137_v32 = vadd.s32 %v1576_v8, %v10043_v6  ;;  %v10055_v16 = vld [vmem:[#allocation44_spill] sm:$0xff]  ;;  %v10060_v8 = vld [vmem:[#allocation65_spill] sm:$0xff]  ;;  %2008 = vrot.lane.b32.xlu1 %v5463_v37, %s2936_s6 }
 0x293   : > { %v10033_v38 = vsel %vm6112_vm3, 4294967295, %v10032_v38  ;;  %vm6121_vm15 = vmor %vm10035_vm4, %vm10034_vm9  ;;  %vm10046_vm4 = vcmp.lt.s32.totalorder %v3228_v31, 126  ;;  %10050 = vst [vmem:[#allocation50_spill] sm:$0xff] %v6149_v21  ;;  %vm10052_vm9 = vnez %v10051_v47  ;;  %v10058_v45 = vmov 0  ;;  %v10065_v6 = vld [vmem:[#allocation17_spill] sm:$0xff] }
 0x294   : > { %v10037_v20 = vsel %vm6121_vm15, 4294967295, %v10036_v20  ;;  %vm6130_vm12 = vmand %vm10040_vm8, %vm10038_vm5  ;;  %10044 = vst [vmem:[#allocation40_spill] sm:$0xff] %v6137_v32  ;;  %v6142_v54 = vsel %vm10046_vm4, %v10045_v10, %v1666_v63  ;;  %vm10056_vm15 = vnez %v10055_v16  ;;  %v10071_v16 = vld [vmem:[#allocation129_spill] sm:$0xff]  ;;  %v10072_v32 = vld [vmem:[#allocation90_spill] sm:$0xff] }
 0x295   : > { %v10042_v49 = vsel %vm6130_vm12, 4294967295, %v10041_v49  ;;  %10047 = vst [vmem:[#allocation76_spill] sm:$0xff] %v6142_v54  ;;  %vm10048_vm2 = vmmov %vm10046_vm4  ;;  %vm10057_vm4 = vcmp.gt.f32.partialorder %v5507_v11, %v9757_v30  ;;  %vm10066_vm12 = vcmp.eq.f32.partialorder %v10065_v6, %v9946_v15  ;;  %v10069_v11 = vmov 0  ;;  %v10087_v54 = vld [vmem:[#allocation54_spill] sm:$0xff]  ;;  %v10088_v21 = vld [vmem:[#allocation25_spill] sm:$0xff] }
 0x296   : > { %v6147_v56 = vsel %vm10048_vm2, %v1666_v63, %v10045_v10  ;;  %vm1480_vm5 = vmand %vm10052_vm9, %vm1442_vm6  ;;  %vm10061_vm2 = vnez %v10060_v8  ;;  %vm10062_vm6 = vcmp.gt.f32.partialorder %v5473_v52, %v5463_v37  ;;  %v10063_v63 = vmov 0  ;;  %v10067_v10 = vld [vmem:[#allocation98_spill] sm:$0xff] }
 0x297   : > { %10049 = vst [vmem:[#allocation75_spill] sm:$0xff] %v6147_v56  ;;  %vm6162_vm3 = vmor %vm10057_vm4, %vm10056_vm15  ;;  %vm10068_vm8 = vnez %v10067_v10  ;;  %vm10073_vm15 = vcmp.lt.s32.totalorder %v3228_v31, 125  ;;  %vm1408_vm4 = vcmp.gt.f32.partialorder %v10023_v55, %v6091_v40  ;;  %v10081_v56 = vmov 0  ;;  %v10097_v52 = vld [vmem:[#allocation38_spill] sm:$0xff] }
 0x298   : > { %v10059_v45 = vsel %vm6162_vm3, 4294967295, %v10058_v45  ;;  %vm6171_vm9 = vmor %vm10062_vm6, %vm10061_vm2  ;;  %v1343_v8 = vsel %vm10073_vm15, %v10072_v32, %v10071_v16  ;;  %vm10083_vm3 = vcmp.lt.s32.totalorder %v3228_v31, 125  ;;  %vm10094_vm6 = vnez %v9979_v39 }
 0x299   : > { %v10064_v63 = vsel %vm6171_vm9, 4294967295, %v10063_v63  ;;  %vm6180_vm11 = vmand %vm10068_vm8, %vm10066_vm12  ;;  %vm10080_vm9 = vnez %v10079_v42  ;;  %v1359_v55 = vsel %vm10083_vm3, %v10071_v16, %v10072_v32  ;;  %v10092_v32 = vmov 0 }
 0x29a   : > { %v10070_v11 = vsel %vm6180_vm11, 4294967295, %v10069_v11  ;;  %vm6192_vm2 = vmor %vm1407_vm13, %vm6103_vm10  ;;  %vm10078_vm11 = vcmp.eq.f32.partialorder %v9957_v13, %v5915_v18  ;;  %vm1048_vm10 = vcmp.gt.f32.partialorder %v9931_v2, %v9757_v30  ;;  %vm1049_vm13 = vcmp.gt.f32.partialorder %v9932_v51, %v5463_v37  ;;  %v6228_v2 = vld [vmem:[%s3072_s0 + $0x48] sm:$0xff]  ;;  %v10089_v51 = vld [vmem:[#allocation77_spill] sm:$0xff] }
 0x29b   : > { %vm6205_vm15 = vmand %vm10080_vm9, %vm10078_vm11  ;;  %v10095_v16 = vmov 0  ;;  %vm1421_vm9 = vcmp.eq.f32.partialorder %v1343_v8, %v10097_v52  ;;  %2006 = vrot.lane.b32.xlu0 %v6228_v2, %s2936_s6 }
 0x29c   : > { %v10082_v56 = vsel %vm6205_vm15, 4294967295, %v10081_v56  ;;  %vm6217_vm12 = vmor %vm1408_vm4, %vm1480_vm5  ;;  %vm10091_vm15 = vnez %v9975_v5  ;;  %vm10098_vm4 = vnez %v9909_v0 }
 0x29d   : > { %vm1549_vm3 = vmand %vm5786_vm14, %vm6192_vm2  ;;  %vm10103_vm2 = vnez %v9739_v43  ;;  %vm10105_vm14 = vnez %v9742_v24 }
 0x29e   : > { %vm6242_vm11 = vmor %vm1048_vm10, %vm10091_vm15  ;;  %v1581_v5 = vsel %vm1549_vm3, 1, %v9243_v41  ;;  %vm10099_vm15 = vnez %v9272_v1  ;;  %vm10108_vm3 = vnez %v9997_v26 }
 0x29f   : > { %v10093_v32 = vsel %vm6242_vm11, 4294967295, %v10092_v32  ;;  %vm6248_vm8 = vmor %vm1049_vm13, %vm10094_vm6  ;;  %vm10100_vm6 = vnez %v9807_v25  ;;  %v6281_v58 = vadd.s32 %v1581_v5, %v10107_v61 }
 0x2a0   : > { %v10096_v16 = vsel %vm6248_vm8, 4294967295, %v10095_v16  ;;  %vm1550_vm5 = vmand %vm10098_vm4, %vm6217_vm12  ;;  %vm1422_vm12 = vcmp.eq.f32.partialorder %v1359_v55, %v10015_v23  ;;  %vm1387_vm8 = vcmp.gt.f32.partialorder %v1343_v8, %v10097_v52  ;;  %v1672_v8 = vpop.permute.xlu2 %1671  ;;  %v6312_v52 = vpop.permute.xlu1 %1651 }
 0x2a1   : > { %vm10101_vm10 = vmand %vm10099_vm15, %vm10100_vm6  ;;  %v1582_v25 = vsel %vm1550_vm5, 1, %v9243_v41  ;;  %vm10112_vm5 = vnez %v9847_v34 }
 0x2a2   : > { %v871_v39 = vsel %vm10101_vm10, 1, %v9243_v41  ;;  %vm10109_vm6 = vmand %vm9999_vm1, %vm10108_vm3  ;;  %vm10110_vm10 = vnez %v10026_v9  ;;  %v6295_v37 = vadd.s32 %v1582_v25, %v10111_v14  ;;  %vm1388_vm1 = vcmp.gt.f32.partialorder %v1359_v55, %v10015_v23  ;;  %v10129_v14 = vld [vmem:[#allocation42_spill] sm:$0xff] }
 0x2a3   : > { %v872_v30 = vsel %vm10109_vm6, 1, %v9243_v41  ;;  %vm1459_vm7 = vmand %vm10110_vm10, %vm1421_vm9  ;;  %vm10114_vm9 = vnez %v9852_v36  ;;  %vm10116_vm6 = vnez %v10051_v47  ;;  %vm10124_vm10 = vcmp.lt.s32.totalorder %v3228_v31, 126  ;;  %2012 = vrot.lane.b32.xlu0 %v5915_v18, %s2936_s6 }
 0x2a4   : > { %vm10113_vm11 = vmand %vm10103_vm2, %vm10112_vm5  ;;  %vm10119_vm2 = vnez %v10011_v33 }
 0x2a5   : > { %v1216_v61 = vsel %vm10113_vm11, 1, %v9243_v41  ;;  %vm10115_vm3 = vmand %vm10006_vm0, %vm10114_vm9  ;;  %vm10117_vm11 = vnez %v9859_v28  ;;  %vm10120_vm9 = vnez %v9864_v57  ;;  %v6335_v28 = vsel %vm10124_vm10, %v5903_v59, %v1672_v8  ;;  %v6342_v57 = vpop.permute.xlu0 %1649 }
 0x2a6   : > { %v558_v26 = vsel %vm10115_vm3, 1, %v9243_v41  ;;  %vm1460_vm13 = vmand %vm10116_vm6, %vm1422_vm12  ;;  %vm707_vm6 = vcmp.gt.f32.partialorder %v5738_v29, %v9946_v15  ;;  %v10128_v29 = vld [vmem:[#allocation62_spill] sm:$0xff] }
 0x2a7   : > { %vm10118_vm5 = vmand %vm10105_vm14, %vm10117_vm11  ;;  %v903_v5 = vadd.s32 %v871_v39, %v558_v26 }
 0x2a8   : > { %v1217_v34 = vsel %vm10118_vm5, 1, %v9243_v41  ;;  %vm10121_vm3 = vmand %vm10119_vm2, %vm10120_vm9  ;;  %vm708_vm5 = vcmp.gt.f32.partialorder %v6020_v12, %v5915_v18  ;;  %vm10132_vm9 = vnez %v10022_v50  ;;  %v10136_v12 = vld [vmem:[#allocation111_spill] sm:$0xff] }
 0x2a9   : > { %v559_v36 = vsel %vm10121_vm3, 1, %v9243_v41  ;;  %vm6326_vm12 = vmor %vm1387_vm8, %vm1459_vm7  ;;  %vm1385_vm8 = vcmp.gt.f32.partialorder %v10136_v12, %v4697_v27 }
 0x2aa   : > { %vm10125_vm11 = vmmov %vm10124_vm10  ;;  %v904_v39 = vadd.s32 %v872_v30, %v559_v36  ;;  %vm10130_vm10 = vcmp.lt.s32.totalorder %v3228_v31, 2  ;;  %v10133_v30 = vmov 0  ;;  %v10144_v36 = vmov 0 }
 0x2ab   : > { %v6340_v55 = vsel %vm10125_vm11, %v1672_v8, %v5903_v59  ;;  %vm6344_vm7 = vmor %vm1388_vm1, %vm1460_vm13  ;;  %v6354_v26 = vsel %vm10130_vm10, %v10129_v14, %v10128_v29  ;;  %v1248_v59 = vadd.s32 %v1216_v61, %v903_v5  ;;  %vm10131_vm1 = vnez %v9890_v44  ;;  %v10146_v5 = vld [vmem:[#allocation112_spill] sm:$0xff] }
 0x2ac   : > { %vm1529_vm13 = vmand %vm10131_vm1, %vm6326_vm12  ;;  %v1249_v61 = vadd.s32 %v1217_v34, %v904_v39  ;;  %vm10140_vm1 = vnez %v10067_v10  ;;  %v10141_v34 = vmov 0 }
 0x2ad   : > { %vm6364_vm3 = vmor %vm707_vm6, %vm10132_vm9  ;;  %v1561_v50 = vsel %vm1529_vm13, 1, %v9243_v41  ;;  %vm1420_vm9 = vcmp.eq.f32.partialorder %v10146_v5, %v5231_v46 }
 0x2ae   : > { %v10134_v30 = vsel %vm6364_vm3, 4294967295, %v10133_v30  ;;  %vm10135_vm11 = vmmov %vm10130_vm10  ;;  %vm1419_vm10 = vcmp.eq.f32.partialorder %v10136_v12, %v4697_v27  ;;  %vm10139_vm3 = vcmp.eq.f32.partialorder %v10088_v21, %v10087_v54  ;;  %v6407_v39 = vadd.s32 %v1561_v50, %v1248_v59  ;;  %v10170_v27 = vld [vmem:[#allocation131_spill] sm:$0xff]  ;;  %v10187_v12 = vld [vmem:[#allocation82_spill] sm:$0xff]  ;;  %v1678_v50 = vpop.permute.xlu2 %1677 }
 0x2af   : > { %v6372_v8 = vsel %vm10135_vm11, %v10128_v29, %v10129_v14  ;;  %vm1530_vm12 = vmand %vm10098_vm4, %vm6344_vm7  ;;  %vm10143_vm7 = vnez %v10042_v49  ;;  %v10161_v29 = vmov 0  ;;  %2016 = vrot.lane.b32.xlu2 %v10170_v27, %s2936_s6 }
 0x2b0   : > { %vm6394_vm14 = vmand %vm10140_vm1, %vm10139_vm3  ;;  %v1562_v23 = vsel %vm1530_vm12, 1, %v9243_v41  ;;  %vm10147_vm3 = vnez %v10053_v19  ;;  %vm10149_vm1 = vnez %v10026_v9  ;;  %v10157_v19 = vmov 0 }
 0x2b1   : > { %v10142_v34 = vsel %vm6394_vm14, 4294967295, %v10141_v34  ;;  %vm6400_vm13 = vmor %vm708_vm5, %vm10143_vm7  ;;  %vm10154_vm14 = vnez %v9294_v35  ;;  %v6449_v14 = vadd.s32 %v1562_v23, %v1249_v61  ;;  %vm735_vm7 = vcmp.eq.f32.partialorder %v6372_v8, %v10087_v54  ;;  %v10188_v61 = vld [vmem:[#allocation52_spill] sm:$0xff] }
 0x2b2   : > { %v10145_v36 = vsel %vm6400_vm13, 4294967295, %v10144_v36  ;;  %vm10148_vm11 = vmand %vm10099_vm15, %vm10147_vm3  ;;  %vm10155_vm3 = vcmp.eq.f32.partialorder %v10089_v51, %v6228_v2  ;;  %vm1386_vm15 = vcmp.gt.f32.partialorder %v10146_v5, %v5231_v46  ;;  %v1658_v5 = vpop.permute.xlu1 %1657 }
 0x2b3   : > { %v869_v25 = vsel %vm10148_vm11, 1, %v9243_v41  ;;  %vm6417_vm5 = vmand %vm10149_vm1, %vm1419_vm10  ;;  %vm10156_vm11 = vnez %v10079_v42  ;;  %vm10159_vm10 = vnez %v10070_v11  ;;  %vm10160_vm1 = vcmp.gt.f32.partialorder %v10065_v6, %v9946_v15  ;;  %v10208_v42 = vld [vmem:[#allocation93_spill] sm:$0xff] }
 0x2b4   : > { %vm6434_vm6 = vmand %vm10156_vm11, %vm10155_vm3  ;;  %vm10163_vm3 = vnez %v10076_v53  ;;  %v10168_v6 = vmov 0  ;;  %v10171_v53 = vld [vmem:[#allocation22_spill] sm:$0xff]  ;;  %v10204_v11 = vmov 0 }
 0x2b5   : > { %v10158_v19 = vsel %vm6434_vm6, 4294967295, %v10157_v19  ;;  %vm6443_vm12 = vmor %vm10160_vm1, %vm10159_vm10  ;;  %vm10165_vm6 = vnez %v10051_v47  ;;  %vm10166_vm1 = vnez %v10082_v56  ;;  %vm10167_vm10 = vcmp.gt.f32.partialorder %v9957_v13, %v5915_v18  ;;  %2014 = vrot.lane.b32.xlu1 %v10171_v53, %s2936_s6  ;;  %v10196_v53 = vld [vmem:[#allocation127_spill] sm:$0xff] }
 0x2b6   : > { %v10162_v29 = vsel %vm6443_vm12, 4294967295, %v10161_v29  ;;  %vm10164_vm11 = vmand %vm10154_vm14, %vm10163_vm3  ;;  %vm10183_vm14 = vnez %v9742_v24 }
 0x2b7   : > { %v870_v59 = vsel %vm10164_vm11, 1, %v9243_v41  ;;  %vm1458_vm13 = vmand %vm10165_vm6, %vm1420_vm9  ;;  %vm10172_vm9 = vnez %v9956_v48  ;;  %vm10184_vm6 = vnez %v9920_v17  ;;  %v6561_v17 = vld [vmem:[%s3072_s0 + $0xf8] sm:$0xff]  ;;  %2022 = vrot.lane.b32.xlu2 %v6091_v40, %s2936_s6 }
 0x2b8   : > { %vm6464_vm12 = vmor %vm10167_vm10, %vm10166_vm1  ;;  %vm10176_vm10 = vnez %v9971_v7  ;;  %v10185_v7 = vmov 0 }
 0x2b9   : > { %v10169_v6 = vsel %vm6464_vm12, 4294967295, %v10168_v6  ;;  %vm10173_vm11 = vmand %vm10006_vm0, %vm10172_vm9 }
 0x2ba   : > { %v556_v13 = vsel %vm10173_vm11, 1, %v9243_v41  ;;  %vm6484_vm3 = vmor %vm1385_vm8, %vm6417_vm5  ;;  %vm10181_vm5 = vnez %v9739_v43  ;;  %vm10193_vm11 = vnez %v9890_v44 }
 0x2bb   : > { %vm10177_vm12 = vmand %vm10119_vm2, %vm10176_vm10  ;;  %v901_v48 = vadd.s32 %v869_v25, %v556_v13 }
 0x2bc   : > { %v557_v46 = vsel %vm10177_vm12, 1, %v9243_v41  ;;  %vm6498_vm9 = vmor %vm1386_vm15, %vm1458_vm13  ;;  %vm10189_vm13 = vnez %v9988_v60 }
 0x2bd   : > { %vm6512_vm10 = vmand %vm10184_vm6, %vm735_vm7  ;;  %v902_v23 = vadd.s32 %v870_v59, %v557_v46  ;;  %vm10191_vm7 = vnez %v9993_v4  ;;  %vm10194_vm6 = vcmp.lt.s32.totalorder %v3228_v31, 126  ;;  %v6554_v46 = vpop.permute.xlu0 %1655 }
 0x2be   : > { %v10186_v7 = vsel %vm6512_vm10, 4294967295, %v10185_v7  ;;  %vm10190_vm12 = vmand %vm10181_vm5, %vm10189_vm13  ;;  %v6537_v59 = vsel %vm10194_vm6, %v6099_v62, %v1678_v50  ;;  %vm10203_vm10 = vnez %v10039_v22  ;;  %vm10221_vm5 = vnez %v10037_v20 }
 0x2bf   : > { %v1214_v25 = vsel %vm10190_vm12, 1, %v9243_v41  ;;  %vm10192_vm0 = vmand %vm10183_vm14, %vm10191_vm7  ;;  %vm10206_vm14 = vnez %v10051_v47  ;;  %2028 = vrot.lane.b32.xlu2 %v6561_v17, %s2936_s6 }
 0x2c0   : > { %v1215_v49 = vsel %vm10192_vm0, 1, %v9243_v41  ;;  %vm10195_vm13 = vmmov %vm10194_vm6 }
 0x2c1   : > { %v6542_v60 = vsel %vm10195_vm13, %v1678_v50, %v6099_v62  ;;  %vm10197_vm12 = vmmov %vm10194_vm6  ;;  %v10199_v62 = vld [vmem:[#allocation56_spill] sm:$0xff]  ;;  %vm10200_vm13 = vcmp.eq.f32.partialorder %v10188_v61, %v10187_v12  ;;  %v1246_v50 = vadd.s32 %v1214_v25, %v901_v48 }
 0x2c2   : > { %v6547_v4 = vsel %vm10197_vm12, %v10196_v53, %v1658_v5  ;;  %vm10198_vm0 = vmmov %vm10194_vm6  ;;  %vm1448_vm7 = vcmp.eq.f32.partialorder %v10199_v62, %v6561_v17  ;;  %vm10201_vm12 = vnez %v10026_v9 }
 0x2c3   : > { %v6552_v13 = vsel %vm10198_vm0, %v1658_v5, %v10196_v53  ;;  %vm1528_vm6 = vmand %vm10098_vm4, %vm6498_vm9  ;;  %vm10202_vm0 = vcmp.eq.f32.partialorder %v6354_v26, %v6228_v2  ;;  %vm1413_vm9 = vcmp.gt.f32.partialorder %v10188_v61, %v10187_v12  ;;  %v1247_v5 = vadd.s32 %v1215_v49, %v902_v23  ;;  %v10207_v53 = vld [vmem:[#allocation132_spill] sm:$0xff]  ;;  %v10239_v61 = vld [vmem:[#allocation118_spill] sm:$0xff] }
 0x2c4   : > { %vm1485_vm15 = vmand %vm10201_vm12, %vm10200_vm13  ;;  %vm10209_vm13 = vcmp.lt.s32.totalorder %v3228_v31, 125  ;;  %v1560_v48 = vsel %vm1528_vm6, 1, %v9243_v41  ;;  %vm10217_vm6 = vnez %v9272_v1  ;;  %vm10233_vm12 = vnez %v10158_v19 }
 0x2c5   : > { %vm6575_vm1 = vmand %vm10203_vm10, %vm10202_vm0  ;;  %v1346_v10 = vsel %vm10209_vm13, %v10208_v42, %v10207_v53  ;;  %vm1414_vm0 = vcmp.gt.f32.partialorder %v10199_v62, %v6561_v17  ;;  %v6624_v49 = vadd.s32 %v1560_v48, %v1247_v5  ;;  %v2729_v5 = vld [vmem:[%s3072_s0 + $0xa8] sm:$0xff]  ;;  %v1664_v48 = vpop.permute.xlu1 %1663  ;;  %v6719_v22 = vpop.permute.xlu0 %1661 }
 0x2c6   : > { %v10205_v11 = vsel %vm6575_vm1, 4294967295, %v10204_v11  ;;  %vm1486_vm8 = vmand %vm10206_vm14, %vm1448_vm7  ;;  %vm388_vm7 = vcmp.gt.f32.partialorder %v10088_v21, %v10087_v54  ;;  %v2728_v21 = vld [vmem:[%s3072_s0 + $0xb8] sm:$0xff]  ;;  %2018 = vrot.lane.b32.xlu0 %v2729_v5, %s2936_s6  ;;  %v10246_v5 = vld [vmem:[#allocation147_spill] sm:$0xff]  ;;  %10249 = vst [vmem:[#allocation140_spill] sm:$0xff] %v6719_v22 }
 0x2c7   : > { %vm10210_vm10 = vmand %vm10193_vm11, %vm6484_vm3  ;;  %2020 = vrot.lane.b32.xlu1 %v2728_v21, %s2936_s6 }
 0x2c8   : > { %v1559_v12 = vsel %vm10210_vm10, 1, %v9243_v41  ;;  %vm6596_vm1 = vmor %vm1413_vm9, %vm1485_vm15  ;;  %vm10223_vm15 = vnez %v10142_v34 }
 0x2c9   : > { %vm10213_vm3 = vmmov %vm10209_vm13  ;;  %v6622_v25 = vadd.s32 %v1559_v12, %v1246_v50  ;;  %v10224_v50 = vmov 0  ;;  %v10235_v12 = vmov 0 }
 0x2ca   : > { %v1362_v56 = vsel %vm10213_vm3, %v10207_v53, %v10208_v42  ;;  %vm6610_vm10 = vmor %vm1414_vm0, %vm1486_vm8  ;;  %vm10218_vm0 = vnez %v10005_v3  ;;  %vm10219_vm3 = vnez %v10033_v38  ;;  %v10228_v38 = vld [vmem:[#allocation64_spill] sm:$0xff] }
 0x2cb   : > { %vm1555_vm8 = vmand %vm10193_vm11, %vm6596_vm1  ;;  %vm10227_vm11 = vnez %v9294_v35 }
 0x2cc   : > { %vm10220_vm9 = vmand %vm10218_vm0, %vm10219_vm3  ;;  %v1587_v20 = vsel %vm1555_vm8, 1, %v9243_v41  ;;  %vm10261_vm0 = vnez %v10186_v7  ;;  %v10273_v7 = vld [vmem:[#allocation88_spill] sm:$0xff] }
 0x2cd   : > { %v564_v42 = vsel %vm10220_vm9, 1, %v9243_v41  ;;  %vm10222_vm13 = vmand %vm10119_vm2, %vm10221_vm5  ;;  %v6689_v23 = vadd.s32 %v1587_v20, %v10239_v61 }
 0x2ce   : > { %v565_v62 = vsel %vm10222_vm13, 1, %v9243_v41  ;;  %vm6644_vm14 = vmor %vm388_vm7, %vm10223_vm15  ;;  %vm10229_vm7 = vnez %v10059_v45  ;;  %vm10231_vm15 = vnez %v10064_v63  ;;  %v10238_v45 = vld [vmem:[#allocation130_spill] sm:$0xff]  ;;  %v1684_v63 = vpop.permute.xlu2 %1683 }
 0x2cf   : > { %v10225_v50 = vsel %vm6644_vm14, 4294967295, %v10224_v50  ;;  %vm1556_vm5 = vmand %vm10098_vm4, %vm6610_vm10  ;;  %vm10234_vm10 = vcmp.gt.f32.partialorder %v10089_v51, %v6228_v2  ;;  %vm1428_vm1 = vcmp.eq.f32.partialorder %v1362_v56, %v10238_v45  ;;  %10240 = vst [vmem:[#allocation61_spill] sm:$0xff] %v6689_v23  ;;  %v10251_v23 = vld [vmem:[#allocation86_spill] sm:$0xff]  ;;  %vm10262_vm14 = vcmp.gt.f32.partialorder %v6372_v8, %v10087_v54 }
 0x2d0   : > { %vm10230_vm13 = vmand %vm10217_vm6, %vm10229_vm7  ;;  %v1588_v19 = vsel %vm1556_vm5, 1, %v9243_v41 }
 0x2d1   : > { %v877_v34 = vsel %vm10230_vm13, 1, %v9243_v41  ;;  %vm10232_vm3 = vmand %vm10227_vm11, %vm10231_vm15  ;;  %vm10242_vm15 = vnez %v10026_v9  ;;  %vm10244_vm13 = vcmp.lt.s32.totalorder %v3228_v31, 126 }
 0x2d2   : > { %v878_v53 = vsel %vm10232_vm3, 1, %v9243_v41  ;;  %vm6677_vm8 = vmor %vm10234_vm10, %vm10233_vm12  ;;  %vm10241_vm12 = vcmp.eq.f32.partialorder %v1346_v10, %v10228_v38  ;;  %v6702_v51 = vsel %vm10244_vm13, %v6312_v52, %v1684_v63  ;;  %vm10252_vm10 = vnez %v9739_v43 }
 0x2d3   : > { %v10236_v12 = vsel %vm6677_vm8, 4294967295, %v10235_v12  ;;  %vm1465_vm3 = vmand %vm10242_vm15, %vm10241_vm12  ;;  %vm1080_vm15 = vcmp.eq.f32.partialorder %v10251_v23, %v10087_v54  ;;  %vm10256_vm8 = vnez %v10096_v16  ;;  %v910_v16 = vadd.s32 %v878_v53, %v565_v62  ;;  %v10271_v54 = vld [vmem:[#allocation119_spill] sm:$0xff] }
 0x2d4   : > { %vm10245_vm5 = vmmov %vm10244_vm13  ;;  %vm10250_vm13 = vnez %v10051_v47  ;;  %v6766_v8 = vadd.s32 %v1588_v19, %v10271_v54  ;;  %v2730_v53 = vld [vmem:[%s3072_s0 + $0xe8] sm:$0xff] }
 0x2d5   : > { %v6707_v21 = vsel %vm10245_vm5, %v1684_v63, %v6312_v52  ;;  %vm10247_vm9 = vmmov %vm10245_vm5  ;;  %2026 = vrot.lane.b32.xlu1 %v2730_v53, %s2936_s6 }
 0x2d6   : > { %v6712_v20 = vsel %vm10247_vm9, %v10246_v5, %v1664_v48  ;;  %vm10248_vm12 = vmmov %vm10245_vm5  ;;  %vm1394_vm5 = vcmp.gt.f32.partialorder %v1362_v56, %v10238_v45  ;;  %vm10253_vm9 = vnez %v10093_v32  ;;  %v10263_v32 = vmov 0  ;;  %v10284_v45 = vld [vmem:[#allocation144_spill] sm:$0xff] }
 0x2d7   : > { %v6717_v61 = vsel %vm10248_vm12, %v1664_v48, %v10246_v5  ;;  %vm1466_vm7 = vmand %vm10250_vm13, %vm1428_vm1  ;;  %vm10255_vm12 = vnez %v9742_v24  ;;  %vm10258_vm1 = vcmp.gt.f32.partialorder %v1346_v10, %v10228_v38  ;;  %v909_v56 = vadd.s32 %v877_v34, %v564_v42  ;;  %v10267_v10 = vld [vmem:[#allocation109_spill] sm:$0xff]  ;;  %v10277_v34 = vld [vmem:[#allocation87_spill] sm:$0xff] }
 0x2d8   : > { %vm10254_vm2 = vmand %vm10252_vm10, %vm10253_vm9  ;;  %v10269_v38 = vmov 0  ;;  %vm702_vm9 = vcmp.gt.f32.partialorder %v6354_v26, %v6228_v2  ;;  %v10275_v26 = vmov 0  ;;  %v10280_v48 = vld [vmem:[#allocation110_spill] sm:$0xff] }
 0x2d9   : > { %v1222_v52 = vsel %vm10254_vm2, 1, %v9243_v41  ;;  %vm10257_vm11 = vmand %vm10255_vm12, %vm10256_vm8 }
 0x2da   : > { %v1223_v63 = vsel %vm10257_vm11, 1, %v9243_v41  ;;  %vm6740_vm13 = vmor %vm10258_vm1, %vm1465_vm3  ;;  %vm10268_vm11 = vnez %v10267_v10  ;;  %v1254_v42 = vadd.s32 %v1222_v52, %v909_v56  ;;  %v6806_v56 = vpop.permute.xlu2 %1966 }
 0x2db   : > { %vm6749_vm2 = vmor %vm10262_vm14, %vm10261_vm0  ;;  %vm10272_vm14 = vnez %v9890_v44  ;;  %v1255_v62 = vadd.s32 %v1223_v63, %v910_v16  ;;  %v1670_v16 = vpop.permute.xlu1 %1669 }
 0x2dc   : > { %v10264_v32 = vsel %vm6749_vm2, 4294967295, %v10263_v32  ;;  %vm6753_vm8 = vmor %vm1394_vm5, %vm1466_vm7  ;;  %vm1086_vm7 = vcmp.eq.f32.partialorder %v10273_v7, %v9946_v15  ;;  %vm10274_vm5 = vnez %v10205_v11  ;;  %v2731_v11 = vld [vmem:[%s3072_s0 + $0xd8] sm:$0xff] }
 0x2dd   : > { %vm6759_vm3 = vmand %vm10268_vm11, %vm1080_vm15  ;;  %2024 = vrot.lane.b32.xlu0 %v2731_v11, %s2936_s6 }
 0x2de   : > { %v10270_v38 = vsel %vm6759_vm3, 4294967295, %v10269_v38  ;;  %vm1535_vm0 = vmand %vm10272_vm14, %vm6740_vm13  ;;  %vm1087_vm3 = vcmp.eq.f32.partialorder %v10277_v34, %v5915_v18  ;;  %vm10290_vm14 = vnez %v10225_v50 }
 0x2df   : > { %vm1536_vm15 = vmand %vm10098_vm4, %vm6753_vm8  ;;  %v1567_v19 = vsel %vm1535_vm0, 1, %v9243_v41  ;;  %vm1052_vm8 = vcmp.gt.f32.partialorder %v10273_v7, %v9946_v15  ;;  %vm1053_vm0 = vcmp.gt.f32.partialorder %v10277_v34, %v5915_v18  ;;  %vm10285_vm4 = vcmp.lt.s32.totalorder %v3228_v31, 126  ;;  %v6824_v7 = vpop.permute.xlu0 %1667 }
 0x2e0   : > { %vm6780_vm1 = vmor %vm702_vm9, %vm10274_vm5  ;;  %v1568_v5 = vsel %vm1536_vm15, 1, %v9243_v41  ;;  %v6798_v52 = vadd.s32 %v1567_v19, %v1254_v42  ;;  %vm10281_vm9 = vnez %v10280_v48  ;;  %v6817_v54 = vsel %vm10285_vm4, %v10284_v45, %v1670_v16  ;;  %10289 = vst [vmem:[#allocation133_spill] sm:$0xff] %v6824_v7  ;;  %v6862_v19 = vld [vmem:[%s3072_s0 + $0x40] sm:$0xff] }
 0x2e1   : > { %v10276_v26 = vsel %vm6780_vm1, 4294967295, %v10275_v26  ;;  %vm1124_vm13 = vmand %vm10268_vm11, %vm1086_vm7  ;;  %v6800_v63 = vadd.s32 %v1568_v5, %v1255_v62  ;;  %vm10282_vm7 = vnez %v10134_v30  ;;  %10286 = vst [vmem:[#allocation53_spill] sm:$0xff] %v6817_v54  ;;  %vm10291_vm1 = vnez %v10005_v3  ;;  %v10357_v3 = vld [vmem:[#allocation142_spill] sm:$0xff] }
 0x2e2   : > { %10278 = vst [vmem:[#allocation27_spill] sm:$0xff] %v6798_v52  ;;  %vm1125_vm5 = vmand %vm10281_vm9, %vm1087_vm3  ;;  %vm10297_vm9 = vnez %v10162_v29  ;;  %v10390_v7 = vmov 0 }
 0x2e3   : > { %10279 = vst [vmem:[#allocation59_spill] sm:$0xff] %v6800_v63  ;;  %vm10283_vm15 = vmand %vm10217_vm6, %vm10282_vm7  ;;  %vm10305_vm6 = vnez %v10264_v32  ;;  %v6887_v32 = vpop.permute.xlu2 %1972 }
 0x2e4   : > { %v881_v15 = vsel %vm10283_vm15, 1, %v9243_v41  ;;  %vm1156_vm11 = vmor %vm1052_vm8, %vm1124_vm13  ;;  %vm10292_vm13 = vnez %v9294_v35  ;;  %vm10293_vm8 = vnez %v10145_v36  ;;  %v10299_v36 = vld [vmem:[#allocation85_spill] sm:$0xff]  ;;  %10304 = vst [vmem:[#allocation141_spill] sm:$0xff] %v6862_v19  ;;  %v10347_v35 = vld [vmem:[#allocation18_spill] sm:$0xff] }
 0x2e5   : > { %vm10287_vm3 = vmmov %vm10285_vm4 }
 0x2e6   : > { %v6822_v18 = vsel %vm10287_vm3, %v1670_v16, %v10284_v45  ;;  %vm10294_vm4 = vmand %vm10292_vm13, %vm10293_vm8  ;;  %vm10296_vm3 = vnez %v10011_v33  ;;  %vm1081_vm8 = vcmp.eq.f32.partialorder %v10299_v36, %v6228_v2  ;;  %v10315_v45 = vld [vmem:[#allocation50_spill] sm:$0xff] }
 0x2e7   : > { %10288 = vst [vmem:[#allocation69_spill] sm:$0xff] %v6822_v18  ;;  %v882_v30 = vsel %vm10294_vm4, 1, %v9243_v41  ;;  %vm1157_vm15 = vmor %vm1053_vm0, %vm1125_vm5  ;;  %vm10300_vm5 = vnez %v10169_v6  ;;  %vm10302_vm4 = vnez %v9742_v24  ;;  %v10348_v24 = vmov 0  ;;  %v10409_v18 = vld [vmem:[#allocation40_spill] sm:$0xff] }
 0x2e8   : > { %vm10298_vm12 = vmand %vm10291_vm1, %vm10297_vm9 }
 0x2e9   : > { %v568_v42 = vsel %vm10298_vm12, 1, %v9243_v41  ;;  %vm1194_vm7 = vmand %vm10252_vm10, %vm1156_vm11  ;;  %vm10303_vm12 = vnez %v10280_v48  ;;  %vm1046_vm11 = vcmp.gt.f32.partialorder %v10251_v23, %v6862_v19  ;;  %v7038_v48 = vld [vmem:[%s3072_s0 + $0x30] sm:$0xff] }
 0x2ea   : > { %vm10301_vm0 = vmand %vm10296_vm3, %vm10300_vm5  ;;  %v913_v34 = vadd.s32 %v881_v15, %v568_v42  ;;  %v1226_v29 = vsel %vm1194_vm7, 1, %v9243_v41  ;;  %vm10306_vm5 = vnez %v9272_v1  ;;  %vm1047_vm7 = vcmp.gt.f32.partialorder %v10299_v36, %v6228_v2  ;;  %v1676_v15 = vpop.permute.xlu1 %1675  ;;  %v6903_v42 = vpop.permute.xlu0 %1673 }
 0x2eb   : > { %v569_v62 = vsel %vm10301_vm0, 1, %v9243_v41  ;;  %vm1195_vm2 = vmand %vm10302_vm4, %vm1157_vm15  ;;  %vm10308_vm15 = vnez %v10270_v38  ;;  %10320 = vst [vmem:[#allocation26_spill] sm:$0xff] %v6903_v42  ;;  %v10345_v42 = vld [vmem:[#allocation66_spill] sm:$0xff] }
 0x2ec   : > { %vm1119_vm9 = vmand %vm10303_vm12, %vm1081_vm8  ;;  %v914_v53 = vadd.s32 %v882_v30, %v569_v62  ;;  %v1227_v6 = vsel %vm1195_vm2, 1, %v9243_v41  ;;  %v6871_v5 = vadd.s32 %v1226_v29, %v913_v34  ;;  %v10322_v62 = vld [vmem:[#allocation117_spill] sm:$0xff] }
 0x2ed   : > { %vm843_vm0 = vmand %vm10306_vm5, %vm10305_vm6  ;;  %vm10314_vm6 = vnez %v10276_v26  ;;  %v10321_v26 = vld [vmem:[#allocation72_spill] sm:$0xff] }
 0x2ee   : > { %10307 = vst [vmem:[#allocation41_spill] sm:$0xff] %v6871_v5  ;;  %vm6877_vm8 = vmor %vm1046_vm11, %vm10308_vm15  ;;  %v6881_v16 = vadd.s32 %v1227_v6, %v914_v53  ;;  %vm10316_vm11 = vcmp.lt.s32.totalorder %v3228_v31, 126  ;;  %v875_v36 = vsel %vm843_vm0, 1, %v9243_v41  ;;  %v10360_v5 = vld [vmem:[#allocation143_spill] sm:$0xff] }
 0x2ef   : > { %vm6883_vm12 = vmor %vm1047_vm7, %vm1119_vm9  ;;  %v6896_v38 = vsel %vm10316_vm11, %v10315_v45, %v1676_v15  ;;  %vm1425_vm7 = vcmp.eq.f32.partialorder %v10321_v26, %v6862_v19 }
 0x2f0   : > { %10311 = vst [vmem:[#allocation81_spill] sm:$0xff] %v6881_v16  ;;  %vm844_vm2 = vmand %vm10292_vm13, %vm10314_vm6  ;;  %v7051_v16 = vld [vmem:[%s3072_s0 + $0x38] sm:$0xff] }
 0x2f1   : > { %10317 = vst [vmem:[#allocation146_spill] sm:$0xff] %v6896_v38  ;;  %vm10318_vm15 = vmmov %vm10316_vm11  ;;  %vm1426_vm11 = vcmp.eq.f32.partialorder %v10322_v62, %v6228_v2  ;;  %v876_v34 = vsel %vm844_vm2, 1, %v9243_v41  ;;  %vm1392_vm2 = vcmp.gt.f32.partialorder %v10322_v62, %v6228_v2  ;;  %v6943_v2 = vpop.permute.xlu2 %1978  ;;  %v7007_v38 = vld [vmem:[%s3072_s0] sm:$0xff] }
 0x2f2   : > { %v6901_v30 = vsel %vm10318_vm15, %v1676_v15, %v10315_v45  ;;  %vm1188_vm9 = vmand %vm10252_vm10, %vm6877_vm8  ;;  %vm10323_vm15 = vnez %v10026_v9  ;;  %vm1391_vm8 = vcmp.gt.f32.partialorder %v10321_v26, %v6862_v19  ;;  %v1682_v45 = vpop.permute.xlu1 %1681  ;;  %vm10329_vm10 = vnez %v9909_v0  ;;  %v10363_v0 = vld [vmem:[#allocation76_spill] sm:$0xff]  ;;  %v10367_v9 = vld [vmem:[#allocation75_spill] sm:$0xff] }
 0x2f3   : > { %10319 = vst [vmem:[#allocation73_spill] sm:$0xff] %v6901_v30  ;;  %vm1189_vm6 = vmand %vm10302_vm4, %vm6883_vm12  ;;  %v1220_v53 = vsel %vm1188_vm9, 1, %v9243_v41  ;;  %vm10325_vm12 = vnez %v10051_v47  ;;  %vm10328_vm9 = vnez %v9890_v44  ;;  %v10364_v44 = vld [vmem:[#allocation96_spill] sm:$0xff]  ;;  %v7074_v47 = vld [vmem:[%s3072_s0 + $0x68] sm:$0xff] }
 0x2f4   : > { %vm1463_vm13 = vmand %vm10323_vm15, %vm1425_vm7  ;;  %vm10326_vm7 = vnez %v10236_v12  ;;  %v1221_v50 = vsel %vm1189_vm6, 1, %v9243_v41 }
 0x2f5   : > { %vm10324_vm0 = vmand %vm10291_vm1, %vm10290_vm14 }
 0x2f6   : > { %v562_v29 = vsel %vm10324_vm0, 1, %v9243_v41  ;;  %vm1464_vm5 = vmand %vm10325_vm12, %vm1426_vm11 }
 0x2f7   : > { %vm10327_vm4 = vmand %vm10296_vm3, %vm10326_vm7  ;;  %v907_v11 = vadd.s32 %v875_v36, %v562_v29 }
 0x2f8   : > { %v563_v6 = vsel %vm10327_vm4, 1, %v9243_v41  ;;  %vm1495_vm14 = vmor %vm1391_vm8, %vm1463_vm13  ;;  %vm10330_vm13 = vcmp.lt.s32.totalorder %v3228_v31, 126 }
 0x2f9   : > { %v908_v23 = vadd.s32 %v876_v34, %v563_v6  ;;  %vm1496_vm0 = vmor %vm1392_vm2, %vm1464_vm5  ;;  %v1252_v15 = vadd.s32 %v1220_v53, %v907_v11  ;;  %v6951_v36 = vsel %vm10330_vm13, %v6342_v57, %v1682_v45  ;;  %v6958_v34 = vpop.permute.xlu0 %1679  ;;  %v10336_v6 = vld [vmem:[#allocation24_spill] sm:$0xff]  ;;  %v10337_v11 = vld [vmem:[#allocation99_spill] sm:$0xff]  ;;  %vm10338_vm5 = vcmp.lt.s32.totalorder %v3228_v31, 125 }
 0x2fa   : > { %vm1533_vm11 = vmand %vm10328_vm9, %vm1495_vm14  ;;  %10331 = vst [vmem:[#allocation60_spill] sm:$0xff] %v6951_v36 }
 0x2fb   : > { %v1253_v26 = vadd.s32 %v1221_v50, %v908_v23  ;;  %vm1534_vm7 = vmand %vm10329_vm10, %vm1496_vm0  ;;  %v1565_v12 = vsel %vm1533_vm11, 1, %v9243_v41  ;;  %10334 = vst [vmem:[#allocation51_spill] sm:$0xff] %v6958_v34  ;;  %v1349_v50 = vsel %vm10338_vm5, %v10337_v11, %v10336_v6 }
 0x2fc   : > { %vm10332_vm4 = vmmov %vm10330_vm13  ;;  %v1566_v29 = vsel %vm1534_vm7, 1, %v9243_v41  ;;  %v6961_v53 = vadd.s32 %v1565_v12, %v1252_v15  ;;  %v6984_v15 = vpop.permute.xlu2 %1984 }
 0x2fd   : > { %v6956_v62 = vsel %vm10332_vm4, %v1682_v45, %v6342_v57  ;;  %v6967_v23 = vadd.s32 %v1566_v29, %v1253_v26  ;;  %vm10340_vm6 = vmmov %vm10338_vm5  ;;  %v6974_v57 = vld [vmem:[%s3072_s0 + $0x80] sm:$0xff]  ;;  %v6978_v45 = vld [vmem:[%s3072_s0 + $0x88] sm:$0xff]  ;;  %v1721_v26 = vpop.permute.xlu1 %1720 }
 0x2fe   : > { %10333 = vst [vmem:[#allocation47_spill] sm:$0xff] %v6956_v62  ;;  %v1365_v36 = vsel %vm10340_vm6, %v10336_v6, %v10337_v11  ;;  %vm1433_vm8 = vcmp.eq.f32.partialorder %v1349_v50, %v6974_v57  ;;  %vm1399_vm0 = vcmp.gt.f32.partialorder %v1349_v50, %v6974_v57  ;;  %vm10343_vm5 = vmmov %vm10332_vm4  ;;  %v10344_v11 = vld [vmem:[#allocation16_spill] sm:$0xff] }
 0x2ff   : > { %10335 = vst [vmem:[#allocation115_spill] sm:$0xff] %v6961_v53  ;;  %vm1434_vm2 = vcmp.eq.f32.partialorder %v1365_v36, %v6978_v45  ;;  %vm1471_vm14 = vmand %vm10323_vm15, %vm1433_vm8  ;;  %vm1400_vm7 = vcmp.gt.f32.partialorder %v1365_v36, %v6978_v45 }
 0x300   : > { %10339 = vst [vmem:[#allocation116_spill] sm:$0xff] %v6967_v23  ;;  %vm1472_vm11 = vmand %vm10325_vm12, %vm1434_vm2  ;;  %vm1728_vm12 = vcmp.gt.f32.partialorder %v10347_v35, %v7007_v38 }
 0x301   : > { %10341 = vst [vmem:[#allocation36_spill] sm:$0xff] %v6974_v57  ;;  %v1719_v12 = vpop.permute.xlu0 %1718  ;;  %vm1503_vm13 = vmor %vm1399_vm0, %vm1471_vm14  ;;  %vm1762_vm0 = vcmp.eq.f32.partialorder %v10347_v35, %v7007_v38 }
 0x302   : > { %10342 = vst [vmem:[#allocation138_spill] sm:$0xff] %v6978_v45  ;;  %v1722_v29 = vsel %vm10332_vm4, %v1719_v12, %v1721_v26  ;;  %v1723_v6 = vsel %vm10343_vm5, %v1721_v26, %v1719_v12  ;;  %vm1504_vm6 = vmor %vm1400_vm7, %vm1472_vm11  ;;  %vm1768_vm4 = vcmp.eq.f32.partialorder %v10357_v3, %v7038_v48 }
 0x303   : > { %vm1760_vm8 = vcmp.lt.s32.totalorder %v1722_v29, %v3228_v31  ;;  %vm1761_vm3 = vcmp.lt.s32.totalorder %v1723_v6, %v10344_v11  ;;  %vm1541_vm2 = vmand %vm10328_vm9, %vm1503_vm13  ;;  %v1724_v1 = vshra.s32 %v1722_v29, 2  ;;  %vm1781_vm9 = vcmp.eq.f32.partialorder %v6340_v55, %v10170_v27 }
 0x304   : > { %v1794_v36 = vsel %vm1760_vm8, 1, %v9243_v41  ;;  %v1795_v50 = vsel %vm1761_vm3, 1, %v9243_v41  ;;  %vm1542_vm14 = vmand %vm10329_vm10, %vm1504_vm6  ;;  %v1573_v34 = vsel %vm1541_vm2, 1, %v9243_v41  ;;  %vm1769_vm6 = vcmp.eq.f32.partialorder %v10360_v5, %v7051_v16 }
 0x305   : > { %v1796_v62 = vperm.slane %v1794_v36, 0  ;;  %v1797_v26 = vperm.slane %v1795_v50, 0  ;;  %v1574_v12 = vsel %vm1542_vm14, 1, %v9243_v41  ;;  %v7004_v30 = vadd.s32 %v1573_v34, %v10345_v42  ;;  %v7020_v50 = vld [vmem:[%s3072_s0 + $0x8] sm:$0xff]  ;;  %v10352_v42 = vld [vmem:[#allocation30_spill] sm:$0xff]  ;;  %v7032_v43 = vpop.permute.xlu1 %1970 }
 0x306   : > { %v10350_v36 = vmov 0  ;;  %vm1763_vm7 = vcmp.eq.f32.partialorder %v10352_v42, %v7020_v50  ;;  %v1725_v34 = vshra.s32 %v1723_v6, 2  ;;  %vm1726_vm14 = vcmp.eq.s32.totalorder %v1724_v1, %v10364_v44  ;;  %v7086_v1 = vld [vmem:[%s3072_s0 + $0x90] sm:$0xff] }
 0x307   : > { %10346 = vst [vmem:[#allocation44_spill] sm:$0xff] %v7004_v30  ;;  %vm7011_vm3 = vcmp.eq.s32.totalorder %v1796_v62, 1  ;;  %vm7015_vm11 = vcmp.eq.s32.totalorder %v1797_v26, 1  ;;  %v7030_v62 = vpop.permute.xlu2 %1990  ;;  %v10355_v26 = vld [vmem:[#allocation78_spill] sm:$0xff]  ;;  %v1864_v45 = vsel %vm1726_vm14, 1, %v9243_v41  ;;  %vm1729_vm15 = vcmp.gt.f32.partialorder %v10352_v42, %v7020_v50  ;;  %v10401_v30 = vld [vmem:[#allocation21_spill] sm:$0xff] }
 0x308   : > { %v10349_v24 = vsel %vm7011_vm3, 4294967295, %v10348_v24  ;;  %v10351_v36 = vsel %vm7015_vm11, 4294967295, %v10350_v36  ;;  %vm7026_vm13 = vmand %vm7011_vm3, %vm1762_vm0  ;;  %v7035_v33 = vadd.s32 %v1574_v12, %v10355_v26  ;;  %v7062_v26 = vld [vmem:[%s3072_s0 + $0x60] sm:$0xff]  ;;  %v1866_v42 = vperm.slane %v1864_v45, 0  ;;  %v10402_v45 = vld [vmem:[#allocation32_spill] sm:$0xff] }
 0x309   : > { %vm7044_vm5 = vmand %vm7015_vm11, %vm1763_vm7  ;;  %v7048_v10 = vpop.permute.xlu0 %1968  ;;  %vm1774_vm2 = vcmp.eq.f32.partialorder %v10363_v0, %v7062_v26  ;;  %vm1775_vm7 = vcmp.eq.f32.partialorder %v10367_v9, %v7074_v47 }
 0x30a   : > { %10356 = vst [vmem:[#allocation65_spill] sm:$0xff] %v7035_v33  ;;  %vm7057_vm8 = vmand %vm7011_vm3, %vm1768_vm4  ;;  %v10368_v33 = vld [vmem:[#allocation97_spill] sm:$0xff] }
 0x30b   : > { %vm7069_vm0 = vmand %vm7015_vm11, %vm1769_vm6  ;;  %vm1727_vm4 = vcmp.eq.s32.totalorder %v1725_v34, %v10368_v33  ;;  %vm1780_vm6 = vcmp.eq.f32.partialorder %v6335_v28, %v7086_v1  ;;  %v10403_v34 = vld [vmem:[#allocation74_spill] sm:$0xff] }
 0x30c   : > { %vm7081_vm1 = vmand %vm7011_vm3, %vm1774_vm2  ;;  %v1865_v57 = vsel %vm1727_vm4, 1, %v9243_v41  ;;  %vm1740_vm4 = vcmp.gt.f32.partialorder %v10363_v0, %v7062_v26 }
 0x30d   : > { %vm7092_vm10 = vmand %vm7015_vm11, %vm1775_vm7  ;;  %v7124_v35 = vpop.permute.xlu1 %1976  ;;  %v1867_v63 = vperm.slane %v1865_v57, 0 }
 0x30e   : > { %vm7100_vm2 = vmand %vm7011_vm3, %vm1780_vm6 }
 0x30f   : > { %vm7109_vm7 = vmand %vm7015_vm11, %vm1781_vm9  ;;  %v7122_v53 = vpop.permute.xlu2 %1996  ;;  %vm1734_vm9 = vcmp.gt.f32.partialorder %v10357_v3, %v7038_v48  ;;  %v10404_v3 = vld [vmem:[#allocation39_spill] sm:$0xff] }
 0x310   : > { %vm7118_vm6 = vmor %vm1728_vm12, %vm7026_vm13  ;;  %vm1735_vm12 = vcmp.gt.f32.partialorder %v10360_v5, %v7051_v16 }
 0x311   : > { %vm7130_vm14 = vmor %vm1729_vm15, %vm7044_vm5  ;;  %v7134_v22 = vpop.permute.xlu0 %1974  ;;  %vm1741_vm5 = vcmp.gt.f32.partialorder %v10367_v9, %v7074_v47  ;;  %v10406_v9 = vld [vmem:[#allocation145_spill] sm:$0xff] }
 0x312   : > { %10381 = vst [vmem:[#allocation17_spill] sm:$0xff] %v7134_v22  ;;  %vm7140_vm13 = vmor %vm1734_vm9, %vm7057_vm8  ;;  %vm1746_vm8 = vcmp.gt.f32.partialorder %v6335_v28, %v7086_v1  ;;  %v10394_v28 = vmov 0  ;;  %v10423_v22 = vmov 0 }
 0x313   : > { %vm7148_vm15 = vmor %vm1735_vm12, %vm7069_vm0  ;;  %vm7168_vm0 = vcmp.eq.s32.totalorder %v1866_v42, 1  ;;  %vm1747_vm12 = vcmp.gt.f32.partialorder %v6340_v55, %v10170_v27 }
 0x314   : > { %vm7156_vm11 = vmor %vm1740_vm4, %vm7081_vm1  ;;  %v10391_v7 = vsel %vm7168_vm0, 4294967295, %v10390_v7  ;;  %vm7180_vm4 = vcmp.eq.s32.totalorder %v1867_v63, 1 }
 0x315   : > { %vm7164_vm9 = vmor %vm1741_vm5, %vm7092_vm10  ;;  %v10395_v28 = vsel %vm7180_vm4, 4294967295, %v10394_v28  ;;  %v7194_v55 = vpop.permute.xlu1 %1982 }
 0x316   : > { %vm7176_vm1 = vmor %vm1746_vm8, %vm7100_vm2  ;;  %10396 = vst [vmem:[#allocation129_spill] sm:$0xff] %v10395_v28 }
 0x317   : > { %vm7186_vm10 = vmor %vm1747_vm12, %vm7109_vm7  ;;  %10399 = vst [vmem:[#allocation90_spill] sm:$0xff] %v7194_v55  ;;  %v7211_v57 = vpop.permute.xlu2 %1998 }
 0x318   : > { %vm1870_vm5 = vmand %vm7168_vm0, %vm7118_vm6 }
 0x319   : > { %vm1871_vm2 = vmand %vm7180_vm4, %vm7130_vm14  ;;  %v1902_v27 = vsel %vm1870_vm5, 1, %v9243_v41  ;;  %v7201_v63 = vpop.permute.xlu0 %1980 }
 0x31a   : > { %10400 = vst [vmem:[#allocation139_spill] sm:$0xff] %v7201_v63  ;;  %vm1876_vm7 = vmand %vm7168_vm0, %vm7140_vm13  ;;  %v1903_v54 = vsel %vm1871_vm2, 1, %v9243_v41  ;;  %v7209_v23 = vadd.s32 %v1902_v27, %v10401_v30  ;;  %vm1753_vm2 = vcmp.gt.f32.partialorder %v6542_v60, %v6091_v40 }
 0x31b   : > { %vm1877_vm6 = vmand %vm7180_vm4, %vm7148_vm15  ;;  %v1908_v19 = vsel %vm1876_vm7, 1, %v9243_v41  ;;  %v7219_v6 = vadd.s32 %v1903_v54, %v10402_v45  ;;  %v10405_v54 = vld [vmem:[#allocation89_spill] sm:$0xff] }
 0x31c   : > { %vm1882_vm14 = vmand %vm7168_vm0, %vm7156_vm11  ;;  %v1909_v12 = vsel %vm1877_vm6, 1, %v9243_v41  ;;  %v7227_v42 = vadd.s32 %v1908_v19, %v10403_v34  ;;  %v7246_v19 = vld [vmem:[%s3072_s0 + $0xc0] sm:$0xff]  ;;  %v10407_v34 = vld [vmem:[#allocation128_spill] sm:$0xff] }
 0x31d   : > { %vm1883_vm13 = vmand %vm7180_vm4, %vm7164_vm9  ;;  %v1914_v29 = vsel %vm1882_vm14, 1, %v9243_v41  ;;  %v7235_v27 = vadd.s32 %v1909_v12, %v10404_v3  ;;  %vm1786_vm15 = vcmp.eq.f32.partialorder %v6537_v59, %v7246_v19  ;;  %vm1787_vm9 = vcmp.eq.f32.partialorder %v6542_v60, %v6091_v40  ;;  %v7264_v3 = vpop.permute.xlu1 %1988 }
 0x31e   : > { %vm1888_vm11 = vmand %vm7168_vm0, %vm7176_vm1  ;;  %v1915_v5 = vsel %vm1883_vm13, 1, %v9243_v41  ;;  %v7243_v30 = vadd.s32 %v1914_v29, %v10405_v54  ;;  %10408 = vst [vmem:[#allocation54_spill] sm:$0xff] %v7264_v3  ;;  %vm1752_vm1 = vcmp.gt.f32.partialorder %v6537_v59, %v7246_v19 }
 0x31f   : > { %vm1889_vm8 = vmand %vm7180_vm4, %vm7186_vm10  ;;  %v1920_v0 = vsel %vm1888_vm11, 1, %v9243_v41  ;;  %v7256_v45 = vadd.s32 %v1915_v5, %v10406_v9  ;;  %vm10411_vm10 = vnez %v10351_v36  ;;  %v7284_v9 = vld [vmem:[%s3072_s0 + $0x20] sm:$0xff] }
 0x320   : > { %v1921_v12 = vsel %vm1889_vm8, 1, %v9243_v41  ;;  %v7262_v29 = vadd.s32 %v1920_v0, %v10407_v34  ;;  %vm1824_vm12 = vmand %vm7011_vm3, %vm1786_vm15  ;;  %v7279_v0 = vpop.permute.xlu2 %2004  ;;  %vm1766_vm13 = vcmp.eq.f32.partialorder %v6547_v4, %v7284_v9 }
 0x321   : > { %v7271_v5 = vadd.s32 %v1921_v12, %v10409_v18  ;;  %v7273_v54 = vpop.permute.xlu0 %1986  ;;  %vm1825_vm5 = vmand %vm10411_vm10, %vm1787_vm9  ;;  %v7292_v12 = vld [vmem:[%s3072_s0 + $0x28] sm:$0xff]  ;;  %vm1732_vm9 = vcmp.gt.f32.partialorder %v6547_v4, %v7284_v9 }
 0x322   : > { %10410 = vst [vmem:[#allocation25_spill] sm:$0xff] %v7273_v54  ;;  %vm1856_vm7 = vmor %vm1752_vm1, %vm1824_vm12  ;;  %vm1767_vm15 = vcmp.eq.f32.partialorder %v6552_v13, %v7292_v12  ;;  %vm1733_vm1 = vcmp.gt.f32.partialorder %v6552_v13, %v7292_v12  ;;  %v10412_v18 = vld [vmem:[#allocation19_spill] sm:$0xff]  ;;  %v7326_v13 = vld [vmem:[%s3072_s0 + $0x10] sm:$0xff] }
 0x323   : > { %vm1857_vm6 = vmor %vm1753_vm2, %vm1825_vm5  ;;  %vm10413_vm5 = vcmp.lt.s32.totalorder %v3228_v31, 126 }
 0x324   : > { %vm1894_vm14 = vmand %vm7168_vm0, %vm1856_vm7 }
 0x325   : > { %vm1895_vm11 = vmand %vm7180_vm4, %vm1857_vm6  ;;  %v1926_v59 = vsel %vm1894_vm14, 1, %v9243_v41 }
 0x326   : > { %v1927_v40 = vsel %vm1895_vm11, 1, %v9243_v41  ;;  %v7298_v60 = vadd.s32 %v1926_v59, %v6281_v58  ;;  %vm1804_vm8 = vmand %vm7011_vm3, %vm1766_vm13  ;;  %v1687_v58 = vsel %vm10413_vm5, %v10412_v18, %v6554_v46  ;;  %v7315_v59 = vpop.permute.xlu1 %1994 }
 0x327   : > { %v7305_v34 = vadd.s32 %v1927_v40, %v6295_v37  ;;  %vm1805_vm12 = vmand %vm10411_vm10, %vm1767_vm15  ;;  %10414 = vst [vmem:[#allocation77_spill] sm:$0xff] %v7315_v59  ;;  %vm1764_vm13 = vcmp.eq.f32.partialorder %v1687_v58, %v7326_v13  ;;  %v7333_v59 = vld [vmem:[%s3072_s0 + $0x18] sm:$0xff] }
 0x328   : > { %vm1836_vm2 = vmor %vm1732_vm9, %vm1804_vm8  ;;  %vm1730_vm9 = vcmp.gt.f32.partialorder %v1687_v58, %v7326_v13  ;;  %v2011_v54 = vpop.permute.xlu2 %2010 }
 0x329   : > { %vm10415_vm7 = vmmov %vm10413_vm5  ;;  %v7321_v4 = vpop.permute.xlu0 %1992 }
 0x32a   : > { %v1703_v37 = vsel %vm10415_vm7, %v6554_v46, %v10412_v18  ;;  %10416 = vst [vmem:[#allocation38_spill] sm:$0xff] %v7321_v4  ;;  %vm1837_vm6 = vmor %vm1733_vm1, %vm1805_vm12 }
 0x32b   : > { %vm1874_vm14 = vmand %vm7168_vm0, %vm1836_vm2  ;;  %vm1765_vm15 = vcmp.eq.f32.partialorder %v1703_v37, %v7333_v59  ;;  %vm1731_vm1 = vcmp.gt.f32.partialorder %v1703_v37, %v7333_v59 }
 0x32c   : > { %vm1875_vm11 = vmand %vm7180_vm4, %vm1837_vm6  ;;  %v1906_v40 = vsel %vm1874_vm14, 1, %v9243_v41  ;;  %vm9095_vm14 = vcmp.lt.s32.totalorder %v3228_v31, 127 }
 0x32d   : > { %v1907_v46 = vsel %vm1875_vm11, 1, %v9243_v41  ;;  %v7338_v18 = vadd.s32 %v1906_v40, %v6407_v39  ;;  %vm1802_vm8 = vmand %vm7011_vm3, %vm1764_vm13  ;;  %v7356_v40 = vld [vmem:[%s3072_s0 + $0xf0] sm:$0xff]  ;;  %v2047_v55 = vsel %vm9095_vm14, %v7211_v57, %v6806_v56 }
 0x32e   : > { %v7344_v4 = vadd.s32 %v1907_v46, %v6449_v14  ;;  %vm1803_vm12 = vmand %vm10411_vm10, %vm1765_vm15  ;;  %v2066_v39 = vpop.permute.xlu1 %2065  ;;  %vm1792_vm6 = vcmp.eq.f32.partialorder %v6702_v51, %v7356_v40  ;;  %vm1758_vm11 = vcmp.gt.f32.partialorder %v6702_v51, %v7356_v40  ;;  %vm1759_vm15 = vcmp.gt.f32.partialorder %v6707_v21, %v6561_v17 }
 0x32f   : > { %vm1834_vm5 = vmor %vm1730_vm9, %vm1802_vm8  ;;  %vm1793_vm8 = vcmp.eq.f32.partialorder %v6707_v21, %v6561_v17  ;;  %v2031_v51 = vsel %vm9095_vm14, %v6806_v56, %v7211_v57 }
 0x330   : > { %vm7349_vm2 = vmor %vm1731_vm1, %vm1803_vm12 }
 0x331   : > { %vm1872_vm7 = vmand %vm7168_vm0, %vm1834_vm5  ;;  %v2064_v14 = vpop.permute.xlu0 %2063 }
 0x332   : > { %vm1873_vm13 = vmand %vm7180_vm4, %vm7349_vm2  ;;  %v1904_v58 = vsel %vm1872_vm7, 1, %v9243_v41  ;;  %v2067_v3 = vsel %vm9095_vm14, %v2064_v14, %v2066_v39  ;;  %v2068_v37 = vsel %vm9095_vm14, %v2066_v39, %v2064_v14 }
 0x333   : > { %vm1830_vm9 = vmand %vm7011_vm3, %vm1792_vm6  ;;  %v1905_v46 = vsel %vm1873_vm13, 1, %v9243_v41  ;;  %v7380_v63 = vadd.s32 %v1904_v58, %v6622_v25  ;;  %vm2105_vm1 = vcmp.lt.s32.totalorder %v2067_v3, %v3228_v31  ;;  %vm2106_vm5 = vcmp.lt.s32.totalorder %v2068_v37, %v10344_v11 }
 0x334   : > { %vm1831_vm12 = vmand %vm10411_vm10, %vm1793_vm8  ;;  %v2139_v25 = vsel %vm2105_vm1, 1, %v9243_v41  ;;  %v2140_v39 = vsel %vm2106_vm5, 1, %v9243_v41  ;;  %v7397_v14 = vadd.s32 %v1905_v46, %v6624_v49  ;;  %vm2107_vm13 = vcmp.eq.f32.partialorder %v2031_v51, %v7007_v38  ;;  %v2017_v46 = vpop.permute.xlu2 %2016 }
 0x335   : > { %vm1862_vm2 = vmor %vm1758_vm11, %vm1830_vm9  ;;  %v2141_v56 = vperm.slane %v2139_v25, 0  ;;  %v2142_v57 = vperm.slane %v2140_v39, 0  ;;  %vm2108_vm11 = vcmp.eq.f32.partialorder %v2047_v55, %v7020_v50  ;;  %v2034_v49 = vsel %vm9095_vm14, %v6887_v32, %v7279_v0 }
 0x336   : > { %vm7402_vm7 = vmor %vm1759_vm15, %vm1831_vm12  ;;  %v2050_v11 = vsel %vm9095_vm14, %v7279_v0, %v6887_v32  ;;  %v2069_v25 = vshra.s32 %v2067_v3, 2  ;;  %v10421_v39 = vmov 0  ;;  %v2037_v58 = vsel %vm9095_vm14, %v6943_v2, %v2011_v54  ;;  %v10427_v0 = vld [vmem:[#allocation61_spill] sm:$0xff] }
 0x337   : > { %vm1900_vm6 = vmand %vm7168_vm0, %vm1862_vm2  ;;  %vm7423_vm8 = vcmp.eq.s32.totalorder %v2141_v56, 1  ;;  %vm7427_vm9 = vcmp.eq.s32.totalorder %v2142_v57, 1  ;;  %v2070_v52 = vshra.s32 %v2068_v37, 2  ;;  %vm2113_vm1 = vcmp.eq.f32.partialorder %v2034_v49, %v7038_v48  ;;  %v2003_v37 = vpop.permute.xlu1 %2002 }
 0x338   : > { %vm1901_vm15 = vmand %vm7180_vm4, %vm7402_vm7  ;;  %v1932_v21 = vsel %vm1900_vm6, 1, %v9243_v41  ;;  %v10422_v39 = vsel %vm7423_vm8, 4294967295, %v10421_v39  ;;  %v10424_v22 = vsel %vm7427_vm9, 4294967295, %v10423_v22  ;;  %v2053_v56 = vsel %vm9095_vm14, %v2011_v54, %v6943_v2 }
 0x339   : > { %vm7436_vm12 = vmand %vm7423_vm8, %vm2107_vm13  ;;  %v1933_v32 = vsel %vm1901_vm15, 1, %v9243_v41  ;;  %v7442_v3 = vadd.s32 %v1932_v21, %v10427_v0  ;;  %vm2114_vm2 = vcmp.eq.f32.partialorder %v2050_v11, %v7051_v16  ;;  %v2040_v57 = vsel %vm9095_vm14, %v6984_v15, %v2017_v46  ;;  %v2343_v21 = vld [vmem:[%s3065_s27] sm:$0xff]  ;;  %v2749_v0 = vld [vmem:[%s3072_s0 + $0xc8] sm:$0xff] }
 0x33a   : > { %vm7452_vm5 = vmand %vm7427_vm9, %vm2108_vm11  ;;  %v7467_v2 = vadd.s32 %v1933_v32, %v6766_v8  ;;  %vm2119_vm6 = vcmp.eq.f32.partialorder %v2037_v58, %v7062_v26  ;;  %v2056_v54 = vsel %vm9095_vm14, %v2017_v46, %v6984_v15  ;;  %vm2071_vm13 = vcmp.eq.s32.totalorder %v2069_v25, %v10364_v44  ;;  %v2748_v15 = vld [vmem:[%s3072_s0 + $0x98] sm:$0xff]  ;;  %v2344_v8 = vld [vmem:[%s3065_s27 + $0x8] sm:$0xff] }
 0x33b   : > { %vm7462_vm7 = vmand %vm7423_vm8, %vm2113_vm1  ;;  %vm2120_vm15 = vcmp.eq.f32.partialorder %v2053_v56, %v7074_v47  ;;  %vm2072_vm1 = vcmp.eq.s32.totalorder %v2070_v52, %v10368_v33  ;;  %vm2125_vm14 = vcmp.eq.f32.partialorder %v2040_v57, %v7086_v1  ;;  %v2209_v52 = vsel %vm2071_vm13, 1, %v9243_v41  ;;  %v2349_v33 = vld [vmem:[%s3065_s27 + $0x30] sm:$0xff] }
 0x33c   : > { %vm7476_vm11 = vmand %vm7427_vm9, %vm2114_vm2  ;;  %vm2126_vm2 = vcmp.eq.f32.partialorder %v2056_v54, %v2748_v15  ;;  %v2210_v25 = vsel %vm2072_vm1, 1, %v9243_v41  ;;  %vm2079_vm13 = vcmp.gt.f32.partialorder %v2034_v49, %v7038_v48  ;;  %v10454_v49 = vmov 0  ;;  %v2356_v48 = vld [vmem:[%s3065_s27 + $0x68] sm:$0xff] }
 0x33d   : > { %vm7484_vm4 = vmand %vm7423_vm8, %vm2119_vm6  ;;  %vm2073_vm6 = vcmp.gt.f32.partialorder %v2031_v51, %v7007_v38  ;;  %v2211_v51 = vperm.slane %v2209_v52, 0  ;;  %v2212_v28 = vperm.slane %v2210_v25, 0  ;;  %v2350_v25 = vld [vmem:[%s3065_s27 + $0x38] sm:$0xff] }
 0x33e   : > { %vm7491_vm0 = vmand %vm7427_vm9, %vm2120_vm15  ;;  %vm2074_vm15 = vcmp.gt.f32.partialorder %v2047_v55, %v7020_v50  ;;  %v2023_v55 = vpop.permute.xlu2 %2022 }
 0x33f   : > { %vm7498_vm10 = vmand %vm7423_vm8, %vm2125_vm14 }
 0x340   : > { %vm7506_vm3 = vmand %vm7427_vm9, %vm2126_vm2  ;;  %vm2080_vm2 = vcmp.gt.f32.partialorder %v2050_v11, %v7051_v16 }
 0x341   : > { %vm7514_vm14 = vmor %vm2073_vm6, %vm7436_vm12  ;;  %vm2085_vm12 = vcmp.gt.f32.partialorder %v2037_v58, %v7062_v26  ;;  %v2361_v26 = vld [vmem:[%s3065_s27 + $0x90] sm:$0xff]  ;;  %v2362_v58 = vld [vmem:[%s3065_s27 + $0x98] sm:$0xff] }
 0x342   : > { %vm7521_vm8 = vmor %vm2074_vm15, %vm7452_vm5  ;;  %vm2086_vm5 = vcmp.gt.f32.partialorder %v2053_v56, %v7074_v47 }
 0x343   : > { %vm7528_vm1 = vmor %vm2079_vm13, %vm7462_vm7  ;;  %vm2091_vm7 = vcmp.gt.f32.partialorder %v2040_v57, %v7086_v1  ;;  %v10458_v1 = vmov 0 }
 0x344   : > { %vm7535_vm6 = vmor %vm2080_vm2, %vm7476_vm11  ;;  %vm7553_vm11 = vcmp.eq.s32.totalorder %v2211_v51, 1  ;;  %vm2092_vm2 = vcmp.gt.f32.partialorder %v2056_v54, %v2748_v15  ;;  %v2355_v51 = vld [vmem:[%s3065_s27 + $0x60] sm:$0xff] }
 0x345   : > { %vm7542_vm15 = vmor %vm2085_vm12, %vm7484_vm4  ;;  %v10455_v49 = vsel %vm7553_vm11, 4294967295, %v10454_v49  ;;  %vm7563_vm12 = vcmp.eq.s32.totalorder %v2212_v28, 1 }
 0x346   : > { %vm7549_vm13 = vmor %vm2086_vm5, %vm7491_vm0  ;;  %v10459_v1 = vsel %vm7563_vm12, 4294967295, %v10458_v1  ;;  %vm10460_vm0 = vcmp.lt.s32.totalorder %v3228_v31, 127 }
 0x347   : > { %vm7559_vm4 = vmor %vm2091_vm7, %vm7498_vm10  ;;  %v2043_v11 = vsel %vm10460_vm0, %v7030_v62, %v2023_v55 }
 0x348   : > { %vm7572_vm5 = vmor %vm2092_vm2, %vm7506_vm3  ;;  %vm2097_vm3 = vcmp.gt.f32.partialorder %v2043_v11, %v7246_v19 }
 0x349   : > { %vm10463_vm10 = vmmov %vm10460_vm0 }
 0x34a   : > { %v7579_v56 = vsel %vm10463_vm10, %v2023_v55, %v7030_v62  ;;  %vm2215_vm7 = vmand %vm7553_vm11, %vm7514_vm14  ;;  %vm2131_vm14 = vcmp.eq.f32.partialorder %v2043_v11, %v7246_v19  ;;  %v2001_v19 = vpop.permute.xlu0 %2000 }
 0x34b   : > { %vm2216_vm0 = vmand %vm7563_vm12, %vm7521_vm8  ;;  %v2247_v57 = vsel %vm2215_vm7, 1, %v9243_v41  ;;  %vm2098_vm8 = vcmp.gt.f32.partialorder %v7579_v56, %v2749_v0  ;;  %vm10464_vm7 = vcmp.lt.s32.totalorder %v3228_v31, 127 }
 0x34c   : > { %vm2221_vm2 = vmand %vm7553_vm11, %vm7528_vm1  ;;  %v2248_v62 = vsel %vm2216_vm0, 1, %v9243_v41  ;;  %v2279_v54 = vadd.s32 %v2247_v57, %v7209_v23  ;;  %vm2132_vm1 = vcmp.eq.f32.partialorder %v7579_v56, %v2749_v0  ;;  %v7612_v23 = vsel %vm10464_vm7, %v7032_v43, %v2003_v37  ;;  %v2367_v0 = vld [vmem:[%s3065_s27 + $0xc0] sm:$0xff] }
 0x34d   : > { %vm2222_vm10 = vmand %vm7563_vm12, %vm7535_vm6  ;;  %v2253_v44 = vsel %vm2221_vm2, 1, %v9243_v41  ;;  %v2280_v15 = vadd.s32 %v2248_v62, %v7219_v6 }
 0x34e   : > { %vm2227_vm0 = vmand %vm7553_vm11, %vm7542_vm15  ;;  %v2254_v52 = vsel %vm2222_vm10, 1, %v9243_v41  ;;  %v2285_v46 = vadd.s32 %v2253_v44, %v7227_v42  ;;  %vm2311_vm6 = vcmp.lt.s32.totalorder %v2279_v54, 2 }
 0x34f   : > { %vm10465_vm2 = vmmov %vm10464_vm7  ;;  %v2259_v32 = vsel %vm2227_vm0, 1, %v9243_v41  ;;  %v2286_v38 = vadd.s32 %v2254_v52, %v7235_v27  ;;  %vm2312_vm15 = vcmp.lt.s32.totalorder %v2280_v15, 2  ;;  %v2375_v42 = vsel %vm2311_vm6, %v2343_v21, 0.0 }
 0x350   : > { %v7624_v6 = vsel %vm10465_vm2, %v2003_v37, %v7032_v43  ;;  %vm2228_vm7 = vmand %vm7563_vm12, %vm7549_vm13  ;;  %v2291_v50 = vadd.s32 %v2259_v32, %v7243_v30  ;;  %vm2317_vm2 = vcmp.lt.s32.totalorder %v2285_v46, 2  ;;  %v2376_v28 = vsel %vm2312_vm15, %v2344_v8, 0.0  ;;  %v2368_v46 = vld [vmem:[%s3065_s27 + $0xc8] sm:$0xff] }
 0x351   : > { %vm2233_vm10 = vmand %vm7553_vm11, %vm7559_vm4  ;;  %v2260_v43 = vsel %vm2228_vm7, 1, %v9243_v41  ;;  %vm2318_vm0 = vcmp.lt.s32.totalorder %v2286_v38, 2  ;;  %v2381_v16 = vsel %vm2317_vm2, %v2349_v33, 0.0  ;;  %vm10466_vm6 = vnez %v10422_v39 }
 0x352   : > { %vm2234_vm13 = vmand %vm7563_vm12, %vm7572_vm5  ;;  %v2265_v27 = vsel %vm2233_vm10, 1, %v9243_v41  ;;  %v2292_v55 = vadd.s32 %v2260_v43, %v7256_v45  ;;  %vm2323_vm4 = vcmp.lt.s32.totalorder %v2291_v50, 2  ;;  %v2382_v30 = vsel %vm2318_vm0, %v2350_v25, 0.0  ;;  %v2348_v43 = vld [vmem:[%s3065_s27 + $0x28] sm:$0xff] }
 0x353   : > { %v2266_v47 = vsel %vm2234_vm13, 1, %v9243_v41  ;;  %v2297_v37 = vadd.s32 %v2265_v27, %v7262_v29  ;;  %vm2169_vm7 = vmand %vm10466_vm6, %vm2131_vm14  ;;  %v2387_v45 = vsel %vm2323_vm4, %v2355_v51, 0.0  ;;  %v2407_v21 = vpack.c.bf16 %v2376_v28, %v2375_v42  ;;  %v7731_v51 = vld [vmem:[%s3072_s0 + $0x50] sm:$0xff] }
 0x354   : > { %v2298_v57 = vadd.s32 %v2266_v47, %v7271_v5  ;;  %vm2324_vm5 = vcmp.lt.s32.totalorder %v2292_v55, 2  ;;  %vm2170_vm15 = vmand %vm7427_vm9, %vm2132_vm1  ;;  %v2410_v62 = vpack.c.bf16 %v2382_v30, %v2381_v16  ;;  %vm2112_vm0 = vcmp.eq.f32.partialorder %v7624_v6, %v7292_v12  ;;  %v2345_v27 = vld [vmem:[%s3065_s27 + $0x10] sm:$0xff]  ;;  %v2346_v16 = vld [vmem:[%s3065_s27 + $0x18] sm:$0xff] }
 0x355   : > { %vm2329_vm10 = vcmp.lt.s32.totalorder %v2297_v37, 2  ;;  %v2388_v29 = vsel %vm2324_vm5, %v2356_v48, 0.0  ;;  %vm7663_vm2 = vmor %vm2097_vm3, %vm2169_vm7  ;;  %2423 = vst [vmem:[%s7669_s5] sm:$0xff] %v2407_v21  ;;  %vm2111_vm3 = vcmp.eq.f32.partialorder %v7612_v23, %v7284_v9  ;;  %vm2077_vm4 = vcmp.gt.f32.partialorder %v7612_v23, %v7284_v9 }
 0x356   : > { %vm2330_vm14 = vcmp.lt.s32.totalorder %v2298_v57, 2  ;;  %v2393_v8 = vsel %vm2329_vm10, %v2361_v26, 0.0  ;;  %v2413_v5 = vpack.c.bf16 %v2388_v29, %v2387_v45  ;;  %vm2202_vm1 = vmor %vm2098_vm8, %vm2170_vm15  ;;  %2426 = vst [vmem:[%s7669_s5 + $0x18] sm:$0xff] %v2410_v62  ;;  %vm2078_vm7 = vcmp.gt.f32.partialorder %v7624_v6, %v7292_v12  ;;  %v2347_v6 = vld [vmem:[%s3065_s27 + $0x20] sm:$0xff]  ;;  %v2374_v29 = vld [vmem:[%s3065_s27 + $0xf8] sm:$0xff] }
 0x357   : > { %v2394_v11 = vsel %vm2330_vm14, %v2362_v58, 0.0  ;;  %vm2239_vm13 = vmand %vm7553_vm11, %vm7663_vm2  ;;  %vm10469_vm15 = vcmp.lt.s32.totalorder %v3228_v31, 127  ;;  %v2373_v58 = vld [vmem:[%s3065_s27 + $0xf0] sm:$0xff] }
 0x358   : > { %v2416_v44 = vpack.c.bf16 %v2394_v11, %v2393_v8  ;;  %2429 = vst [vmem:[%s7669_s5 + $0x30] sm:$0xff] %v2413_v5  ;;  %vm2240_vm8 = vmand %vm7563_vm12, %vm2202_vm1  ;;  %v2271_v56 = vsel %vm2239_vm13, 1, %v9243_v41  ;;  %v2032_v52 = vsel %vm10469_vm15, %v7048_v10, %v2001_v19  ;;  %v10483_v8 = vld [vmem:[#allocation27_spill] sm:$0xff] }
 0x359   : > { %v2272_v15 = vsel %vm2240_vm8, 1, %v9243_v41  ;;  %v2303_v33 = vadd.s32 %v2271_v56, %v7298_v60  ;;  %vm2149_vm5 = vmand %vm10466_vm6, %vm2111_vm3  ;;  %vm2109_vm8 = vcmp.eq.f32.partialorder %v2032_v52, %v7326_v13  ;;  %v10487_v56 = vld [vmem:[#allocation28_spill] sm:$0xff] }
 0x35a   : > { %2432 = vst [vmem:[%s7669_s5 + $0x48] sm:$0xff] %v2416_v44  ;;  %v2304_v25 = vadd.s32 %v2272_v15, %v7305_v34  ;;  %vm2150_vm10 = vmand %vm7427_vm9, %vm2112_vm0  ;;  %v2029_v34 = vpop.permute.xlu2 %2028  ;;  %v10486_v44 = vld [vmem:[#allocation140_spill] sm:$0xff] }
 0x35b   : > { %vm10470_vm2 = vmmov %vm10469_vm15  ;;  %vm2335_vm14 = vcmp.lt.s32.totalorder %v2303_v33, 2  ;;  %v2007_v33 = vpop.permute.xlu0 %2006 }
 0x35c   : > { %v2048_v9 = vsel %vm10470_vm2, %v2001_v19, %v7048_v10  ;;  %vm2181_vm1 = vmor %vm2077_vm4, %vm2149_vm5  ;;  %vm2336_vm3 = vcmp.lt.s32.totalorder %v2304_v25, 2  ;;  %v2399_v60 = vsel %vm2335_vm14, %v2367_v0, 0.0  ;;  %vm2075_vm4 = vcmp.gt.f32.partialorder %v2032_v52, %v7326_v13  ;;  %v10484_v19 = vld [vmem:[#allocation59_spill] sm:$0xff]  ;;  %v10491_v52 = vld [vmem:[#allocation141_spill] sm:$0xff] }
 0x35d   : > { %vm2182_vm13 = vmor %vm2078_vm7, %vm2150_vm10  ;;  %v2400_v23 = vsel %vm2336_vm3, %v2368_v46, 0.0  ;;  %vm2110_vm15 = vcmp.eq.f32.partialorder %v2048_v9, %v7333_v59  ;;  %vm2076_vm7 = vcmp.gt.f32.partialorder %v2048_v9, %v7333_v59  ;;  %vm10471_vm10 = vcmp.lt.s32.totalorder %v3228_v31, 127  ;;  %v2752_v25 = vld [vmem:[%s3072_s0 + $0x48] sm:$0xff]  ;;  %v2353_v9 = vld [vmem:[%s3065_s27 + $0x50] sm:$0xff] }
 0x35e   : > { %vm2219_vm0 = vmand %vm7553_vm11, %vm2181_vm1  ;;  %v2419_v12 = vpack.c.bf16 %v2400_v23, %v2399_v60  ;;  %v2046_v42 = vsel %vm10471_vm10, %v7122_v53, %v2029_v34  ;;  %vm1772_vm14 = vcmp.eq.f32.partialorder %v6712_v20, %v7731_v51  ;;  %v10494_v23 = vld [vmem:[#allocation17_spill] sm:$0xff] }
 0x35f   : > { %vm2220_vm2 = vmand %vm7563_vm12, %vm2182_vm13  ;;  %v2251_v10 = vsel %vm2219_vm0, 1, %v9243_v41  ;;  %vm10473_vm0 = vnez %v10349_v24 }
 0x360   : > { %v2252_v32 = vsel %vm2220_vm2, 1, %v9243_v41  ;;  %v2283_v38 = vadd.s32 %v2251_v10, %v7338_v18  ;;  %vm2147_vm5 = vmand %vm10466_vm6, %vm2109_vm8  ;;  %2435 = vst [vmem:[%s7669_s5 + $0x60] sm:$0xff] %v2419_v12  ;;  %v2354_v10 = vld [vmem:[%s3065_s27 + $0x58] sm:$0xff] }
 0x361   : > { %v2284_v50 = vadd.s32 %v2252_v32, %v7344_v4  ;;  %vm2148_vm1 = vmand %vm7427_vm9, %vm2110_vm15  ;;  %vm2137_vm9 = vcmp.eq.f32.partialorder %v2046_v42, %v7356_v40 }
 0x362   : > { %vm10472_vm3 = vmmov %vm10471_vm10  ;;  %vm2315_vm13 = vcmp.lt.s32.totalorder %v2283_v38, 2 }
 0x363   : > { %v2062_v18 = vsel %vm10472_vm3, %v2029_v34, %v7122_v53  ;;  %vm2179_vm8 = vmor %vm2075_vm4, %vm2147_vm5  ;;  %vm2316_vm10 = vcmp.lt.s32.totalorder %v2284_v50, 2  ;;  %v2379_v4 = vsel %vm2315_vm13, %v2347_v6, 0.0  ;;  %vm10476_vm13 = vnez %v10424_v22 }
 0x364   : > { %vm7749_vm2 = vmand %vm10473_vm0, %vm1772_vm14  ;;  %v2380_v53 = vsel %vm2316_vm10, %v2348_v43, 0.0  ;;  %vm2138_vm4 = vcmp.eq.f32.partialorder %v2062_v18, %v6561_v17  ;;  %vm2103_vm14 = vcmp.gt.f32.partialorder %v2046_v42, %v7356_v40  ;;  %v2009_v40 = vpop.permute.xlu1 %2008 }
 0x365   : > { %vm2180_vm15 = vmor %vm2076_vm7, %vm2148_vm1  ;;  %v2409_v13 = vpack.c.bf16 %v2380_v53, %v2379_v4  ;;  %vm2104_vm7 = vcmp.gt.f32.partialorder %v2062_v18, %v6561_v17  ;;  %v2751_v17 = vld [vmem:[%s3072_s0 + $0x58] sm:$0xff]  ;;  %v10498_v18 = vld [vmem:[#allocation115_spill] sm:$0xff] }
 0x366   : > { %vm2217_vm3 = vmand %vm7553_vm11, %vm2179_vm8  ;;  %vm1773_vm0 = vcmp.eq.f32.partialorder %v6717_v61, %v2751_v17  ;;  %v10500_v4 = vld [vmem:[#allocation116_spill] sm:$0xff] }
 0x367   : > { %vm2218_vm5 = vmand %vm7563_vm12, %vm2180_vm15  ;;  %v2249_v48 = vsel %vm2217_vm3, 1, %v9243_v41  ;;  %2425 = vst [vmem:[%s7669_s5 + $0x10] sm:$0xff] %v2409_v13 }
 0x368   : > { %v2250_v59 = vsel %vm2218_vm5, 1, %v9243_v41  ;;  %v2281_v55 = vadd.s32 %v2249_v48, %v7380_v63  ;;  %vm2175_vm1 = vmand %vm10466_vm6, %vm2137_vm9  ;;  %v10503_v48 = vld [vmem:[#allocation36_spill] sm:$0xff] }
 0x369   : > { %v2282_v26 = vadd.s32 %v2250_v59, %v7397_v14  ;;  %vm2176_vm8 = vmand %vm10476_vm13, %vm2138_vm4 }
 0x36a   : > { %vm2313_vm10 = vcmp.lt.s32.totalorder %v2281_v55, 2  ;;  %vm2207_vm15 = vmor %vm2103_vm14, %vm2175_vm1  ;;  %vm10477_vm14 = vcmp.lt.s32.totalorder %v3228_v31, 127  ;;  %vm10478_vm1 = vnez %v10351_v36  ;;  %v10506_v55 = vld [vmem:[#allocation138_spill] sm:$0xff] }
 0x36b   : > { %vm2314_vm3 = vcmp.lt.s32.totalorder %v2282_v26, 2  ;;  %v2377_v47 = vsel %vm2313_vm10, %v2345_v27, 0.0  ;;  %vm2208_vm5 = vmor %vm2104_vm7, %vm2176_vm8  ;;  %v2036_v30 = vsel %vm10477_vm14, %v7124_v35, %v2009_v40  ;;  %vm1738_vm7 = vcmp.gt.f32.partialorder %v6712_v20, %v7731_v51  ;;  %v10504_v27 = vld [vmem:[#allocation53_spill] sm:$0xff]  ;;  %v2351_v26 = vld [vmem:[%s3065_s27 + $0x40] sm:$0xff] }
 0x36c   : > { %v2378_v63 = vsel %vm2314_vm3, %v2346_v16, 0.0  ;;  %vm2245_vm9 = vmand %vm7553_vm11, %vm2207_vm15  ;;  %vm1739_vm15 = vcmp.gt.f32.partialorder %v6717_v61, %v2751_v17  ;;  %v10481_v61 = vld [vmem:[#allocation129_spill] sm:$0xff]  ;;  %vm2083_vm13 = vcmp.gt.f32.partialorder %v2036_v30, %v7731_v51  ;;  %v2015_v13 = vpop.permute.xlu1 %2014 }
 0x36d   : > { %v2408_v14 = vpack.c.bf16 %v2378_v63, %v2377_v47  ;;  %vm2246_vm4 = vmand %vm7563_vm12, %vm2208_vm5  ;;  %v2277_v37 = vsel %vm2245_vm9, 1, %v9243_v41  ;;  %vm10482_vm12 = vnez %v10481_v61  ;;  %v10507_v16 = vld [vmem:[#allocation69_spill] sm:$0xff]  ;;  %v10509_v63 = vld [vmem:[#allocation90_spill] sm:$0xff] }
 0x36e   : > { %v2278_v57 = vsel %vm2246_vm4, 1, %v9243_v41  ;;  %v2309_v45 = vadd.s32 %v2277_v37, %v7442_v3  ;;  %vm1811_vm8 = vmand %vm10478_vm1, %vm1773_vm0  ;;  %vm2117_vm4 = vcmp.eq.f32.partialorder %v2036_v30, %v7731_v51  ;;  %vm10480_vm0 = vnez %v10391_v7 }
 0x36f   : > { %vm10479_vm10 = vmmov %vm10477_vm14  ;;  %2424 = vst [vmem:[%s7669_s5 + $0x8] sm:$0xff] %v2408_v14  ;;  %v2310_v62 = vadd.s32 %v2278_v57, %v7467_v2  ;;  %v2352_v14 = vld [vmem:[%s3065_s27 + $0x48] sm:$0xff]  ;;  %v10512_v57 = vld [vmem:[#allocation20_spill] sm:$0xff] }
 0x370   : > { %v2052_v21 = vsel %vm10479_vm10, %v2009_v40, %v7124_v35  ;;  %vm1842_vm3 = vmor %vm1738_vm7, %vm7749_vm2  ;;  %vm2341_vm5 = vcmp.lt.s32.totalorder %v2309_v45, 2  ;;  %v10513_v45 = vld [vmem:[#allocation43_spill] sm:$0xff] }
 0x371   : > { %vm1843_vm9 = vmor %vm1739_vm15, %vm1811_vm8  ;;  %vm2342_vm14 = vcmp.lt.s32.totalorder %v2310_v62, 2  ;;  %v2405_v20 = vsel %vm2341_vm5, %v2373_v58, 0.0  ;;  %vm2118_vm10 = vcmp.eq.f32.partialorder %v2052_v21, %v2751_v17  ;;  %vm2084_vm2 = vcmp.gt.f32.partialorder %v2052_v21, %v2751_v17 }
 0x372   : > { %vm1880_vm1 = vmand %vm10480_vm0, %vm1842_vm3  ;;  %v2406_v35 = vsel %vm2342_vm14, %v2374_v29, 0.0  ;;  %vm10485_vm8 = vnez %v10424_v22 }
 0x373   : > { %vm1881_vm11 = vmand %vm10482_vm12, %vm1843_vm9  ;;  %v1912_v3 = vsel %vm1880_vm1, 1, %v9243_v41  ;;  %v2422_v2 = vpack.c.bf16 %v2406_v35, %v2405_v20  ;;  %vm10488_vm1 = vcmp.lt.s32.totalorder %v3228_v31, 126  ;;  %vm10490_vm9 = vnez %v10455_v49 }
 0x374   : > { %v1913_v54 = vsel %vm1881_vm11, 1, %v9243_v41  ;;  %v1944_v5 = vadd.s32 %v1912_v3, %v10483_v8  ;;  %vm2155_vm7 = vmand %vm10466_vm6, %vm2117_vm4  ;;  %v1690_v0 = vsel %vm10488_vm1, %v10487_v56, %v10486_v44  ;;  %v7911_v8 = vld [vmem:[%s3072_s0 + $0xb0] sm:$0xff] }
 0x375   : > { %v1945_v11 = vadd.s32 %v1913_v54, %v10484_v19  ;;  %vm2156_vm15 = vmand %vm10485_vm8, %vm2118_vm10  ;;  %2438 = vst [vmem:[%s7669_s5 + $0x78] sm:$0xff] %v2422_v2  ;;  %vm1770_vm14 = vcmp.eq.f32.partialorder %v1690_v0, %v10491_v52  ;;  %vm10492_vm10 = vnez %v10459_v1  ;;  %v10518_v2 = vld [vmem:[#allocation44_spill] sm:$0xff] }
 0x376   : > { %vm2187_vm11 = vmor %vm2083_vm13, %vm2155_vm7  ;;  %vm10493_vm7 = vnez %v10349_v24 }
 0x377   : > { %vm10489_vm3 = vmmov %vm10488_vm1  ;;  %vm1736_vm1 = vcmp.gt.f32.partialorder %v1690_v0, %v10491_v52  ;;  %v10524_v0 = vld [vmem:[#allocation100_spill] sm:$0xff] }
 0x378   : > { %v1706_v15 = vsel %vm10489_vm3, %v10486_v44, %v10487_v56  ;;  %vm2188_vm5 = vmor %vm2084_vm2, %vm2156_vm15  ;;  %vm10495_vm15 = vcmp.lt.s32.totalorder %v3228_v31, 127  ;;  %v10520_v44 = vld [vmem:[#allocation98_spill] sm:$0xff] }
 0x379   : > { %vm2225_vm4 = vmand %vm10490_vm9, %vm2187_vm11  ;;  %vm1771_vm13 = vcmp.eq.f32.partialorder %v1706_v15, %v2752_v25  ;;  %v2035_v12 = vsel %vm10495_vm15, %v10494_v23, %v2007_v33  ;;  %vm10496_vm11 = vnez %v10351_v36  ;;  %v10568_v56 = vld [vmem:[#allocation106_spill] sm:$0xff] }
 0x37a   : > { %vm2226_vm8 = vmand %vm10492_vm10, %vm2188_vm5  ;;  %v2257_v46 = vsel %vm2225_vm4, 1, %v9243_v41 }
 0x37b   : > { %v2258_v60 = vsel %vm2226_vm8, 1, %v9243_v41  ;;  %v2289_v34 = vadd.s32 %v2257_v46, %v1944_v5  ;;  %vm1808_vm2 = vmand %vm10493_vm7, %vm1770_vm14  ;;  %vm1737_vm8 = vcmp.gt.f32.partialorder %v1706_v15, %v2752_v25  ;;  %v10519_v5 = vld [vmem:[#allocation65_spill] sm:$0xff] }
 0x37c   : > { %v2290_v6 = vadd.s32 %v2258_v60, %v1945_v11  ;;  %vm1809_vm3 = vmand %vm10496_vm11, %vm1771_vm13  ;;  %v7920_v11 = vld [vmem:[%s3072_s0 + $0xb8] sm:$0xff]  ;;  %v2359_v60 = vld [vmem:[%s3065_s27 + $0x80] sm:$0xff] }
 0x37d   : > { %vm10497_vm5 = vmmov %vm10495_vm15  ;;  %vm2321_vm4 = vcmp.lt.s32.totalorder %v2289_v34, 2  ;;  %vm2115_vm15 = vcmp.eq.f32.partialorder %v2035_v12, %v10491_v52  ;;  %v10570_v15 = vld [vmem:[#allocation57_spill] sm:$0xff] }
 0x37e   : > { %v2051_v32 = vsel %vm10497_vm5, %v2007_v33, %v10494_v23  ;;  %vm1840_vm10 = vmor %vm1736_vm1, %vm1808_vm2  ;;  %vm2322_vm14 = vcmp.lt.s32.totalorder %v2290_v6, 2  ;;  %v2385_v38 = vsel %vm2321_vm4, %v2353_v9, 0.0  ;;  %vm2081_vm5 = vcmp.gt.f32.partialorder %v2035_v12, %v10491_v52  ;;  %v2755_v33 = vld [vmem:[%s3072_s0 + $0x70] sm:$0xff]  ;;  %v10528_v52 = vld [vmem:[#allocation14_spill] sm:$0xff] }
 0x37f   : > { %vm1841_vm7 = vmor %vm1737_vm8, %vm1809_vm3  ;;  %v2386_v42 = vsel %vm2322_vm14, %v2354_v10, 0.0  ;;  %vm2116_vm6 = vcmp.eq.f32.partialorder %v2051_v32, %v2752_v25  ;;  %vm2082_vm2 = vcmp.gt.f32.partialorder %v2051_v32, %v2752_v25  ;;  %vm10499_vm1 = vnez %v10422_v39  ;;  %v2756_v25 = vld [vmem:[%s3072_s0 + $0x78] sm:$0xff]  ;;  %v10530_v9 = vld [vmem:[#allocation120_spill] sm:$0xff] }
 0x380   : > { %vm1878_vm9 = vmand %vm10480_vm0, %vm1840_vm10  ;;  %v2412_v51 = vpack.c.bf16 %v2386_v42, %v2385_v38  ;;  %vm10501_vm10 = vnez %v10424_v22  ;;  %vm10502_vm4 = vnez %v10455_v49  ;;  %v10531_v12 = vld [vmem:[#allocation136_spill] sm:$0xff]  ;;  %v2360_v10 = vld [vmem:[%s3065_s27 + $0x88] sm:$0xff] }
 0x381   : > { %vm1879_vm13 = vmand %vm10482_vm12, %vm1841_vm7  ;;  %v1910_v43 = vsel %vm1878_vm9, 1, %v9243_v41  ;;  %vm10505_vm12 = vnez %v10459_v1  ;;  %v10533_v32 = vld [vmem:[#allocation137_spill] sm:$0xff] }
 0x382   : > { %v1911_v50 = vsel %vm1879_vm13, 1, %v9243_v41  ;;  %v1942_v28 = vadd.s32 %v1910_v43, %v10498_v18  ;;  %vm2153_vm3 = vmand %vm10499_vm1, %vm2115_vm15  ;;  %2428 = vst [vmem:[%s7669_s5 + $0x28] sm:$0xff] %v2412_v51  ;;  %vm1778_vm13 = vcmp.eq.f32.partialorder %v10504_v27, %v10503_v48  ;;  %vm1779_vm15 = vcmp.eq.f32.partialorder %v10507_v16, %v10506_v55  ;;  %v10535_v38 = vld [vmem:[#allocation133_spill] sm:$0xff]  ;;  %v2013_v18 = vpop.permute.xlu0 %2012 }
 0x383   : > { %v1943_v53 = vadd.s32 %v1911_v50, %v10500_v4  ;;  %vm2154_vm7 = vmand %vm10501_vm10, %vm2116_vm6  ;;  %vm10508_vm6 = vnez %v10349_v24  ;;  %v10536_v42 = vld [vmem:[#allocation49_spill] sm:$0xff]  ;;  %v10539_v4 = vld [vmem:[#allocation134_spill] sm:$0xff] }
 0x384   : > { %vm2185_vm8 = vmor %vm2081_vm5, %vm2153_vm3  ;;  %vm1744_vm3 = vcmp.gt.f32.partialorder %v10504_v27, %v10503_v48 }
 0x385   : > { %vm2186_vm9 = vmor %vm2082_vm2, %vm2154_vm7  ;;  %vm10510_vm2 = vcmp.lt.s32.totalorder %v3228_v31, 127 }
 0x386   : > { %vm2223_vm14 = vmand %vm10502_vm4, %vm2185_vm8  ;;  %v2039_v17 = vsel %vm10510_vm2, %v10509_v63, %v2015_v13 }
 0x387   : > { %vm2224_vm0 = vmand %vm10505_vm12, %vm2186_vm9  ;;  %v2255_v59 = vsel %vm2223_vm14, 1, %v9243_v41  ;;  %vm10514_vm12 = vcmp.lt.s32.totalorder %v3228_v31, 1 }
 0x388   : > { %v2256_v40 = vsel %vm2224_vm0, 1, %v9243_v41  ;;  %v2287_v47 = vadd.s32 %v2255_v59, %v1942_v28  ;;  %vm1816_vm5 = vmand %vm10508_vm6, %vm1778_vm13  ;;  %vm1745_vm0 = vcmp.gt.f32.partialorder %v10507_v16, %v10506_v55  ;;  %vm2123_vm6 = vcmp.eq.f32.partialorder %v2039_v17, %v10503_v48  ;;  %v10543_v59 = vld [vmem:[#allocation41_spill] sm:$0xff]  ;;  %v10545_v16 = vld [vmem:[#allocation139_spill] sm:$0xff] }
 0x389   : > { %v2288_v37 = vadd.s32 %v2256_v40, %v1943_v53  ;;  %vm1817_vm7 = vmand %vm10496_vm11, %vm1779_vm15  ;;  %v7890_v21 = vsel %vm10514_vm12, %v10513_v45, %v10512_v57  ;;  %vm10515_vm15 = vnez %v10391_v7  ;;  %v10547_v40 = vld [vmem:[#allocation81_spill] sm:$0xff] }
 0x38a   : > { %vm10511_vm8 = vmmov %vm10510_vm2  ;;  %vm2319_vm9 = vcmp.lt.s32.totalorder %v2287_v47, 2 }
 0x38b   : > { %v2055_v30 = vsel %vm10511_vm8, %v2015_v13, %v10509_v63  ;;  %vm1848_vm14 = vmor %vm1744_vm3, %vm1816_vm5  ;;  %vm2320_vm13 = vcmp.lt.s32.totalorder %v2288_v37, 2  ;;  %v2383_v58 = vsel %vm2319_vm9, %v2351_v26, 0.0  ;;  %v10541_v13 = vld [vmem:[#allocation135_spill] sm:$0xff] }
 0x38c   : > { %vm1849_vm2 = vmor %vm1745_vm0, %vm1817_vm7  ;;  %v2384_v29 = vsel %vm2320_vm13, %v2352_v14, 0.0  ;;  %vm2124_vm5 = vcmp.eq.f32.partialorder %v2055_v30, %v10506_v55  ;;  %vm10517_vm7 = vnez %v10481_v61  ;;  %vm2090_vm9 = vcmp.gt.f32.partialorder %v2055_v30, %v10506_v55 }
 0x38d   : > { %vm1886_vm8 = vmand %vm10515_vm15, %vm1848_vm14  ;;  %v2411_v20 = vpack.c.bf16 %v2384_v29, %v2383_v58  ;;  %vm436_vm13 = vcmp.eq.f32.partialorder %v7890_v21, %v7911_v8  ;;  %v10551_v14 = vmov 0  ;;  %v10560_v29 = vld [vmem:[#allocation79_spill] sm:$0xff] }
 0x38e   : > { %vm10516_vm3 = vmmov %vm10514_vm12  ;;  %v1918_v35 = vsel %vm1886_vm8, 1, %v9243_v41  ;;  %vm2089_vm12 = vcmp.gt.f32.partialorder %v2039_v17, %v10503_v48  ;;  %v10549_v17 = vmov 0 }
 0x38f   : > { %v7899_v62 = vsel %vm10516_vm3, %v10512_v57, %v10513_v45  ;;  %vm1887_vm0 = vmand %vm10517_vm7, %vm1849_vm2  ;;  %v1950_v54 = vadd.s32 %v1918_v35, %v10518_v2  ;;  %2427 = vst [vmem:[%s7669_s5 + $0x20] sm:$0xff] %v2411_v20  ;;  %vm10525_vm7 = vnez %v10524_v0  ;;  %v10558_v45 = vld [vmem:[#allocation80_spill] sm:$0xff]  ;;  %v10564_v2 = vld [vmem:[#allocation105_spill] sm:$0xff] }
 0x390   : > { %v1919_v3 = vsel %vm1887_vm0, 1, %v9243_v41  ;;  %vm2161_vm14 = vmand %vm10499_vm1, %vm2123_vm6  ;;  %vm437_vm8 = vcmp.eq.f32.partialorder %v7899_v62, %v7920_v11  ;;  %vm10521_vm6 = vnez %v10520_v44 }
 0x391   : > { %v1951_v19 = vadd.s32 %v1919_v3, %v10519_v5  ;;  %vm2162_vm2 = vmand %vm10501_vm10, %vm2124_vm5  ;;  %v10561_v3 = vld [vmem:[#allocation109_spill] sm:$0xff] }
 0x392   : > { %vm2193_vm3 = vmor %vm2089_vm12, %vm2161_vm14  ;;  %vm1431_vm12 = vcmp.eq.f32.partialorder %v10528_v52, %v2755_v33  ;;  %vm10529_vm14 = vnez %v10459_v1 }
 0x393   : > { %vm7926_vm0 = vmand %vm10521_vm6, %vm436_vm13  ;;  %vm10532_vm13 = vnez %v10531_v12 }
 0x394   : > { %vm2194_vm1 = vmor %vm2090_vm9, %vm2162_vm2  ;;  %vm1432_vm9 = vcmp.eq.f32.partialorder %v10530_v9, %v2756_v25 }
 0x395   : > { %vm7932_vm15 = vmand %vm10525_vm7, %vm437_vm8  ;;  %vm1397_vm8 = vcmp.gt.f32.partialorder %v10528_v52, %v2755_v33 }
 0x396   : > { %vm2231_vm5 = vmand %vm10502_vm4, %vm2193_vm3  ;;  %vm10534_vm3 = vnez %v10533_v32  ;;  %vm402_vm4 = vcmp.gt.f32.partialorder %v7890_v21, %v7911_v8 }
 0x397   : > { %vm2232_vm10 = vmand %vm10529_vm14, %vm2194_vm1  ;;  %v2263_v46 = vsel %vm2231_vm5, 1, %v9243_v41  ;;  %vm1398_vm1 = vcmp.gt.f32.partialorder %v10530_v9, %v2756_v25  ;;  %vm10537_vm5 = vcmp.lt.s32.totalorder %v3228_v31, 126 }
 0x398   : > { %v2264_v34 = vsel %vm2232_vm10, 1, %v9243_v41  ;;  %v2295_v23 = vadd.s32 %v2263_v46, %v1950_v54  ;;  %vm1469_vm2 = vmand %vm10532_vm13, %vm1431_vm12  ;;  %v1693_v51 = vsel %vm10537_vm5, %v10536_v42, %v10535_v38  ;;  %v2358_v54 = vld [vmem:[%s3065_s27 + $0x78] sm:$0xff] }
 0x399   : > { %v2296_v6 = vadd.s32 %v2264_v34, %v1951_v19  ;;  %vm1470_vm7 = vmand %vm10534_vm3, %vm1432_vm9  ;;  %vm10540_vm9 = vnez %v10539_v4  ;;  %v10566_v19 = vld [vmem:[#allocation110_spill] sm:$0xff] }
 0x39a   : > { %vm2327_vm6 = vcmp.lt.s32.totalorder %v2295_v23, 2  ;;  %vm1501_vm10 = vmor %vm1397_vm8, %vm1469_vm2  ;;  %vm10542_vm2 = vnez %v10541_v13  ;;  %v10578_v23 = vld [vmem:[#allocation113_spill] sm:$0xff] }
 0x39b   : > { %vm10538_vm12 = vmmov %vm10537_vm5  ;;  %vm2328_vm13 = vcmp.lt.s32.totalorder %v2296_v6, 2  ;;  %v2391_v50 = vsel %vm2327_vm6, %v2359_v60, 0.0  ;;  %vm1776_vm5 = vcmp.eq.f32.partialorder %v1693_v51, %v2755_v33  ;;  %v10576_v60 = vmov 0  ;;  %v10580_v6 = vld [vmem:[#allocation114_spill] sm:$0xff] }
 0x39c   : > { %v1709_v43 = vsel %vm10538_vm12, %v10535_v38, %v10536_v42  ;;  %vm1502_vm14 = vmor %vm1398_vm1, %vm1470_vm7  ;;  %v2392_v28 = vsel %vm2328_vm13, %v2360_v10, 0.0  ;;  %vm10544_vm7 = vnez %v10349_v24  ;;  %vm10546_vm13 = vcmp.lt.s32.totalorder %v3228_v31, 127  ;;  %v10582_v38 = vld [vmem:[#allocation101_spill] sm:$0xff]  ;;  %v10584_v42 = vld [vmem:[#allocation55_spill] sm:$0xff] }
 0x39d   : > { %vm1539_vm3 = vmand %vm10540_vm9, %vm1501_vm10  ;;  %v2415_v53 = vpack.c.bf16 %v2392_v28, %v2391_v50  ;;  %vm1777_vm12 = vcmp.eq.f32.partialorder %v1709_v43, %v2756_v25  ;;  %v2038_v26 = vsel %vm10546_vm13, %v10545_v16, %v2013_v18  ;;  %vm403_vm1 = vcmp.gt.f32.partialorder %v7899_v62, %v7920_v11  ;;  %v2357_v62 = vld [vmem:[%s3065_s27 + $0x70] sm:$0xff]  ;;  %v10587_v50 = vld [vmem:[#allocation102_spill] sm:$0xff] }
 0x39e   : > { %vm1540_vm8 = vmand %vm10542_vm2, %vm1502_vm14  ;;  %v1571_v48 = vsel %vm1539_vm3, 1, %v9243_v41  ;;  %vm1742_vm10 = vcmp.gt.f32.partialorder %v1693_v51, %v2755_v33  ;;  %v10585_v51 = vld [vmem:[#allocation103_spill] sm:$0xff]  ;;  %v10590_v28 = vld [vmem:[#allocation104_spill] sm:$0xff] }
 0x39f   : > { %v1572_v27 = vsel %vm1540_vm8, 1, %v9243_v41  ;;  %v1603_v55 = vadd.s32 %v1571_v48, %v10543_v59  ;;  %vm1814_vm6 = vmand %vm10544_vm7, %vm1776_vm5  ;;  %2431 = vst [vmem:[%s7669_s5 + $0x40] sm:$0xff] %v2415_v53  ;;  %vm1743_vm8 = vcmp.gt.f32.partialorder %v1709_v43, %v2756_v25 }
 0x3a0   : > { %v1604_v47 = vadd.s32 %v1572_v27, %v10547_v40  ;;  %vm1815_vm14 = vmand %vm10496_vm11, %vm1777_vm12  ;;  %vm2121_vm11 = vcmp.eq.f32.partialorder %v2038_v26, %v2755_v33  ;;  %v10595_v27 = vld [vmem:[#allocation108_spill] sm:$0xff] }
 0x3a1   : > { %vm10548_vm3 = vmmov %vm10546_vm13 }
 0x3a2   : > { %v2054_v63 = vsel %vm10548_vm3, %v2013_v18, %v10545_v16  ;;  %vm7990_vm5 = vmor %vm402_vm4, %vm7926_vm0  ;;  %vm10553_vm3 = vnez %v10391_v7  ;;  %vm10554_vm0 = vnez %v10481_v61 }
 0x3a3   : > { %v10550_v17 = vsel %vm7990_vm5, 4294967295, %v10549_v17  ;;  %vm1846_vm13 = vmor %vm1742_vm10, %vm1814_vm6  ;;  %vm2122_vm9 = vcmp.eq.f32.partialorder %v2054_v63, %v2756_v25  ;;  %vm2087_vm5 = vcmp.gt.f32.partialorder %v2038_v26, %v2755_v33  ;;  %vm10555_vm6 = vnez %v10422_v39  ;;  %v10571_v33 = vld [vmem:[#allocation67_spill] sm:$0xff] }
 0x3a4   : > { %vm7996_vm7 = vmor %vm403_vm1, %vm7932_vm15  ;;  %vm2088_vm15 = vcmp.gt.f32.partialorder %v2054_v63, %v2756_v25  ;;  %vm10556_vm10 = vnez %v10424_v22 }
 0x3a5   : > { %v10552_v14 = vsel %vm7996_vm7, 4294967295, %v10551_v14  ;;  %vm1847_vm12 = vmor %vm1743_vm8, %vm1815_vm14 }
 0x3a6   : > { %vm1884_vm2 = vmand %vm10553_vm3, %vm1846_vm13 }
 0x3a7   : > { %vm1885_vm4 = vmand %vm10554_vm0, %vm1847_vm12  ;;  %v1916_v37 = vsel %vm1884_vm2, 1, %v9243_v41  ;;  %vm10557_vm12 = vnez %v10455_v49  ;;  %vm1094_vm2 = vcmp.eq.f32.partialorder %v10558_v45, %v7911_v8 }
 0x3a8   : > { %v1917_v30 = vsel %vm1885_vm4, 1, %v9243_v41  ;;  %v1948_v58 = vadd.s32 %v1916_v37, %v1603_v55  ;;  %vm2159_vm1 = vmand %vm10555_vm6, %vm2121_vm11  ;;  %vm10559_vm4 = vnez %v10459_v1  ;;  %vm1095_vm11 = vcmp.eq.f32.partialorder %v10560_v29, %v7920_v11  ;;  %v10606_v37 = vld [vmem:[#allocation146_spill] sm:$0xff] }
 0x3a9   : > { %v1949_v57 = vadd.s32 %v1917_v30, %v1604_v47  ;;  %vm2160_vm14 = vmand %vm10556_vm10, %vm2122_vm9  ;;  %vm10562_vm9 = vnez %v10561_v3  ;;  %vm10586_vm6 = vcmp.lt.s32.totalorder %v3228_v31, 125  ;;  %vm10591_vm10 = vnez %v10590_v28 }
 0x3aa   : > { %vm2191_vm8 = vmor %vm2087_vm5, %vm2159_vm1  ;;  %vm10565_vm1 = vnez %v10564_v2  ;;  %v1352_v43 = vsel %vm10586_vm6, %v10585_v51, %v10584_v42 }
 0x3ab   : > { %vm2192_vm13 = vmor %vm2088_vm15, %vm2160_vm14  ;;  %vm1061_vm14 = vcmp.gt.f32.partialorder %v10560_v29, %v7920_v11 }
 0x3ac   : > { %vm2229_vm0 = vmand %vm10557_vm12, %vm2191_vm8  ;;  %vm1060_vm8 = vcmp.gt.f32.partialorder %v10558_v45, %v7911_v8 }
 0x3ad   : > { %vm2230_vm3 = vmand %vm10559_vm4, %vm2192_vm13  ;;  %v2261_v21 = vsel %vm2229_vm0, 1, %v9243_v41  ;;  %vm10567_vm0 = vnez %v10566_v19 }
 0x3ae   : > { %v2262_v20 = vsel %vm2230_vm3, 1, %v9243_v41  ;;  %v2293_v35 = vadd.s32 %v2261_v21, %v1948_v58  ;;  %vm1132_vm5 = vmand %vm10562_vm9, %vm1094_vm2  ;;  %vm10572_vm2 = vcmp.lt.s32.totalorder %v3228_v31, 2  ;;  %v10608_v58 = vld [vmem:[#allocation73_spill] sm:$0xff]  ;;  %v10610_v21 = vld [vmem:[#allocation54_spill] sm:$0xff] }
 0x3af   : > { %v2294_v5 = vadd.s32 %v2262_v20, %v1949_v57  ;;  %vm1133_vm13 = vmand %vm10567_vm0, %vm1095_vm11  ;;  %v678_v52 = vsel %vm10572_vm2, %v10571_v33, %v10570_v15 }
 0x3b0   : > { %vm2325_vm9 = vcmp.lt.s32.totalorder %v2293_v35, 2  ;;  %vm8042_vm12 = vmor %vm1060_vm8, %vm1132_vm5  ;;  %vm749_vm8 = vcmp.eq.f32.partialorder %v678_v52, %v7911_v8  ;;  %vm10588_vm5 = vnez %v10587_v50 }
 0x3b1   : > { %vm10575_vm11 = vmmov %vm10572_vm2  ;;  %vm2326_vm4 = vcmp.lt.s32.totalorder %v2294_v5, 2  ;;  %v2389_v9 = vsel %vm2325_vm9, %v2357_v62, 0.0  ;;  %vm10579_vm2 = vnez %v10578_v23 }
 0x3b2   : > { %v662_v25 = vsel %vm10575_vm11, %v10570_v15, %v10571_v33  ;;  %vm8050_vm0 = vmor %vm1061_vm14, %vm1133_vm13  ;;  %v2390_v34 = vsel %vm2326_vm4, %v2358_v54, 0.0  ;;  %vm10583_vm14 = vnez %v10582_v38  ;;  %vm715_vm4 = vcmp.gt.f32.partialorder %v678_v52, %v7911_v8  ;;  %v10618_v33 = vld [vmem:[#allocation29_spill] sm:$0xff] }
 0x3b3   : > { %v10577_v60 = vsel %vm8050_vm0, 4294967295, %v10576_v60  ;;  %v2414_v10 = vpack.c.bf16 %v2390_v34, %v2389_v9  ;;  %vm750_vm9 = vcmp.eq.f32.partialorder %v662_v25, %v7920_v11  ;;  %vm787_vm13 = vmand %vm10583_vm14, %vm749_vm8  ;;  %vm716_vm3 = vcmp.gt.f32.partialorder %v662_v25, %v7920_v11  ;;  %v10619_v52 = vld [vmem:[#allocation33_spill] sm:$0xff]  ;;  %v8173_v9 = vld [vmem:[%s3072_s0 + $0xa8] sm:$0xff] }
 0x3b4   : > { %vm788_vm7 = vmand %vm10588_vm5, %vm750_vm9  ;;  %vm1439_vm14 = vcmp.eq.f32.partialorder %v1352_v43, %v7911_v8  ;;  %vm10615_vm5 = vnez %v10481_v61 }
 0x3b5   : > { %2430 = vst [vmem:[%s7669_s5 + $0x38] sm:$0xff] %v2414_v10  ;;  %vm10589_vm11 = vmmov %vm10586_vm6 }
 0x3b6   : > { %v1368_v18 = vsel %vm10589_vm11, %v10584_v42, %v10585_v51  ;;  %vm819_vm0 = vmor %vm715_vm4, %vm787_vm13  ;;  %vm10593_vm11 = vnez %v10550_v17  ;;  %vm10598_vm4 = vnez %v10577_v60  ;;  %v2021_v17 = vpop.permute.xlu1 %2020  ;;  %v2365_v60 = vld [vmem:[%s3065_s27 + $0xb0] sm:$0xff]  ;;  %v2366_v42 = vld [vmem:[%s3065_s27 + $0xb8] sm:$0xff] }
 0x3b7   : > { %vm820_vm8 = vmor %vm716_vm3, %vm788_vm7  ;;  %vm1440_vm6 = vcmp.eq.f32.partialorder %v1368_v18, %v7920_v11  ;;  %vm10596_vm3 = vnez %v10595_v27 }
 0x3b8   : > { %vm857_vm15 = vmand %vm10591_vm10, %vm819_vm0  ;;  %vm10597_vm0 = vnez %v10580_v6 }
 0x3b9   : > { %vm10592_vm9 = vmand %vm10579_vm2, %vm8042_vm12  ;;  %v889_v59 = vsel %vm857_vm15, 1, %v9243_v41  ;;  %vm10600_vm12 = vnez %v10568_v56 }
 0x3ba   : > { %v1234_v53 = vsel %vm10592_vm9, 1, %v9243_v41  ;;  %vm10594_vm7 = vmand %vm10565_vm1, %vm10593_vm11  ;;  %vm10601_vm9 = vnez %v10552_v14  ;;  %vm1405_vm11 = vcmp.gt.f32.partialorder %v1352_v43, %v7911_v8  ;;  %v10626_v43 = vld [vmem:[#allocation46_spill] sm:$0xff] }
 0x3bb   : > { %v576_v48 = vsel %vm10594_vm7, 1, %v9243_v41  ;;  %vm858_vm13 = vmand %vm10596_vm3, %vm820_vm8  ;;  %vm10603_vm8 = vnez %v10531_v12  ;;  %vm10604_vm7 = vnez %v10533_v32  ;;  %vm1784_vm3 = vcmp.eq.f32.partialorder %v10606_v37, %v7911_v8 }
 0x3bc   : > { %vm10599_vm10 = vmand %vm10597_vm0, %vm10598_vm4  ;;  %v890_v26 = vsel %vm858_vm13, 1, %v9243_v41  ;;  %v921_v40 = vadd.s32 %v889_v59, %v576_v48  ;;  %v10629_v48 = vmov 0 }
 0x3bd   : > { %v1235_v55 = vsel %vm10599_vm10, 1, %v9243_v41  ;;  %vm10602_vm2 = vmand %vm10600_vm12, %vm10601_vm9  ;;  %vm1406_vm10 = vcmp.gt.f32.partialorder %v1368_v18, %v7920_v11  ;;  %v10627_v18 = vld [vmem:[#allocation68_spill] sm:$0xff] }
 0x3be   : > { %v577_v16 = vsel %vm10602_vm2, 1, %v9243_v41  ;;  %vm1477_vm15 = vmand %vm10603_vm8, %vm1439_vm14  ;;  %v1266_v63 = vadd.s32 %v1234_v53, %v921_v40  ;;  %vm10605_vm2 = vnez %v10539_v4  ;;  %vm10607_vm14 = vnez %v10541_v13 }
 0x3bf   : > { %v922_v47 = vadd.s32 %v890_v26, %v577_v16  ;;  %vm1478_vm4 = vmand %vm10604_vm7, %vm1440_vm6  ;;  %vm1785_vm6 = vcmp.eq.f32.partialorder %v10608_v58, %v7920_v11  ;;  %v10632_v16 = vmov 0 }
 0x3c0   : > { %vm1509_vm0 = vmor %vm1405_vm11, %vm1477_vm15  ;;  %vm10609_vm15 = vnez %v10349_v24 }
 0x3c1   : > { %v1267_v14 = vadd.s32 %v1235_v55, %v922_v47  ;;  %vm1510_vm9 = vmor %vm1406_vm10, %vm1478_vm4  ;;  %vm1750_vm4 = vcmp.gt.f32.partialorder %v10606_v37, %v7911_v8  ;;  %vm10612_vm10 = vnez %v10351_v36  ;;  %v10637_v47 = vld [vmem:[#allocation92_spill] sm:$0xff] }
 0x3c2   : > { %vm1547_vm13 = vmand %vm10605_vm2, %vm1509_vm0  ;;  %vm10611_vm0 = vcmp.lt.s32.totalorder %v3228_v31, 127 }
 0x3c3   : > { %vm1548_vm8 = vmand %vm10607_vm14, %vm1510_vm9  ;;  %v1579_v30 = vsel %vm1547_vm13, 1, %v9243_v41  ;;  %v2042_v29 = vsel %vm10611_vm0, %v10610_v21, %v2021_v17 }
 0x3c4   : > { %v1580_v57 = vsel %vm1548_vm8, 1, %v9243_v41  ;;  %v1611_v45 = vadd.s32 %v1579_v30, %v1266_v63  ;;  %vm1822_vm11 = vmand %vm10609_vm15, %vm1784_vm3  ;;  %vm1751_vm8 = vcmp.gt.f32.partialorder %v10608_v58, %v7920_v11  ;;  %vm2129_vm15 = vcmp.eq.f32.partialorder %v2042_v29, %v7911_v8  ;;  %v10639_v63 = vld [vmem:[#allocation91_spill] sm:$0xff] }
 0x3c5   : > { %v1612_v62 = vadd.s32 %v1580_v57, %v1267_v14  ;;  %vm1823_vm9 = vmand %vm10612_vm10, %vm1785_vm6  ;;  %vm10636_vm10 = vnez %v10590_v28  ;;  %v10649_v57 = vld [vmem:[#allocation15_spill] sm:$0xff] }
 0x3c6   : > { %vm10613_vm13 = vmmov %vm10611_vm0  ;;  %vm10614_vm0 = vnez %v10391_v7 }
 0x3c7   : > { %v2058_v20 = vsel %vm10613_vm13, %v2021_v17, %v10610_v21  ;;  %vm1854_vm14 = vmor %vm1750_vm4, %vm1822_vm11  ;;  %vm2095_vm13 = vcmp.gt.f32.partialorder %v2042_v29, %v7911_v8  ;;  %vm10616_vm4 = vnez %v10422_v39  ;;  %v10651_v29 = vld [vmem:[#allocation123_spill] sm:$0xff] }
 0x3c8   : > { %vm1855_vm3 = vmor %vm1751_vm8, %vm1823_vm9  ;;  %vm2130_vm7 = vcmp.eq.f32.partialorder %v2058_v20, %v7920_v11  ;;  %vm2096_vm11 = vcmp.gt.f32.partialorder %v2058_v20, %v7920_v11  ;;  %vm10617_vm9 = vnez %v10424_v22  ;;  %v8166_v11 = vld [vmem:[%s3072_s0 + $0xa0] sm:$0xff] }
 0x3c9   : > { %vm1892_vm2 = vmand %vm10614_vm0, %vm1854_vm14  ;;  %vm10622_vm0 = vnez %v10455_v49 }
 0x3ca   : > { %vm1893_vm6 = vmand %vm10615_vm5, %vm1855_vm3  ;;  %v1924_v35 = vsel %vm1892_vm2, 1, %v9243_v41  ;;  %vm10620_vm2 = vcmp.lt.s32.totalorder %v3228_v31, 1 }
 0x3cb   : > { %v1925_v54 = vsel %vm1893_vm6, 1, %v9243_v41  ;;  %v1956_v5 = vadd.s32 %v1924_v35, %v1611_v45  ;;  %vm2167_vm14 = vmand %vm10616_vm4, %vm2129_vm15  ;;  %v364_v46 = vsel %vm10620_vm2, %v10619_v52, %v10618_v33 }
 0x3cc   : > { %v1957_v15 = vadd.s32 %v1925_v54, %v1612_v62  ;;  %vm2168_vm8 = vmand %vm10617_vm9, %vm2130_vm7  ;;  %vm434_vm7 = vcmp.eq.f32.partialorder %v364_v46, %v8166_v11  ;;  %vm10623_vm9 = vnez %v10459_v1  ;;  %v10654_v54 = vld [vmem:[#allocation26_spill] sm:$0xff] }
 0x3cd   : > { %vm2199_vm3 = vmor %vm2095_vm13, %vm2167_vm14 }
 0x3ce   : > { %vm10621_vm6 = vmmov %vm10620_vm2  ;;  %vm10625_vm2 = vnez %v10524_v0 }
 0x3cf   : > { %v348_v8 = vsel %vm10621_vm6, %v10618_v33, %v10619_v52  ;;  %vm2200_vm5 = vmor %vm2096_vm11, %vm2168_vm8  ;;  %vm10624_vm11 = vnez %v10520_v44  ;;  %vm400_vm8 = vcmp.gt.f32.partialorder %v364_v46, %v8166_v11  ;;  %vm10628_vm6 = vcmp.lt.s32.totalorder %v3228_v31, 2  ;;  %v2019_v52 = vpop.permute.xlu0 %2018 }
 0x3d0   : > { %vm2237_vm15 = vmand %vm10622_vm0, %vm2199_vm3  ;;  %vm435_vm13 = vcmp.eq.f32.partialorder %v348_v8, %v8173_v9  ;;  %vm401_vm3 = vcmp.gt.f32.partialorder %v348_v8, %v8173_v9  ;;  %v677_v53 = vsel %vm10628_vm6, %v10627_v18, %v10626_v43 }
 0x3d1   : > { %vm2238_vm4 = vmand %vm10623_vm9, %vm2200_vm5  ;;  %v2269_v25 = vsel %vm2237_vm15, 1, %v9243_v41 }
 0x3d2   : > { %v2270_v34 = vsel %vm2238_vm4, 1, %v9243_v41  ;;  %v2301_v10 = vadd.s32 %v2269_v25, %v1956_v5  ;;  %vm472_vm14 = vmand %vm10624_vm11, %vm434_vm7  ;;  %v10655_v5 = vld [vmem:[#allocation37_spill] sm:$0xff] }
 0x3d3   : > { %v2302_v51 = vadd.s32 %v2270_v34, %v1957_v15  ;;  %vm473_vm5 = vmand %vm10625_vm2, %vm435_vm13 }
 0x3d4   : > { %vm2333_vm4 = vcmp.lt.s32.totalorder %v2301_v10, 2  ;;  %vm8189_vm15 = vmor %vm400_vm8, %vm472_vm14  ;;  %vm747_vm8 = vcmp.eq.f32.partialorder %v677_v53, %v8166_v11 }
 0x3d5   : > { %v10630_v48 = vsel %vm8189_vm15, 4294967295, %v10629_v48  ;;  %vm10631_vm7 = vmmov %vm10628_vm6  ;;  %vm2334_vm11 = vcmp.lt.s32.totalorder %v2302_v51, 2  ;;  %v2397_v55 = vsel %vm2333_vm4, %v2365_v60, 0.0  ;;  %vm1092_vm6 = vcmp.eq.f32.partialorder %v10637_v47, %v8166_v11  ;;  %v10661_v60 = vld [vmem:[#allocation25_spill] sm:$0xff] }
 0x3d6   : > { %v661_v59 = vsel %vm10631_vm7, %v10626_v43, %v10627_v18  ;;  %vm8197_vm13 = vmor %vm401_vm3, %vm473_vm5  ;;  %v2398_v26 = vsel %vm2334_vm11, %v2366_v42, 0.0  ;;  %vm10634_vm5 = vnez %v10582_v38  ;;  %vm713_vm11 = vcmp.gt.f32.partialorder %v677_v53, %v8166_v11 }
 0x3d7   : > { %v10633_v16 = vsel %vm8197_vm13, 4294967295, %v10632_v16  ;;  %v2418_v40 = vpack.c.bf16 %v2398_v26, %v2397_v55  ;;  %vm748_vm4 = vcmp.eq.f32.partialorder %v661_v59, %v8173_v9  ;;  %vm785_vm3 = vmand %vm10634_vm5, %vm747_vm8  ;;  %vm10635_vm7 = vnez %v10587_v50  ;;  %v10672_v55 = vld [vmem:[#allocation83_spill] sm:$0xff] }
 0x3d8   : > { %vm786_vm2 = vmand %vm10635_vm7, %vm748_vm4  ;;  %vm714_vm14 = vcmp.gt.f32.partialorder %v661_v59, %v8173_v9  ;;  %vm10638_vm13 = vnez %v10595_v27  ;;  %vm1093_vm8 = vcmp.eq.f32.partialorder %v10639_v63, %v8173_v9  ;;  %vm10640_vm5 = vnez %v10561_v3  ;;  %v8319_v59 = vld [vmem:[%s3072_s0 + $0xe8] sm:$0xff] }
 0x3d9   : > { %2434 = vst [vmem:[%s7669_s5 + $0x58] sm:$0xff] %v2418_v40  ;;  %vm817_vm9 = vmor %vm713_vm11, %vm785_vm3  ;;  %vm1058_vm4 = vcmp.gt.f32.partialorder %v10637_v47, %v8166_v11  ;;  %vm10642_vm3 = vnez %v10564_v2  ;;  %vm10643_vm11 = vnez %v10630_v48  ;;  %vm10648_vm7 = vnez %v10578_v23  ;;  %v10670_v48 = vld [vmem:[#allocation84_spill] sm:$0xff]  ;;  %v2364_v47 = vld [vmem:[%s3065_s27 + $0xa8] sm:$0xff] }
 0x3da   : > { %vm818_vm0 = vmor %vm714_vm14, %vm786_vm2  ;;  %vm10641_vm2 = vnez %v10566_v19  ;;  %vm1059_vm14 = vcmp.gt.f32.partialorder %v10639_v63, %v8173_v9 }
 0x3db   : > { %vm855_vm15 = vmand %vm10636_vm10, %vm817_vm9  ;;  %vm10646_vm10 = vnez %v10633_v16  ;;  %v2363_v16 = vld [vmem:[%s3065_s27 + $0xa0] sm:$0xff] }
 0x3dc   : > { %vm856_vm12 = vmand %vm10638_vm13, %vm818_vm0  ;;  %v887_v17 = vsel %vm855_vm15, 1, %v9243_v41  ;;  %vm10645_vm15 = vnez %v10568_v56 }
 0x3dd   : > { %vm1130_vm1 = vmand %vm10640_vm5, %vm1092_vm6  ;;  %v888_v14 = vsel %vm856_vm12, 1, %v9243_v41 }
 0x3de   : > { %vm1131_vm9 = vmand %vm10641_vm2, %vm1093_vm8 }
 0x3df   : > { %vm1162_vm0 = vmor %vm1058_vm4, %vm1130_vm1  ;;  %vm1437_vm1 = vcmp.eq.f32.partialorder %v10649_v57, %v8166_v11  ;;  %vm10650_vm4 = vnez %v10580_v6 }
 0x3e0   : > { %vm10644_vm6 = vmand %vm10642_vm3, %vm10643_vm11 }
 0x3e1   : > { %v574_v37 = vsel %vm10644_vm6, 1, %v9243_v41  ;;  %vm1163_vm13 = vmor %vm1059_vm14, %vm1131_vm9  ;;  %vm1438_vm9 = vcmp.eq.f32.partialorder %v10651_v29, %v8173_v9  ;;  %vm10653_vm6 = vnez %v10533_v32 }
 0x3e2   : > { %vm10647_vm8 = vmand %vm10645_vm15, %vm10646_vm10  ;;  %v919_v58 = vadd.s32 %v887_v17, %v574_v37  ;;  %vm10652_vm10 = vnez %v10531_v12  ;;  %vm10658_vm15 = vnez %v10539_v4  ;;  %v10674_v17 = vld [vmem:[#allocation23_spill] sm:$0xff] }
 0x3e3   : > { %v575_v30 = vsel %vm10647_vm8, 1, %v9243_v41  ;;  %vm1200_vm12 = vmand %vm10648_vm7, %vm1162_vm0  ;;  %vm1403_vm0 = vcmp.gt.f32.partialorder %v10649_v57, %v8166_v11  ;;  %vm10666_vm7 = vnez %v10481_v61 }
 0x3e4   : > { %v920_v45 = vadd.s32 %v888_v14, %v575_v30  ;;  %vm1201_vm11 = vmand %vm10650_vm4, %vm1163_vm13  ;;  %v1232_v21 = vsel %vm1200_vm12, 1, %v9243_v41  ;;  %vm1404_vm13 = vcmp.gt.f32.partialorder %v10651_v29, %v8173_v9  ;;  %vm10656_vm12 = vcmp.lt.s32.totalorder %v3228_v31, 126  ;;  %v10675_v14 = vld [vmem:[#allocation45_spill] sm:$0xff] }
 0x3e5   : > { %v1233_v62 = vsel %vm1201_vm11, 1, %v9243_v41  ;;  %v1264_v20 = vadd.s32 %v1232_v21, %v919_v58  ;;  %vm1475_vm14 = vmand %vm10652_vm10, %vm1437_vm1  ;;  %v1696_v15 = vsel %vm10656_vm12, %v10655_v5, %v10654_v54  ;;  %v10680_v21 = vmov 0 }
 0x3e6   : > { %v1265_v35 = vadd.s32 %v1233_v62, %v920_v45  ;;  %vm1476_vm8 = vmand %vm10653_vm6, %vm1438_vm9  ;;  %vm1782_vm9 = vcmp.eq.f32.partialorder %v1696_v15, %v8166_v11  ;;  %vm10659_vm6 = vnez %v10541_v13  ;;  %v10686_v62 = vld [vmem:[#allocation58_spill] sm:$0xff] }
 0x3e7   : > { %vm1507_vm11 = vmor %vm1403_vm0, %vm1475_vm14  ;;  %vm10660_vm14 = vnez %v10349_v24 }
 0x3e8   : > { %vm10657_vm1 = vmmov %vm10656_vm12 }
 0x3e9   : > { %v1712_v33 = vsel %vm10657_vm1, %v10654_v54, %v10655_v5  ;;  %vm1508_vm10 = vmor %vm1404_vm13, %vm1476_vm8  ;;  %vm10662_vm8 = vcmp.lt.s32.totalorder %v3228_v31, 127  ;;  %vm1748_vm13 = vcmp.gt.f32.partialorder %v1696_v15, %v8166_v11  ;;  %v10689_v54 = vmov 0 }
 0x3ea   : > { %vm1545_vm3 = vmand %vm10658_vm15, %vm1507_vm11  ;;  %vm1783_vm12 = vcmp.eq.f32.partialorder %v1712_v33, %v8173_v9  ;;  %v2041_v34 = vsel %vm10662_vm8, %v10661_v60, %v2019_v52  ;;  %vm10663_vm11 = vnez %v10351_v36  ;;  %v10692_v15 = vmov 0 }
 0x3eb   : > { %vm1546_vm4 = vmand %vm10659_vm6, %vm1508_vm10  ;;  %v1577_v46 = vsel %vm1545_vm3, 1, %v9243_v41 }
 0x3ec   : > { %v1578_v8 = vsel %vm1546_vm4, 1, %v9243_v41  ;;  %v1609_v25 = vadd.s32 %v1577_v46, %v1264_v20  ;;  %vm1820_vm0 = vmand %vm10660_vm14, %vm1782_vm9  ;;  %vm1749_vm4 = vcmp.gt.f32.partialorder %v1712_v33, %v8173_v9  ;;  %vm2127_vm9 = vcmp.eq.f32.partialorder %v2041_v34, %v8166_v11  ;;  %v10687_v20 = vld [vmem:[#allocation70_spill] sm:$0xff]  ;;  %v10697_v33 = vld [vmem:[#allocation63_spill] sm:$0xff] }
 0x3ed   : > { %v1610_v10 = vadd.s32 %v1578_v8, %v1265_v35  ;;  %vm1821_vm10 = vmand %vm10663_vm11, %vm1783_vm12  ;;  %vm10665_vm14 = vnez %v10391_v7  ;;  %vm2093_vm12 = vcmp.gt.f32.partialorder %v2041_v34, %v8166_v11  ;;  %v8311_v11 = vld [vmem:[%s3072_s0 + $0xe0] sm:$0xff] }
 0x3ee   : > { %vm10664_vm3 = vmmov %vm10662_vm8 }
 0x3ef   : > { %v2057_v42 = vsel %vm10664_vm3, %v2019_v52, %v10661_v60  ;;  %vm1852_vm1 = vmor %vm1748_vm13, %vm1820_vm0  ;;  %vm10667_vm13 = vnez %v10422_v39  ;;  %vm10668_vm3 = vnez %v10424_v22  ;;  %v10698_v52 = vld [vmem:[#allocation107_spill] sm:$0xff] }
 0x3f0   : > { %vm1853_vm6 = vmor %vm1749_vm4, %vm1821_vm10  ;;  %vm2128_vm15 = vcmp.eq.f32.partialorder %v2057_v42, %v8173_v9  ;;  %vm2094_vm0 = vcmp.gt.f32.partialorder %v2057_v42, %v8173_v9 }
 0x3f1   : > { %vm1890_vm8 = vmand %vm10665_vm14, %vm1852_vm1  ;;  %vm10671_vm14 = vnez %v10459_v1 }
 0x3f2   : > { %vm1891_vm2 = vmand %vm10666_vm7, %vm1853_vm6  ;;  %v1922_v51 = vsel %vm1890_vm8, 1, %v9243_v41  ;;  %vm10669_vm8 = vnez %v10455_v49 }
 0x3f3   : > { %v1923_v43 = vsel %vm1891_vm2, 1, %v9243_v41  ;;  %v1954_v18 = vadd.s32 %v1922_v51, %v1609_v25  ;;  %vm2165_vm10 = vmand %vm10667_vm13, %vm2127_vm9  ;;  %vm1100_vm2 = vcmp.eq.f32.partialorder %v10670_v48, %v8311_v11  ;;  %vm10699_vm13 = vcmp.lt.s32.totalorder %v3228_v31, 125 }
 0x3f4   : > { %v1955_v53 = vadd.s32 %v1923_v43, %v1610_v10  ;;  %vm2166_vm4 = vmand %vm10668_vm3, %vm2128_vm15  ;;  %vm1101_vm15 = vcmp.eq.f32.partialorder %v10672_v55, %v8319_v59  ;;  %v1355_v46 = vsel %vm10699_vm13, %v10698_v52, %v10697_v33 }
 0x3f5   : > { %vm2197_vm6 = vmor %vm2093_vm12, %vm2165_vm10  ;;  %vm10673_vm12 = vnez %v10566_v19  ;;  %vm1066_vm10 = vcmp.gt.f32.partialorder %v10670_v48, %v8311_v11  ;;  %v2027_v48 = vpop.permute.xlu1 %2026 }
 0x3f6   : > { %vm2198_vm1 = vmor %vm2094_vm0, %vm2166_vm4 }
 0x3f7   : > { %vm2235_vm7 = vmand %vm10669_vm8, %vm2197_vm6  ;;  %vm1067_vm6 = vcmp.gt.f32.partialorder %v10672_v55, %v8319_v59  ;;  %v10717_v55 = vld [vmem:[#allocation60_spill] sm:$0xff] }
 0x3f8   : > { %vm2236_vm11 = vmand %vm10671_vm14, %vm2198_vm1  ;;  %v2267_v9 = vsel %vm2235_vm7, 1, %v9243_v41  ;;  %vm10676_vm7 = vcmp.lt.s32.totalorder %v3228_v31, 1 }
 0x3f9   : > { %v2268_v26 = vsel %vm2236_vm11, 1, %v9243_v41  ;;  %v2299_v40 = vadd.s32 %v2267_v9, %v1954_v18  ;;  %vm1138_vm9 = vmand %vm10640_vm5, %vm1100_vm2  ;;  %v368_v37 = vsel %vm10676_vm7, %v10675_v14, %v10674_v17  ;;  %vm10688_vm5 = vcmp.lt.s32.totalorder %v3228_v31, 2 }
 0x3fa   : > { %v2300_v63 = vadd.s32 %v2268_v26, %v1955_v53  ;;  %vm1139_vm0 = vmand %vm10673_vm12, %vm1101_vm15  ;;  %v681_v35 = vsel %vm10688_vm5, %v10687_v20, %v10686_v62  ;;  %v10719_v26 = vld [vmem:[#allocation47_spill] sm:$0xff] }
 0x3fb   : > { %vm2331_vm4 = vcmp.lt.s32.totalorder %v2299_v40, 2  ;;  %vm10677_vm11 = vmmov %vm10676_vm7  ;;  %vm442_vm7 = vcmp.eq.f32.partialorder %v368_v37, %v8311_v11 }
 0x3fc   : > { %v352_v30 = vsel %vm10677_vm11, %v10674_v17, %v10675_v14  ;;  %vm2332_vm1 = vcmp.lt.s32.totalorder %v2300_v63, 2  ;;  %v2395_v58 = vsel %vm2331_vm4, %v2363_v16, 0.0  ;;  %vm8342_vm2 = vmor %vm1066_vm10, %vm1138_vm9  ;;  %vm10682_vm11 = vnez %v10578_v23  ;;  %v10721_v63 = vld [vmem:[#allocation77_spill] sm:$0xff] }
 0x3fd   : > { %v2396_v45 = vsel %vm2332_vm1, %v2364_v47, 0.0  ;;  %vm8346_vm15 = vmor %vm1067_vm6, %vm1139_vm0  ;;  %vm443_vm12 = vcmp.eq.f32.partialorder %v352_v30, %v8319_v59  ;;  %vm10683_vm9 = vnez %v10520_v44  ;;  %vm408_vm4 = vcmp.gt.f32.partialorder %v368_v37, %v8311_v11 }
 0x3fe   : > { %v10681_v21 = vsel %vm8346_vm15, 4294967295, %v10680_v21  ;;  %v2417_v29 = vpack.c.bf16 %v2396_v45, %v2395_v58  ;;  %vm480_vm10 = vmand %vm10683_vm9, %vm442_vm7  ;;  %vm10685_vm1 = vnez %v10524_v0  ;;  %vm409_vm8 = vcmp.gt.f32.partialorder %v352_v30, %v8319_v59 }
 0x3ff   : > { %vm481_vm14 = vmand %vm10685_vm1, %vm443_vm12  ;;  %vm10700_vm1 = vnez %v10587_v50 }
 0x400   : > { %2433 = vst [vmem:[%s7669_s5 + $0x50] sm:$0xff] %v2417_v29  ;;  %vm8371_vm3 = vmor %vm408_vm4, %vm480_vm10  ;;  %v10730_v29 = vld [vmem:[#allocation35_spill] sm:$0xff] }
 0x401   : > { %v10690_v54 = vsel %vm8371_vm3, 4294967295, %v10689_v54  ;;  %vm10691_vm7 = vmmov %vm10688_vm5  ;;  %vm755_vm5 = vcmp.eq.f32.partialorder %v681_v35, %v8311_v11 }
 0x402   : > { %v665_v5 = vsel %vm10691_vm7, %v10686_v62, %v10687_v20  ;;  %vm8379_vm6 = vmor %vm409_vm8, %vm481_vm14  ;;  %vm10696_vm7 = vnez %v10582_v38  ;;  %vm721_vm8 = vcmp.gt.f32.partialorder %v681_v35, %v8311_v11  ;;  %v8501_v35 = vld [vmem:[%s3072_s0 + $0xd8] sm:$0xff] }
 0x403   : > { %v10693_v15 = vsel %vm8379_vm6, 4294967295, %v10692_v15  ;;  %vm756_vm9 = vcmp.eq.f32.partialorder %v665_v5, %v8319_v59  ;;  %vm793_vm14 = vmand %vm10696_vm7, %vm755_vm5  ;;  %vm722_vm0 = vcmp.gt.f32.partialorder %v665_v5, %v8319_v59  ;;  %vm1445_vm5 = vcmp.eq.f32.partialorder %v1355_v46, %v8311_v11 }
 0x404   : > { %vm794_vm15 = vmand %vm10700_vm1, %vm756_vm9  ;;  %vm10702_vm7 = vnez %v10590_v28  ;;  %vm10704_vm9 = vnez %v10564_v2  ;;  %vm10726_vm1 = vnez %v10481_v61 }
 0x405   : > { %vm10701_vm4 = vmmov %vm10699_vm13 }
 0x406   : > { %v1371_v8 = vsel %vm10701_vm4, %v10697_v33, %v10698_v52  ;;  %vm825_vm6 = vmor %vm721_vm8, %vm793_vm14  ;;  %vm10705_vm4 = vnez %v10690_v54  ;;  %vm10709_vm8 = vnez %v10681_v21  ;;  %v10729_v21 = vld [vmem:[#allocation31_spill] sm:$0xff]  ;;  %v2371_v54 = vld [vmem:[%s3065_s27 + $0xe0] sm:$0xff] }
 0x407   : > { %vm826_vm10 = vmor %vm722_vm0, %vm794_vm15  ;;  %vm1446_vm12 = vcmp.eq.f32.partialorder %v1371_v8, %v8319_v59  ;;  %vm10707_vm0 = vnez %v10595_v27  ;;  %v2372_v33 = vld [vmem:[%s3065_s27 + $0xe8] sm:$0xff] }
 0x408   : > { %vm863_vm3 = vmand %vm10702_vm7, %vm825_vm6  ;;  %vm10708_vm6 = vnez %v10580_v6 }
 0x409   : > { %vm10703_vm13 = vmand %vm10682_vm11, %vm8342_vm2  ;;  %v895_v34 = vsel %vm863_vm3, 1, %v9243_v41  ;;  %vm10711_vm2 = vnez %v10568_v56 }
 0x40a   : > { %v1240_v25 = vsel %vm10703_vm13, 1, %v9243_v41  ;;  %vm10706_vm15 = vmand %vm10704_vm9, %vm10705_vm4  ;;  %vm10712_vm13 = vnez %v10693_v15  ;;  %vm1411_vm4 = vcmp.gt.f32.partialorder %v1355_v46, %v8311_v11  ;;  %v10737_v46 = vld [vmem:[#allocation48_spill] sm:$0xff] }
 0x40b   : > { %v582_v60 = vsel %vm10706_vm15, 1, %v9243_v41  ;;  %vm864_vm14 = vmand %vm10707_vm0, %vm826_vm10  ;;  %vm10714_vm10 = vnez %v10531_v12  ;;  %vm10715_vm15 = vnez %v10533_v32  ;;  %vm1790_vm0 = vcmp.eq.f32.partialorder %v10717_v55, %v8311_v11 }
 0x40c   : > { %vm10710_vm7 = vmand %vm10708_vm6, %vm10709_vm8  ;;  %v896_v51 = vsel %vm864_vm14, 1, %v9243_v41  ;;  %v927_v43 = vadd.s32 %v895_v34, %v582_v60  ;;  %v10740_v60 = vmov 0  ;;  %v10743_v34 = vmov 0 }
 0x40d   : > { %v1241_v10 = vsel %vm10710_vm7, 1, %v9243_v41  ;;  %vm10713_vm11 = vmand %vm10711_vm2, %vm10712_vm13  ;;  %vm1412_vm7 = vcmp.gt.f32.partialorder %v1371_v8, %v8319_v59  ;;  %v10738_v8 = vld [vmem:[#allocation71_spill] sm:$0xff] }
 0x40e   : > { %v583_v42 = vsel %vm10713_vm11, 1, %v9243_v41  ;;  %vm1483_vm3 = vmand %vm10714_vm10, %vm1445_vm5  ;;  %v1272_v53 = vadd.s32 %v1240_v25, %v927_v43  ;;  %vm10716_vm11 = vnez %v10539_v4  ;;  %vm10718_vm5 = vnez %v10541_v13  ;;  %v10760_v43 = vld [vmem:[#allocation125_spill] sm:$0xff] }
 0x40f   : > { %v928_v18 = vadd.s32 %v896_v51, %v583_v42  ;;  %vm1484_vm8 = vmand %vm10715_vm15, %vm1446_vm12  ;;  %vm1791_vm12 = vcmp.eq.f32.partialorder %v10719_v26, %v8319_v59  ;;  %v10748_v51 = vld [vmem:[#allocation95_spill] sm:$0xff] }
 0x410   : > { %vm1515_vm6 = vmor %vm1411_vm4, %vm1483_vm3  ;;  %vm10720_vm3 = vnez %v10349_v24 }
 0x411   : > { %v1273_v9 = vadd.s32 %v1241_v10, %v928_v18  ;;  %vm1516_vm13 = vmor %vm1412_vm7, %vm1484_vm8  ;;  %vm1756_vm8 = vcmp.gt.f32.partialorder %v10717_v55, %v8311_v11  ;;  %vm10723_vm7 = vnez %v10351_v36 }
 0x412   : > { %vm1553_vm14 = vmand %vm10716_vm11, %vm1515_vm6  ;;  %vm10722_vm6 = vcmp.lt.s32.totalorder %v3228_v31, 127 }
 0x413   : > { %vm1554_vm10 = vmand %vm10718_vm5, %vm1516_vm13  ;;  %v1585_v16 = vsel %vm1553_vm14, 1, %v9243_v41  ;;  %v2045_v17 = vsel %vm10722_vm6, %v10721_v63, %v2027_v48 }
 0x414   : > { %v1586_v40 = vsel %vm1554_vm10, 1, %v9243_v41  ;;  %v1617_v47 = vadd.s32 %v1585_v16, %v1272_v53  ;;  %vm1828_vm4 = vmand %vm10720_vm3, %vm1790_vm0  ;;  %vm1757_vm10 = vcmp.gt.f32.partialorder %v10719_v26, %v8319_v59  ;;  %vm2135_vm3 = vcmp.eq.f32.partialorder %v2045_v17, %v8311_v11  ;;  %v10762_v53 = vld [vmem:[#allocation126_spill] sm:$0xff]  ;;  %v2025_v16 = vpop.permute.xlu0 %2024 }
 0x415   : > { %v1618_v14 = vadd.s32 %v1586_v40, %v1273_v9  ;;  %vm1829_vm13 = vmand %vm10723_vm7, %vm1791_vm12  ;;  %vm10747_vm7 = vnez %v10590_v28  ;;  %v10766_v9 = vld [vmem:[#allocation124_spill] sm:$0xff] }
 0x416   : > { %vm10724_vm14 = vmmov %vm10722_vm6  ;;  %vm10725_vm6 = vnez %v10391_v7 }
 0x417   : > { %v2061_v37 = vsel %vm10724_vm14, %v2027_v48, %v10721_v63  ;;  %vm1860_vm5 = vmor %vm1756_vm8, %vm1828_vm4  ;;  %vm2101_vm14 = vcmp.gt.f32.partialorder %v2045_v17, %v8311_v11  ;;  %vm10727_vm8 = vnez %v10422_v39 }
 0x418   : > { %vm1861_vm0 = vmor %vm1757_vm10, %vm1829_vm13  ;;  %vm2136_vm15 = vcmp.eq.f32.partialorder %v2061_v37, %v8319_v59  ;;  %vm2102_vm4 = vcmp.gt.f32.partialorder %v2061_v37, %v8319_v59  ;;  %vm10728_vm13 = vnez %v10424_v22  ;;  %v8494_v59 = vld [vmem:[%s3072_s0 + $0xd0] sm:$0xff]  ;;  %s2837_s0 = sshra.s32 %s2458_s7, 4  ;;  %s2838_s0 = int_to_ptr.hbm [resolvable:$true] %s2837_s0 }
 0x419   : > { %vm1898_vm11 = vmand %vm10725_vm6, %vm1860_vm5  ;;  %vm10733_vm6 = vnez %v10455_v49  ;;  %s2839_s29 = scalar_lea.hbm %s2838_s0, 128  ;;  %p2844_p7 = scmp.lt.s32.totalorder %s2838_s0, %s8692_s2 }
 0x41a   : > { %vm1899_vm12 = vmand %vm10726_vm1, %vm1861_vm0  ;;  %v1930_v30 = vsel %vm1898_vm11, 1, %v9243_v41  ;;  %vm10731_vm11 = vcmp.lt.s32.totalorder %v3228_v31, 1  ;;  %p2840_p4 = scmp.ne.s32.totalorder %s2838_s0, %s2839_s29  ;;  %p2845_p8 = scmp.lt.s32.totalorder %s2843_s3, %s2839_s29 }
 0x41b   : > { %v1931_v58 = vsel %vm1899_vm12, 1, %v9243_v41  ;;  %v1962_v57 = vadd.s32 %v1930_v30, %v1617_v47  ;;  %vm2173_vm5 = vmand %vm10727_vm8, %vm2135_vm3  ;;  %v367_v62 = vsel %vm10731_vm11, %v10730_v29, %v10729_v21  ;;  %v10772_v47 = vld [vmem:[#allocation38_spill] sm:$0xff] }
 0x41c   : > { %v1963_v45 = vadd.s32 %v1931_v58, %v1618_v14  ;;  %vm2174_vm10 = vmand %vm10728_vm13, %vm2136_vm15  ;;  %vm440_vm15 = vcmp.eq.f32.partialorder %v367_v62, %v8494_v59  ;;  %vm10734_vm13 = vnez %v10459_v1  ;;  %v2370_v14 = vld [vmem:[%s3065_s27 + $0xd8] sm:$0xff]  ;;  %p2841_p5 = pnand %p2840_p4, %p3020_p9  ;;  %p2846_p10 = por %p2845_p8, %p2844_p7 }
 0x41d   : > { %vm2205_vm0 = vmor %vm2101_vm14, %vm2173_vm5 }
 0x41e   : > { %vm10732_vm12 = vmmov %vm10731_vm11  ;;  %vm10736_vm11 = vnez %v10524_v0  ;;  %p2842_p6 = pneg %p2841_p5 }
 0x41f   : > { %v351_v11 = vsel %vm10732_vm12, %v10729_v21, %v10730_v29  ;;  %vm2206_vm1 = vmor %vm2102_vm4, %vm2174_vm10  ;;  %vm10735_vm4 = vnez %v10520_v44  ;;  %vm406_vm10 = vcmp.gt.f32.partialorder %v367_v62, %v8494_v59  ;;  %vm10739_vm12 = vcmp.lt.s32.totalorder %v3228_v31, 2 }
 0x420   : > { %vm2243_vm3 = vmand %vm10733_vm6, %vm2205_vm0  ;;  %vm441_vm14 = vcmp.eq.f32.partialorder %v351_v11, %v8501_v35  ;;  %vm407_vm0 = vcmp.gt.f32.partialorder %v351_v11, %v8501_v35  ;;  %v680_v25 = vsel %vm10739_vm12, %v10738_v8, %v10737_v46  ;;  %p2847_p11 = pnand %p2846_p10, %p2842_p6 }
 0x421   : > { %vm2244_vm8 = vmand %vm10734_vm13, %vm2206_vm1  ;;  %v2275_v20 = vsel %vm2243_vm3, 1, %v9243_v41 }
 0x422   : > { %v2276_v5 = vsel %vm2244_vm8, 1, %v9243_v41  ;;  %v2307_v15 = vadd.s32 %v2275_v20, %v1962_v57  ;;  %vm478_vm5 = vmand %vm10735_vm4, %vm440_vm15 }
 0x423   : > { %v2308_v52 = vadd.s32 %v2276_v5, %v1963_v45  ;;  %vm479_vm1 = vmand %vm10736_vm11, %vm441_vm14  ;;  %vm1098_vm11 = vcmp.eq.f32.partialorder %v10748_v51, %v8494_v59 }
 0x424   : > { %vm2339_vm8 = vcmp.lt.s32.totalorder %v2307_v15, 2  ;;  %vm8517_vm3 = vmor %vm406_vm10, %vm478_vm5  ;;  %vm753_vm10 = vcmp.eq.f32.partialorder %v680_v25, %v8494_v59 }
 0x425   : > { %v10741_v60 = vsel %vm8517_vm3, 4294967295, %v10740_v60  ;;  %vm10742_vm15 = vmmov %vm10739_vm12  ;;  %vm2340_vm4 = vcmp.lt.s32.totalorder %v2308_v52, 2  ;;  %v2403_v0 = vsel %vm2339_vm8, %v2371_v54, 0.0  ;;  %vm719_vm8 = vcmp.gt.f32.partialorder %v680_v25, %v8494_v59 }
 0x426   : > { %v664_v44 = vsel %vm10742_vm15, %v10737_v46, %v10738_v8  ;;  %vm8525_vm14 = vmor %vm407_vm0, %vm479_vm1  ;;  %v2404_v10 = vsel %vm2340_vm4, %v2372_v33, 0.0  ;;  %vm10745_vm1 = vnez %v10582_v38  ;;  %vm10746_vm15 = vnez %v10587_v50  ;;  %v10750_v38 = vld [vmem:[#allocation94_spill] sm:$0xff] }
 0x427   : > { %v10744_v34 = vsel %vm8525_vm14, 4294967295, %v10743_v34  ;;  %v2421_v42 = vpack.c.bf16 %v2404_v10, %v2403_v0  ;;  %vm754_vm12 = vcmp.eq.f32.partialorder %v664_v44, %v8501_v35  ;;  %vm791_vm0 = vmand %vm10745_vm1, %vm753_vm10  ;;  %vm720_vm5 = vcmp.gt.f32.partialorder %v664_v44, %v8501_v35 }
 0x428   : > { %vm792_vm4 = vmand %vm10746_vm15, %vm754_vm12  ;;  %vm10749_vm14 = vnez %v10595_v27  ;;  %vm1099_vm10 = vcmp.eq.f32.partialorder %v10750_v38, %v8501_v35  ;;  %vm10751_vm1 = vnez %v10561_v3  ;;  %vm1064_vm12 = vcmp.gt.f32.partialorder %v10748_v51, %v8494_v59 }
 0x429   : > { %2437 = vst [vmem:[%s7669_s5 + $0x70] sm:$0xff] %v2421_v42  ;;  %vm823_vm13 = vmor %vm719_vm8, %vm791_vm0  ;;  %vm10754_vm0 = vnez %v10741_v60  ;;  %vm10757_vm15 = vnez %v10744_v34 }
 0x42a   : > { %vm824_vm6 = vmor %vm720_vm5, %vm792_vm4  ;;  %vm10752_vm5 = vnez %v10566_v19 }
 0x42b   : > { %vm861_vm3 = vmand %vm10747_vm7, %vm823_vm13  ;;  %vm1065_vm13 = vcmp.gt.f32.partialorder %v10750_v38, %v8501_v35 }
 0x42c   : > { %vm862_vm2 = vmand %vm10749_vm14, %vm824_vm6  ;;  %v893_v50 = vsel %vm861_vm3, 1, %v9243_v41  ;;  %vm10753_vm14 = vnez %v10564_v2  ;;  %vm10756_vm3 = vnez %v10568_v56 }
 0x42d   : > { %vm1136_vm9 = vmand %vm10751_vm1, %vm1098_vm11  ;;  %v894_v28 = vsel %vm862_vm2, 1, %v9243_v41  ;;  %vm10761_vm1 = vnez %v10580_v6  ;;  %v10765_v6 = vld [vmem:[#allocation51_spill] sm:$0xff] }
 0x42e   : > { %vm1137_vm7 = vmand %vm10752_vm5, %vm1099_vm10  ;;  %vm10759_vm10 = vnez %v10578_v23  ;;  %vm1444_vm5 = vcmp.eq.f32.partialorder %v10762_v53, %v8501_v35 }
 0x42f   : > { %vm1168_vm6 = vmor %vm1064_vm12, %vm1136_vm9  ;;  %vm1443_vm9 = vcmp.eq.f32.partialorder %v10760_v43, %v8494_v59 }
 0x430   : > { %vm10755_vm11 = vmand %vm10753_vm14, %vm10754_vm0  ;;  %vm10764_vm14 = vnez %v10533_v32 }
 0x431   : > { %v580_v3 = vsel %vm10755_vm11, 1, %v9243_v41  ;;  %vm1169_vm8 = vmor %vm1065_vm13, %vm1137_vm7  ;;  %vm10763_vm7 = vnez %v10531_v12  ;;  %vm1410_vm11 = vcmp.gt.f32.partialorder %v10762_v53, %v8501_v35 }
 0x432   : > { %vm10758_vm4 = vmand %vm10756_vm3, %vm10757_vm15  ;;  %v925_v27 = vadd.s32 %v893_v50, %v580_v3 }
 0x433   : > { %v581_v19 = vsel %vm10758_vm4, 1, %v9243_v41  ;;  %vm1206_vm2 = vmand %vm10759_vm10, %vm1168_vm6  ;;  %vm1409_vm6 = vcmp.gt.f32.partialorder %v10760_v43, %v8494_v59  ;;  %vm10769_vm10 = vnez %v10539_v4 }
 0x434   : > { %v926_v2 = vadd.s32 %v894_v28, %v581_v19  ;;  %vm1207_vm12 = vmand %vm10761_vm1, %vm1169_vm8  ;;  %v1238_v18 = vsel %vm1206_vm2, 1, %v9243_v41  ;;  %vm10767_vm8 = vcmp.lt.s32.totalorder %v3228_v31, 126  ;;  %vm10770_vm1 = vnez %v10541_v13 }
 0x435   : > { %v1239_v56 = vsel %vm1207_vm12, 1, %v9243_v41  ;;  %v1270_v48 = vadd.s32 %v1238_v18, %v925_v27  ;;  %vm1481_vm13 = vmand %vm10763_vm7, %vm1443_vm9  ;;  %v1699_v55 = vsel %vm10767_vm8, %v10766_v9, %v10765_v6  ;;  %vm10771_vm7 = vnez %v10349_v24 }
 0x436   : > { %v1271_v23 = vadd.s32 %v1239_v56, %v926_v2  ;;  %vm1482_vm0 = vmand %vm10764_vm14, %vm1444_vm5  ;;  %vm1788_vm9 = vcmp.eq.f32.partialorder %v1699_v55, %v8494_v59  ;;  %vm1754_vm14 = vcmp.gt.f32.partialorder %v1699_v55, %v8494_v59 }
 0x437   : > { %vm1513_vm3 = vmor %vm1409_vm6, %vm1481_vm13  ;;  %vm10773_vm6 = vcmp.lt.s32.totalorder %v3228_v31, 127 }
 0x438   : > { %vm10768_vm15 = vmmov %vm10767_vm8  ;;  %v2044_v4 = vsel %vm10773_vm6, %v10772_v47, %v2025_v16 }
 0x439   : > { %v1715_v12 = vsel %vm10768_vm15, %v10765_v6, %v10766_v9  ;;  %vm1514_vm4 = vmor %vm1410_vm11, %vm1482_vm0  ;;  %vm10774_vm0 = vnez %v10351_v36 }
 0x43a   : > { %vm1551_vm2 = vmand %vm10769_vm10, %vm1513_vm3  ;;  %vm1789_vm5 = vcmp.eq.f32.partialorder %v1715_v12, %v8501_v35  ;;  %vm1755_vm3 = vcmp.gt.f32.partialorder %v1715_v12, %v8501_v35  ;;  %vm2133_vm10 = vcmp.eq.f32.partialorder %v2044_v4, %v8494_v59 }
 0x43b   : > { %vm1552_vm12 = vmand %vm10770_vm1, %vm1514_vm4  ;;  %v1583_v32 = vsel %vm1551_vm2, 1, %v9243_v41  ;;  %vm10776_vm2 = vnez %v10391_v7 }
 0x43c   : > { %v1584_v26 = vsel %vm1552_vm12, 1, %v9243_v41  ;;  %v1615_v40 = vadd.s32 %v1583_v32, %v1270_v48  ;;  %vm1826_vm13 = vmand %vm10771_vm7, %vm1788_vm9  ;;  %vm10777_vm12 = vnez %v10481_v61  ;;  %vm2099_vm7 = vcmp.gt.f32.partialorder %v2044_v4, %v8494_v59 }
 0x43d   : > { %v1616_v63 = vadd.s32 %v1584_v26, %v1271_v23  ;;  %vm1827_vm11 = vmand %vm10774_vm0, %vm1789_vm5  ;;  %vm10779_vm0 = vnez %v10424_v22 }
 0x43e   : > { %vm10775_vm8 = vmmov %vm10773_vm6  ;;  %vm10778_vm6 = vnez %v10422_v39  ;;  %v2369_v39 = vld [vmem:[%s3065_s27 + $0xd0] sm:$0xff] }
 0x43f   : > { %v2060_v13 = vsel %vm10775_vm8, %v2025_v16, %v10772_v47  ;;  %vm1858_vm15 = vmor %vm1754_vm14, %vm1826_vm13 }
 0x440   : > { %vm1859_vm4 = vmor %vm1755_vm3, %vm1827_vm11  ;;  %vm2134_vm1 = vcmp.eq.f32.partialorder %v2060_v13, %v8501_v35  ;;  %vm2100_vm13 = vcmp.gt.f32.partialorder %v2060_v13, %v8501_v35 }
 0x441   : > { %vm1896_vm9 = vmand %vm10776_vm2, %vm1858_vm15  ;;  %vm10780_vm15 = vnez %v10455_v49  ;;  %vm10781_vm2 = vnez %v10459_v1 }
 0x442   : > { %vm1897_vm5 = vmand %vm10777_vm12, %vm1859_vm4  ;;  %v1928_v24 = vsel %vm1896_vm9, 1, %v9243_v41 }
 0x443   : > { %v1929_v31 = vsel %vm1897_vm5, 1, %v9243_v41  ;;  %v1960_v36 = vadd.s32 %v1928_v24, %v1615_v40  ;;  %vm2171_vm14 = vmand %vm10778_vm6, %vm2133_vm10 }
 0x444   : > { %v1961_v7 = vadd.s32 %v1929_v31, %v1616_v63  ;;  %vm2172_vm11 = vmand %vm10779_vm0, %vm2134_vm1 }
 0x445   : > { %vm2203_vm8 = vmor %vm2099_vm7, %vm2171_vm14 }
 0x446   : > { %vm2204_vm3 = vmor %vm2100_vm13, %vm2172_vm11 }
 0x447   : > { %vm2241_vm4 = vmand %vm10780_vm15, %vm2203_vm8 }
 0x448   : > { %vm2242_vm9 = vmand %vm10781_vm2, %vm2204_vm3  ;;  %v2273_v61 = vsel %vm2241_vm4, 1, %v9243_v41 }
 0x449   : > { %v2274_v22 = vsel %vm2242_vm9, 1, %v9243_v41  ;;  %v2305_v17 = vadd.s32 %v2273_v61, %v1960_v36 }
 0x44a   : > { %v2306_v49 = vadd.s32 %v2274_v22, %v1961_v7 }
 0x44b   : > { %vm2337_vm10 = vcmp.lt.s32.totalorder %v2305_v17, 2 }
 0x44c   : > { %vm2338_vm1 = vcmp.lt.s32.totalorder %v2306_v49, 2  ;;  %v2401_v1 = vsel %vm2337_vm10, %v2369_v39, 0.0 }
 0x44d   : > { %v2402_v37 = vsel %vm2338_vm1, %v2370_v14, 0.0 }
 0x44e   : > { %v2420_v30 = vpack.c.bf16 %v2402_v37, %v2401_v1 }
 0x450   : > { %2436 = vst [vmem:[%s7669_s5 + $0x68] sm:$0xff] %v2420_v30 }
 0x451   : > { %2850 = shalt.err (!%p2847_p11)
}
 0x452   : > { %s2937_s15 = smov 128   ;;  %s2938_s6 = smov 256  }
 0x453   : > { %s2939_s4 = smov 8  }
 0x454   : > { %2606 = dma.vmem_to_hbm [thread:$0]  (%p3020_p9), %s2456_s20, 2048, %s2458_s7, %s2440_s19, %s2937_s15, %s2938_s6, %s2939_s4  }
 0x455 PF: > { %p2620_p13 = scmp.ge.s32.totalorder %s2925_s16, 2  ;;  %s2472_s5 = sand.u32 1, %s2897_s9  }
 0x456   : > { %s2473_s23 = scalar_lea.sflag [#allocation4], %s2472_s5 }
 0x457   : > { %p2616_p0 = pnand %p2620_p13, %p3026_p12 }
 0x459   : > { %p2617_p1 = pneg %p2616_p0 }
 0x45b   : > { %2892 = dma.done.wait (%p2617_p1), %s2473_s23, 2048  }
 0x45c   : > { %2894 = vsyncadd (%p2617_p1), %s2473_s23, 4294965248  ;;  %s21_s16 = sadd.s32 1, %s2925_s16   ;;  %s10782_s13 = sld [smem:[#allocation11_spill]] }
 0x45d   : > { %p18_p2 = scmp.ge.s32.totalorder %s21_s16, 6   ;;  %s10783_s25 = sld [smem:[#allocation12_spill]] }
 0x45e   : > { %s10784_s15 = sld [smem:[#allocation13_spill]]  ;;  %s10785_s9 = smov %s2901_s10 }
 0x45f   : > { %s10786_s10 = smov %s2905_s11  ;;  %s10787_s11 = smov %s3035_s30 }
 0x460   : > { %s10788_s12 = smov %s2917_s14  ;;  %20 = sbr.rel (!%p18_p2) target bundleno = 11 (0xb), region = 86 }
 0x463   : > { %s10789_s14 = smov %s10783_s25 }
 0x465   :  { %2479 = vsyncpa [#allocation3], 1 }
 0x466   :  { %2481 = vsyncpa [#allocation3 + $0x1], 1 }
 0x467   :  { %2482 = vsyncpa [#allocation6], 1 }
 0x468   :  { %2484 = vsyncpa [#allocation6 + $0x1], 1 }
 0x469   :  { %2485 = vsyncpa [#allocation4], 1 }
 0x46a   :  { %2487 = vsyncpa [#allocation4 + $0x1], 1 }

</bundles_post_ra>
